<compile_context>
chip_gen: v7x
topology: tpu7x:2x2x1
jax: 0.10.0
libtpu: 0.0.40
codegen_flags: <defaults>
</compile_context>

<pallas_src>
import functools
import math

import jax
import jax.numpy as jnp
from jax.experimental import pallas as pl
from jax.experimental.pallas import tpu as pltpu

# ---------------------------------------------------------------------------
# constants (match PyTorch defaults in the reference module)
# ---------------------------------------------------------------------------
LEAKY_SLOPE = 0.01          # nn.LeakyReLU() default negative_slope
IN_EPS = 1e-5               # nn.InstanceNorm2d default eps
ADAIN_HIDDEN = 128          # nhidden inside ADAIN.mlp_shared
CONV_COMPUTE_DTYPE = jnp.float32   # set to jnp.bfloat16 on v6e/v7x for MXU-native GEMMs


# ---------------------------------------------------------------------------
# tiling helpers
# ---------------------------------------------------------------------------
def _row_tile(rows, lanes, itemsize=4, vmem_budget=4 << 20):
    """Largest multiple-of-8 row block dividing `rows` that fits the VMEM budget
    and leaves >=2 grid steps (so the 'parallel' axis can shard across TCs)."""
    if rows % 8 != 0:
        return rows
    max_rows = max(8, vmem_budget // max(1, lanes * itemsize))
    target = min(rows // 2 if rows >= 16 else rows, max_rows)
    t = (target // 8) * 8
    while t >= 8:
        if rows % t == 0:
            return t
        t -= 8
    return rows


def _k_tile(k, lanes, itemsize=4, vmem_budget=4 << 20):
    """Reduction-axis tile for the conv GEMM: full K when it fits VMEM, otherwise
    the largest multiple-of-8 divisor within the budget."""
    max_k = max(8, vmem_budget // max(1, lanes * itemsize))
    if k <= max_k or k % 8 != 0:
        return k
    t = (max_k // 8) * 8
    while t >= 8:
        if k % t == 0:
            return t
        t -= 8
    return k


# ---------------------------------------------------------------------------
# Kernel 1: fused InstanceNorm + AdaIN modulation + LeakyReLU
# ---------------------------------------------------------------------------
def _adain_lrelu_kernel(x_ref, scale_ref, shift_ref, o_ref, *, eps, slope):
    # x_ref: (rows, H*W)  -- lane axis is spatial (lane-dense at real sizes)
    x = x_ref[...].astype(jnp.float32)
    mean = jnp.mean(x, axis=1, keepdims=True)
    mean_sq = jnp.mean(x * x, axis=1, keepdims=True)
    var = mean_sq - mean * mean                       # single-sweep biased variance
    inv = jax.lax.rsqrt(var + eps)
    y = (x - mean) * inv * scale_ref[...] + shift_ref[...]
    y = jnp.where(y >= 0, y, slope * y)               # fused LeakyReLU
    o_ref[...] = y.astype(o_ref.dtype)


def adain_leakyrelu(x2d, scale, shift, out_dtype=jnp.float32):
    rows, lanes = x2d.shape
    br = _row_tile(rows, lanes)
    kernel = functools.partial(_adain_lrelu_kernel, eps=IN_EPS, slope=LEAKY_SLOPE)
    return pl.pallas_call(
        kernel,
        out_shape=jax.ShapeDtypeStruct((rows, lanes), out_dtype),
        grid=(rows // br,),
        in_specs=[
            pl.BlockSpec((br, lanes), lambda r: (r, 0)),
            pl.BlockSpec((br, 1), lambda r: (r, 0)),
            pl.BlockSpec((br, 1), lambda r: (r, 0)),
        ],
        out_specs=pl.BlockSpec((br, lanes), lambda r: (r, 0)),
        compiler_params=pltpu.CompilerParams(dimension_semantics=("parallel",)),
    )(x2d, scale, shift)


# ---------------------------------------------------------------------------
# Kernel 2: conv / conv-transpose as a single im2col GEMM (bias + residual fused)
# ---------------------------------------------------------------------------
def _conv_gemm_kernel(p_ref, w_ref, b_ref, o_ref, acc_ref):
    k = pl.program_id(1)

    @pl.when(k == 0)
    def _():
        acc_ref[...] = jnp.zeros_like(acc_ref)

    acc_ref[...] += jnp.dot(w_ref[...], p_ref[0],
                            preferred_element_type=jnp.float32)

    @pl.when(k == pl.num_programs(1) - 1)
    def _():
        o_ref[0] = (acc_ref[...] + b_ref[...]).astype(o_ref.dtype)


def _conv_gemm_residual_kernel(p_ref, w_ref, b_ref, r_ref, o_ref, acc_ref):
    k = pl.program_id(1)

    @pl.when(k == 0)
    def _():
        acc_ref[...] = jnp.zeros_like(acc_ref)

    acc_ref[...] += jnp.dot(w_ref[...], p_ref[0],
                            preferred_element_type=jnp.float32)

    @pl.when(k == pl.num_programs(1) - 1)
    def _():
        o_ref[0] = (acc_ref[...] + b_ref[...]
                    + r_ref[0].astype(jnp.float32)).astype(o_ref.dtype)


def _conv_gemm(patches, w2, bias2, residual=None, out_dtype=jnp.float32):
    # patches: (N, K, Msp)   w2: (Cout, K)   bias2: (Cout, 1)  residual: (N, Cout, Msp)
    n, K, msp = patches.shape
    cout = w2.shape[0]
    tk = _k_tile(K, msp)
    grid = (n, K // tk)

    in_specs = [
        pl.BlockSpec((1, tk, msp), lambda i, k: (i, k, 0)),
        pl.BlockSpec((cout, tk), lambda i, k: (0, k)),
        pl.BlockSpec((cout, 1), lambda i, k: (0, 0)),
    ]
    args = [patches, w2, bias2]
    if residual is not None:
        in_specs.append(pl.BlockSpec((1, cout, msp), lambda i, k: (i, 0, 0)))
        args.append(residual)
        kernel = _conv_gemm_residual_kernel
    else:
        kernel = _conv_gemm_kernel

    return pl.pallas_call(
        kernel,
        out_shape=jax.ShapeDtypeStruct((n, cout, msp), out_dtype),
        grid=grid,
        in_specs=in_specs,
        out_specs=pl.BlockSpec((1, cout, msp), lambda i, k: (i, 0, 0)),
        scratch_shapes=[pltpu.VMEM((cout, msp), jnp.float32)],
        compiler_params=pltpu.CompilerParams(
            dimension_semantics=("parallel", "arbitrary")),
    )(*args)


def _im2col(x_pad, kh, kw, stride, ho, wo):
    # x_pad: (N, Cin, Hp, Wp) -> (N, Cin*kh*kw, ho*wo), K index order = (cin, kh, kw)
    n, cin, _, _ = x_pad.shape
    taps = []
    for dh in range(kh):
        for dw in range(kw):
            taps.append(x_pad[:, :, dh:dh + (ho - 1) * stride + 1:stride,
                                    dw:dw + (wo - 1) * stride + 1:stride])
    p = jnp.stack(taps, axis=2)                        # (N, Cin, kh*kw, ho, wo)
    return p.reshape(n, cin * kh * kw, ho * wo)


def conv2d(x, w, b, stride, padding, residual=None):
    """x: (N,Cin,H,W); w: (Cout,Cin,KH,KW) PyTorch layout; b: (Cout,)."""
    n, cin, hh, ww = x.shape
    cout, _, kh, kw = w.shape
    ho = (hh + 2 * padding - kh) // stride + 1
    wo = (ww + 2 * padding - kw) // stride + 1
    xp = jnp.pad(x, ((0, 0), (0, 0), (padding, padding), (padding, padding)))
    patches = _im2col(xp, kh, kw, stride, ho, wo).astype(CONV_COMPUTE_DTYPE)
    w2 = w.reshape(cout, cin * kh * kw).astype(CONV_COMPUTE_DTYPE)
    bias2 = b.reshape(cout, 1).astype(jnp.float32)
    res = None if residual is None else residual.reshape(n, cout, ho * wo)
    out = _conv_gemm(patches, w2, bias2, res)
    return out.reshape(n, cout, ho, wo)


def conv_transpose2d(x, wt, b, stride=2, padding=1, output_padding=1, residual=None):
    """PyTorch ConvTranspose2d forward; wt: (Cin, Cout, KH, KW) PyTorch layout."""
    n, cin, hh, ww = x.shape
    _, cout, kh, kw = wt.shape
    # zero-dilate by stride, asymmetric pad, then stride-1 conv with flipped kernel
    hd, wd = (hh - 1) * stride + 1, (ww - 1) * stride + 1
    xd = jnp.zeros((n, cin, hd, wd), x.dtype).at[:, :, ::stride, ::stride].set(x)
    lo = kh - 1 - padding
    hi = kh - 1 - padding + output_padding
    xp = jnp.pad(xd, ((0, 0), (0, 0), (lo, hi), (lo, hi)))
    ho = xp.shape[2] - kh + 1
    wo = xp.shape[3] - kw + 1
    w_eq = jnp.transpose(jnp.flip(wt, axis=(2, 3)), (1, 0, 2, 3))   # (Cout,Cin,KH,KW)
    patches = _im2col(xp, kh, kw, 1, ho, wo).astype(CONV_COMPUTE_DTYPE)
    w2 = w_eq.reshape(cout, cin * kh * kw).astype(CONV_COMPUTE_DTYPE)
    bias2 = b.reshape(cout, 1).astype(jnp.float32)
    res = None if residual is None else residual.reshape(n, cout, ho * wo)
    out = _conv_gemm(patches, w2, bias2, res)
    return out.reshape(n, cout, ho, wo)


# ---------------------------------------------------------------------------
# Kernel 3: ADAIN MLP (shared Linear+ReLU, gamma/beta heads fused into one GEMM)
# ---------------------------------------------------------------------------
def _adain_mlp_kernel(z_ref, w1_ref, b1_ref, w2_ref, b2_ref, o_ref):
    h = jnp.dot(z_ref[...], w1_ref[...], preferred_element_type=jnp.float32) + b1_ref[...]
    h = jnp.maximum(h, 0.0)
    o = jnp.dot(h, w2_ref[...], preferred_element_type=jnp.float32) + b2_ref[...]
    o_ref[...] = o.astype(o_ref.dtype)


def adain_mlp(z, w1, b1, w2, b2):
    n, f = z.shape
    h = w1.shape[1]
    c2 = w2.shape[1]
    return pl.pallas_call(
        _adain_mlp_kernel,
        out_shape=jax.ShapeDtypeStruct((n, c2), jnp.float32),
        in_specs=[
            pl.BlockSpec((n, f), lambda: (0, 0)),
            pl.BlockSpec((f, h), lambda: (0, 0)),
            pl.BlockSpec((1, h), lambda: (0, 0)),
            pl.BlockSpec((h, c2), lambda: (0, 0)),
            pl.BlockSpec((1, c2), lambda: (0, 0)),
        ],
        out_specs=pl.BlockSpec((n, c2), lambda: (0, 0)),
    )(z, w1, b1, w2, b2)


# ---------------------------------------------------------------------------
# module forward (ADAIN -> actvn -> conv structure of the reference code)
# ---------------------------------------------------------------------------
def adain_actvn(x, z, p):
    """self.actvn(ADAIN(x, z)) with ADAIN's (1+gamma)/beta produced by the MLP kernel."""
    n, c, hh, ww = x.shape
    sb = adain_mlp(z, p["w1"], p["b1"], p["w2"], p["b2"])   # (N, 2C) = [1+gamma | beta]
    scale = sb[:, :c].reshape(n * c, 1)
    shift = sb[:, c:].reshape(n * c, 1)
    y = adain_leakyrelu(x.reshape(n * c, hh * ww), scale, shift, out_dtype=x.dtype)
    return y.reshape(n, c, hh, ww)


def encoder_block(x, z, p):
    y = adain_actvn(x, z, p["norm_0"])
    y = conv2d(y, p["conv_0_w"], p["conv_0_b"], stride=2, padding=1)   # 4x4 /2
    y = adain_actvn(y, z, p["norm_1"])
    y = conv2d(y, p["conv_1_w"], p["conv_1_b"], stride=1, padding=1)   # 3x3
    return y


def decoder_block(x, z, p):
    # shortcut branch
    s = adain_actvn(x, z, p["norm_s"])
    x_s = conv_transpose2d(s, p["conv_s_w"], p["conv_s_b"])
    # main branch; "out = x_s + dx" is fused into the last GEMM's epilogue
    d = adain_actvn(x, z, p["norm_0"])
    d = conv2d(d, p["conv_0_w"], p["conv_0_b"], stride=1, padding=1)
    d = adain_actvn(d, z, p["norm_1"])
    return conv_transpose2d(d, p["conv_1_w"], p["conv_1_b"], residual=x_s)


def hourglass_forward(params, x, z, *, encoder_layers, decoder_layers):
    # ---- ADAINEncoder ----
    out = conv2d(x, params["input_w"], params["input_b"], stride=1, padding=3)  # 7x7
    feats = [out]
    for i in range(encoder_layers):
        out = encoder_block(out, z, params["enc"][i])
        feats.append(out)
    # ---- ADAINDecoder (skip_connect=True, use_transpose=True) ----
    out = feats.pop()
    for i in list(range(encoder_layers - decoder_layers, encoder_layers))[::-1]:
        out = decoder_block(out, z, params["dec"][str(i)])
        out = jnp.concatenate([out, feats.pop()], axis=1)
    return out


# ---------------------------------------------------------------------------
# deterministic parameter construction (PyTorch-style uniform init)
# ---------------------------------------------------------------------------
def _init_linear(key, fan_in, fan_out):
    kw, kb = jax.random.split(key)
    bound = 1.0 / math.sqrt(fan_in)
    w = jax.random.uniform(kw, (fan_in, fan_out), jnp.float32, -bound, bound)
    b = jax.random.uniform(kb, (fan_out,), jnp.float32, -bound, bound)
    return w, b


def _init_conv(key, cin, cout, k):
    kw, kb = jax.random.split(key)
    bound = 1.0 / math.sqrt(cin * k * k)
    w = jax.random.uniform(kw, (cout, cin, k, k), jnp.float32, -bound, bound)
    b = jax.random.uniform(kb, (cout,), jnp.float32, -bound, bound)
    return w, b


def _init_conv_transpose(key, cin, cout, k):
    kw, kb = jax.random.split(key)
    bound = 1.0 / math.sqrt(cout * k * k)
    w = jax.random.uniform(kw, (cin, cout, k, k), jnp.float32, -bound, bound)
    b = jax.random.uniform(kb, (cout,), jnp.float32, -bound, bound)
    return w, b


def _init_adain(key, norm_nc, feature_nc):
    k1, k2, k3 = jax.random.split(key, 3)
    w1, b1 = _init_linear(k1, feature_nc, ADAIN_HIDDEN)
    wg, bg = _init_linear(k2, ADAIN_HIDDEN, norm_nc)
    wb, bb = _init_linear(k3, ADAIN_HIDDEN, norm_nc)
    # fuse the two heads into one (128, 2C) GEMM; fold the "+1" of (1+gamma) into the bias
    w2 = jnp.concatenate([wg, wb], axis=1)
    b2 = jnp.concatenate([bg + 1.0, bb], axis=0)
    return {"w1": w1, "b1": b1.reshape(1, -1), "w2": w2, "b2": b2.reshape(1, -1)}


def init_params(key, *, image_nc, pose_nc, ngf, img_f, encoder_layers, decoder_layers):
    keys = iter(jax.random.split(key, 64))
    params = {}
    params["input_w"], params["input_b"] = _init_conv(next(keys), image_nc, ngf, 7)

    enc = []
    for i in range(encoder_layers):
        cin = min(ngf * 2 ** i, img_f)
        cout = min(ngf * 2 ** (i + 1), img_f)
        c0w, c0b = _init_conv(next(keys), cin, cout, 4)
        c1w, c1b = _init_conv(next(keys), cout, cout, 3)
        enc.append({
            "norm_0": _init_adain(next(keys), cin, pose_nc),
            "conv_0_w": c0w, "conv_0_b": c0b,
            "norm_1": _init_adain(next(keys), cout, pose_nc),
            "conv_1_w": c1w, "conv_1_b": c1b,
        })
    params["enc"] = enc

    dec = {}
    for i in range(encoder_layers - decoder_layers, encoder_layers):
        cin = min(ngf * 2 ** (i + 1), img_f)
        if i != encoder_layers - 1:
            cin = cin * 2                       # skip_connect doubles the input channels
        cout = min(ngf * 2 ** i, img_f)
        hidden = cout
        c0w, c0b = _init_conv(next(keys), cin, hidden, 3)
        c1w, c1b = _init_conv_transpose(next(keys), hidden, cout, 3)
        csw, csb = _init_conv_transpose(next(keys), cin, cout, 3)
        dec[str(i)] = {
            "norm_0": _init_adain(next(keys), cin, pose_nc),
            "conv_0_w": c0w, "conv_0_b": c0b,
            "norm_1": _init_adain(next(keys), hidden, pose_nc),
            "conv_1_w": c1w, "conv_1_b": c1b,
            "norm_s": _init_adain(next(keys), cin, pose_nc),
            "conv_s_w": csw, "conv_s_b": csb,
        }
    params["dec"] = dec
    return params


# ---------------------------------------------------------------------------
if __name__ == "__main__":
    # ADAINHourglass(image_nc=3, pose_nc=16, ngf=8, img_f=32,
    #                encoder_layers=2, decoder_layers=2,
    #                nonlinearity=nn.LeakyReLU(), use_spect=False)
    image_nc, pose_nc, ngf, img_f = 3, 16, 8, 32
    encoder_layers, decoder_layers = 2, 2
    N, H, W = 2, 16, 16

    root = jax.random.PRNGKey(0)
    k_p, k_x, k_z = jax.random.split(root, 3)
    params = init_params(k_p, image_nc=image_nc, pose_nc=pose_nc, ngf=ngf,
                         img_f=img_f, encoder_layers=encoder_layers,
                         decoder_layers=decoder_layers)
    x = jax.random.normal(k_x, (N, image_nc, H, W), jnp.float32)
    z = jax.random.normal(k_z, (N, pose_nc), jnp.float32)

    fwd = jax.jit(functools.partial(hourglass_forward,
                                    encoder_layers=encoder_layers,
                                    decoder_layers=decoder_layers))
    out = fwd(params, x, z)
    jax.block_until_ready(out)

    expected_nc = 2 * min(ngf * 2 ** (encoder_layers - decoder_layers), img_f)
    assert out.shape == (N, expected_nc, H, W), out.shape
    print("KERNEL_OK")
</pallas_src>

<mosaic_0001>
module attributes {stable_mosaic.version = 11 : i64} {
  func.func @_conv_gemm_kernel(%arg0: i32, %arg1: i32, %arg2: memref<1x147x256xf32, #tpu.memory_space<vmem>>, %arg3: memref<8x147xf32, #tpu.memory_space<vmem>>, %arg4: memref<8x1xf32, #tpu.memory_space<vmem>>, %arg5: memref<1x8x256xf32, #tpu.memory_space<vmem>>, %arg6: memref<8x256xf32, #tpu.memory_space<vmem>>) attributes {dimension_semantics = [#tpu.dimension_semantics<parallel>, #tpu.dimension_semantics<arbitrary>], iteration_bounds = array<i64: 2, 1>, scalar_prefetch = 0 : i64, scratch_operands = 1 : i64, tpu.core_type = #tpu.core_type<tc>, window_params = [{transform_indices = @transform_0, window_bounds = array<i64: 1, 147, 256>}, {transform_indices = @transform_1, window_bounds = array<i64: 8, 147>}, {pipeline_mode = #tpu.pipeline_mode<synchronous>, transform_indices = @transform_2, window_bounds = array<i64: 8, 1>}, {transform_indices = @transform_3, window_bounds = array<i64: 1, 8, 256>}]} {
    %c0_i32 = arith.constant 0 : i32
    %0 = arith.cmpi eq, %arg1, %c0_i32 : i32
    %1 = arith.extui %0 : i1 to i32
    %c0_i32_0 = arith.constant 0 : i32
    %2 = arith.cmpi ne, %1, %c0_i32_0 : i32
    scf.if %2 {
      %cst_11 = arith.constant 0.000000e+00 : f32
      %13 = vector.broadcast %cst_11 : f32 to vector<8x256xf32>
      %c0_12 = arith.constant 0 : index
      %c0_13 = arith.constant 0 : index
      %14 = vector.load %arg6[%c0_12, %c0_13] : memref<8x256xf32, #tpu.memory_space<vmem>>, vector<8x256xf32>
      tpu.vector_store %arg6[%c0_12, %c0_13], %13 {strides = array<i32>} : memref<8x256xf32, #tpu.memory_space<vmem>>, vector<8x256xf32>,
    } else {
    }
    %c0 = arith.constant 0 : index
    %c0_1 = arith.constant 0 : index
    %3 = vector.load %arg6[%c0, %c0_1] : memref<8x256xf32, #tpu.memory_space<vmem>>, vector<8x256xf32>
    %c0_2 = arith.constant 0 : index
    %c0_3 = arith.constant 0 : index
    %4 = vector.load %arg3[%c0_2, %c0_3] : memref<8x147xf32, #tpu.memory_space<vmem>>, vector<8x147xf32>
    %c0_4 = arith.constant 0 : index
    %c0_5 = arith.constant 0 : index
    %c0_6 = arith.constant 0 : index
    %5 = vector.load %arg2[%c0_4, %c0_5, %c0_6] : memref<1x147x256xf32, #tpu.memory_space<vmem>>, vector<1x147x256xf32>
    %6 = vector.shape_cast %5 : vector<1x147x256xf32> to vector<147x256xf32>
    %cst = arith.constant dense<0.000000e+00> : vector<8x256xf32>
    %7 = tpu.matmul %4, %6, %cst {dimension_numbers = #tpu.dot_dimension_numbers<[1], [0], [0], [1], [0, 0, 1, 1], [], []>} : vector<8x147xf32>, vector<147x256xf32>, vector<8x256xf32> -> vector<8x256xf32>
    %8 = arith.addf %3, %7 : vector<8x256xf32>
    %c0_7 = arith.constant 0 : index
    %c0_8 = arith.constant 0 : index
    %9 = vector.load %arg6[%c0_7, %c0_8] : memref<8x256xf32, #tpu.memory_space<vmem>>, vector<8x256xf32>
    tpu.vector_store %arg6[%c0_7, %c0_8], %8 {strides = array<i32>} : memref<8x256xf32, #tpu.memory_space<vmem>>, vector<8x256xf32>,
    %c0_i32_9 = arith.constant 0 : i32
    %10 = arith.cmpi eq, %arg1, %c0_i32_9 : i32
    %11 = arith.extui %10 : i1 to i32
    %c0_i32_10 = arith.constant 0 : i32
    %12 = arith.cmpi ne, %11, %c0_i32_10 : i32
    scf.if %12 {
      %c0_11 = arith.constant 0 : index
      %c0_12 = arith.constant 0 : index
      %13 = vector.load %arg6[%c0_11, %c0_12] : memref<8x256xf32, #tpu.memory_space<vmem>>, vector<8x256xf32>
      %c0_13 = arith.constant 0 : index
      %c0_14 = arith.constant 0 : index
      %14 = vector.load %arg4[%c0_13, %c0_14] : memref<8x1xf32, #tpu.memory_space<vmem>>, vector<8x1xf32>
      %15 = vector.broadcast %14 : vector<8x1xf32> to vector<8x256xf32>
      %16 = arith.addf %13, %15 : vector<8x256xf32>
      %c0_15 = arith.constant 0 : index
      %c0_16 = arith.constant 0 : index
      %c0_17 = arith.constant 0 : index
      %17 = vector.load %arg5[%c0_15, %c0_16, %c0_17] : memref<1x8x256xf32, #tpu.memory_space<vmem>>, vector<1x8x256xf32>
      %18 = vector.shape_cast %17 : vector<1x8x256xf32> to vector<8x256xf32>
      %19 = vector.shape_cast %16 : vector<8x256xf32> to vector<1x8x256xf32>
      tpu.vector_store %arg5[%c0_15, %c0_16, %c0_17], %19 {strides = array<i32>} : memref<1x8x256xf32, #tpu.memory_space<vmem>>, vector<1x8x256xf32>,
    } else {
    }
    return
  }
  func.func @transform_0(%arg0: i32, %arg1: i32) -> (i32, i32, i32) {
    %c0_i32 = arith.constant 0 : i32
    %c0_i32_0 = arith.constant 0 : i32
    return %arg0, %arg1, %c0_i32 : i32, i32, i32
  }
  func.func @transform_1(%arg0: i32, %arg1: i32) -> (i32, i32) {
    %c0_i32 = arith.constant 0 : i32
    %c0_i32_0 = arith.constant 0 : i32
    return %c0_i32, %arg1 : i32, i32
  }
  func.func @transform_2(%arg0: i32, %arg1: i32) -> (i32, i32) {
    %c0_i32 = arith.constant 0 : i32
    %c0_i32_0 = arith.constant 0 : i32
    %c0_i32_1 = arith.constant 0 : i32
    return %c0_i32, %c0_i32_0 : i32, i32
  }
  func.func @transform_3(%arg0: i32, %arg1: i32) -> (i32, i32, i32) {
    %c0_i32 = arith.constant 0 : i32
    %c0_i32_0 = arith.constant 0 : i32
    %c0_i32_1 = arith.constant 0 : i32
    return %arg0, %c0_i32, %c0_i32_0 : i32, i32, i32
  }
}

module attributes {stable_mosaic.version = 11 : i64} {
  func.func @_adain_mlp_kernel(%arg0: memref<2x16xf32, #tpu.memory_space<vmem>>, %arg1: memref<16x128xf32, #tpu.memory_space<vmem>>, %arg2: memref<1x128xf32, #tpu.memory_space<vmem>>, %arg3: memref<128x16xf32, #tpu.memory_space<vmem>>, %arg4: memref<1x16xf32, #tpu.memory_space<vmem>>, %arg5: memref<2x16xf32, #tpu.memory_space<vmem>>) attributes {dimension_semantics = [], scalar_prefetch = 0 : i64, scratch_operands = 0 : i64, tpu.core_type = #tpu.core_type<tc>} {
    %c0 = arith.constant 0 : index
    %c0_0 = arith.constant 0 : index
    %0 = vector.load %arg0[%c0, %c0_0] : memref<2x16xf32, #tpu.memory_space<vmem>>, vector<2x16xf32>
    %c0_1 = arith.constant 0 : index
    %c0_2 = arith.constant 0 : index
    %1 = vector.load %arg1[%c0_1, %c0_2] : memref<16x128xf32, #tpu.memory_space<vmem>>, vector<16x128xf32>
    %cst = arith.constant dense<0.000000e+00> : vector<2x128xf32>
    %2 = tpu.matmul %0, %1, %cst {dimension_numbers = #tpu.dot_dimension_numbers<[1], [0], [0], [1], [0, 0, 1, 1], [], []>} : vector<2x16xf32>, vector<16x128xf32>, vector<2x128xf32> -> vector<2x128xf32>
    %c0_3 = arith.constant 0 : index
    %c0_4 = arith.constant 0 : index
    %3 = vector.load %arg2[%c0_3, %c0_4] : memref<1x128xf32, #tpu.memory_space<vmem>>, vector<1x128xf32>
    %4 = vector.broadcast %3 : vector<1x128xf32> to vector<2x128xf32>
    %5 = arith.addf %2, %4 : vector<2x128xf32>
    %cst_5 = arith.constant 0.000000e+00 : f32
    %6 = vector.broadcast %cst_5 : f32 to vector<2x128xf32>
    %7 = arith.maximumf %5, %6 : vector<2x128xf32>
    %c0_6 = arith.constant 0 : index
    %c0_7 = arith.constant 0 : index
    %8 = vector.load %arg3[%c0_6, %c0_7] : memref<128x16xf32, #tpu.memory_space<vmem>>, vector<128x16xf32>
    %cst_8 = arith.constant dense<0.000000e+00> : vector<2x16xf32>
    %9 = tpu.matmul %7, %8, %cst_8 {dimension_numbers = #tpu.dot_dimension_numbers<[1], [0], [0], [1], [0, 0, 1, 1], [], []>} : vector<2x128xf32>, vector<128x16xf32>, vector<2x16xf32> -> vector<2x16xf32>
    %c0_9 = arith.constant 0 : index
    %c0_10 = arith.constant 0 : index
    %10 = vector.load %arg4[%c0_9, %c0_10] : memref<1x16xf32, #tpu.memory_space<vmem>>, vector<1x16xf32>
    %11 = vector.broadcast %10 : vector<1x16xf32> to vector<2x16xf32>
    %12 = arith.addf %9, %11 : vector<2x16xf32>
    %c0_11 = arith.constant 0 : index
    %c0_12 = arith.constant 0 : index
    %13 = vector.load %arg5[%c0_11, %c0_12] : memref<2x16xf32, #tpu.memory_space<vmem>>, vector<2x16xf32>
    tpu.vector_store %arg5[%c0_11, %c0_12], %12 {strides = array<i32>} : memref<2x16xf32, #tpu.memory_space<vmem>>, vector<2x16xf32>,
    return
  }
}

module attributes {stable_mosaic.version = 11 : i64} {
  func.func @_adain_lrelu_kernel(%arg0: i32, %arg1: memref<8x256xf32, #tpu.memory_space<vmem>>, %arg2: memref<8x1xf32, #tpu.memory_space<vmem>>, %arg3: memref<8x1xf32, #tpu.memory_space<vmem>>, %arg4: memref<8x256xf32, #tpu.memory_space<vmem>>) attributes {dimension_semantics = [#tpu.dimension_semantics<parallel>], iteration_bounds = array<i64: 2>, scalar_prefetch = 0 : i64, scratch_operands = 0 : i64, tpu.core_type = #tpu.core_type<tc>, window_params = [{transform_indices = @transform_0, window_bounds = array<i64: 8, 256>}, {transform_indices = @transform_1, window_bounds = array<i64: 8, 1>}, {transform_indices = @transform_2, window_bounds = array<i64: 8, 1>}, {transform_indices = @transform_3, window_bounds = array<i64: 8, 256>}]} {
    %c0 = arith.constant 0 : index
    %c0_0 = arith.constant 0 : index
    %0 = vector.load %arg1[%c0, %c0_0] : memref<8x256xf32, #tpu.memory_space<vmem>>, vector<8x256xf32>
    %cst = arith.constant dense<0.000000e+00> : vector<8xf32>
    %1 = vector.multi_reduction <add>, %0, %cst [1] : vector<8x256xf32> to vector<8xf32>
    %2 = vector.shape_cast %1 : vector<8xf32> to vector<8x1xf32>
    %cst_1 = arith.constant 2.560000e+02 : f32
    %3 = vector.broadcast %cst_1 : f32 to vector<8x1xf32>
    %4 = arith.divf %2, %3 : vector<8x1xf32>
    %5 = arith.mulf %0, %0 : vector<8x256xf32>
    %cst_2 = arith.constant dense<0.000000e+00> : vector<8xf32>
    %6 = vector.multi_reduction <add>, %5, %cst_2 [1] : vector<8x256xf32> to vector<8xf32>
    %7 = vector.shape_cast %6 : vector<8xf32> to vector<8x1xf32>
    %cst_3 = arith.constant 2.560000e+02 : f32
    %8 = vector.broadcast %cst_3 : f32 to vector<8x1xf32>
    %9 = arith.divf %7, %8 : vector<8x1xf32>
    %10 = arith.mulf %4, %4 : vector<8x1xf32>
    %11 = arith.subf %9, %10 : vector<8x1xf32>
    %cst_4 = arith.constant 9.99999974E-6 : f32
    %12 = vector.broadcast %cst_4 : f32 to vector<8x1xf32>
    %13 = arith.addf %11, %12 : vector<8x1xf32>
    %14 = math.rsqrt %13 : vector<8x1xf32>
    %15 = vector.broadcast %4 : vector<8x1xf32> to vector<8x256xf32>
    %16 = arith.subf %0, %15 : vector<8x256xf32>
    %17 = vector.broadcast %14 : vector<8x1xf32> to vector<8x256xf32>
    %18 = arith.mulf %16, %17 : vector<8x256xf32>
    %c0_5 = arith.constant 0 : index
    %c0_6 = arith.constant 0 : index
    %19 = vector.load %arg2[%c0_5, %c0_6] : memref<8x1xf32, #tpu.memory_space<vmem>>, vector<8x1xf32>
    %20 = vector.broadcast %19 : vector<8x1xf32> to vector<8x256xf32>
    %21 = arith.mulf %18, %20 : vector<8x256xf32>
    %c0_7 = arith.constant 0 : index
    %c0_8 = arith.constant 0 : index
    %22 = vector.load %arg3[%c0_7, %c0_8] : memref<8x1xf32, #tpu.memory_space<vmem>>, vector<8x1xf32>
    %23 = vector.broadcast %22 : vector<8x1xf32> to vector<8x256xf32>
    %24 = arith.addf %21, %23 : vector<8x256xf32>
    %cst_9 = arith.constant 0.000000e+00 : f32
    %25 = vector.broadcast %cst_9 : f32 to vector<8x256xf32>
    %26 = arith.cmpf oge, %24, %25 : vector<8x256xf32>
    %cst_10 = arith.constant 0.00999999977 : f32
    %27 = vector.broadcast %cst_10 : f32 to vector<8x256xf32>
    %28 = arith.mulf %27, %24 : vector<8x256xf32>
    %29 = arith.select %26, %24, %28 : vector<8x256xi1>, vector<8x256xf32>
    %c0_11 = arith.constant 0 : index
    %c0_12 = arith.constant 0 : index
    %30 = vector.load %arg4[%c0_11, %c0_12] : memref<8x256xf32, #tpu.memory_space<vmem>>, vector<8x256xf32>
    tpu.vector_store %arg4[%c0_11, %c0_12], %29 {strides = array<i32>} : memref<8x256xf32, #tpu.memory_space<vmem>>, vector<8x256xf32>,
    return
  }
  func.func @transform_0(%arg0: i32) -> (i32, i32) {
    %c0_i32 = arith.constant 0 : i32
    %c0_i32_0 = arith.constant 0 : i32
    return %arg0, %c0_i32 : i32, i32
  }
  func.func @transform_1(%arg0: i32) -> (i32, i32) {
    %c0_i32 = arith.constant 0 : i32
    %c0_i32_0 = arith.constant 0 : i32
    return %arg0, %c0_i32 : i32, i32
  }
  func.func @transform_2(%arg0: i32) -> (i32, i32) {
    %c0_i32 = arith.constant 0 : i32
    %c0_i32_0 = arith.constant 0 : i32
    return %arg0, %c0_i32 : i32, i32
  }
  func.func @transform_3(%arg0: i32) -> (i32, i32) {
    %c0_i32 = arith.constant 0 : i32
    %c0_i32_0 = arith.constant 0 : i32
    return %arg0, %c0_i32 : i32, i32
  }
}

module attributes {stable_mosaic.version = 11 : i64} {
  func.func @_conv_gemm_kernel(%arg0: i32, %arg1: i32, %arg2: memref<1x128x64xf32, #tpu.memory_space<vmem>>, %arg3: memref<16x128xf32, #tpu.memory_space<vmem>>, %arg4: memref<16x1xf32, #tpu.memory_space<vmem>>, %arg5: memref<1x16x64xf32, #tpu.memory_space<vmem>>, %arg6: memref<16x64xf32, #tpu.memory_space<vmem>>) attributes {dimension_semantics = [#tpu.dimension_semantics<parallel>, #tpu.dimension_semantics<arbitrary>], iteration_bounds = array<i64: 2, 1>, scalar_prefetch = 0 : i64, scratch_operands = 1 : i64, tpu.core_type = #tpu.core_type<tc>, window_params = [{transform_indices = @transform_0, window_bounds = array<i64: 1, 128, 64>}, {transform_indices = @transform_1, window_bounds = array<i64: 16, 128>}, {pipeline_mode = #tpu.pipeline_mode<synchronous>, transform_indices = @transform_2, window_bounds = array<i64: 16, 1>}, {transform_indices = @transform_3, window_bounds = array<i64: 1, 16, 64>}]} {
    %c0_i32 = arith.constant 0 : i32
    %0 = arith.cmpi eq, %arg1, %c0_i32 : i32
    %1 = arith.extui %0 : i1 to i32
    %c0_i32_0 = arith.constant 0 : i32
    %2 = arith.cmpi ne, %1, %c0_i32_0 : i32
    scf.if %2 {
      %cst_11 = arith.constant 0.000000e+00 : f32
      %13 = vector.broadcast %cst_11 : f32 to vector<16x64xf32>
      %c0_12 = arith.constant 0 : index
      %c0_13 = arith.constant 0 : index
      %14 = vector.load %arg6[%c0_12, %c0_13] : memref<16x64xf32, #tpu.memory_space<vmem>>, vector<16x64xf32>
      tpu.vector_store %arg6[%c0_12, %c0_13], %13 {strides = array<i32>} : memref<16x64xf32, #tpu.memory_space<vmem>>, vector<16x64xf32>,
    } else {
    }
    %c0 = arith.constant 0 : index
    %c0_1 = arith.constant 0 : index
    %3 = vector.load %arg6[%c0, %c0_1] : memref<16x64xf32, #tpu.memory_space<vmem>>, vector<16x64xf32>
    %c0_2 = arith.constant 0 : index
    %c0_3 = arith.constant 0 : index
    %4 = vector.load %arg3[%c0_2, %c0_3] : memref<16x128xf32, #tpu.memory_space<vmem>>, vector<16x128xf32>
    %c0_4 = arith.constant 0 : index
    %c0_5 = arith.constant 0 : index
    %c0_6 = arith.constant 0 : index
    %5 = vector.load %arg2[%c0_4, %c0_5, %c0_6] : memref<1x128x64xf32, #tpu.memory_space<vmem>>, vector<1x128x64xf32>
    %6 = vector.shape_cast %5 : vector<1x128x64xf32> to vector<128x64xf32>
    %cst = arith.constant dense<0.000000e+00> : vector<16x64xf32>
    %7 = tpu.matmul %4, %6, %cst {dimension_numbers = #tpu.dot_dimension_numbers<[1], [0], [0], [1], [0, 0, 1, 1], [], []>} : vector<16x128xf32>, vector<128x64xf32>, vector<16x64xf32> -> vector<16x64xf32>
    %8 = arith.addf %3, %7 : vector<16x64xf32>
    %c0_7 = arith.constant 0 : index
    %c0_8 = arith.constant 0 : index
    %9 = vector.load %arg6[%c0_7, %c0_8] : memref<16x64xf32, #tpu.memory_space<vmem>>, vector<16x64xf32>
    tpu.vector_store %arg6[%c0_7, %c0_8], %8 {strides = array<i32>} : memref<16x64xf32, #tpu.memory_space<vmem>>, vector<16x64xf32>,
    %c0_i32_9 = arith.constant 0 : i32
    %10 = arith.cmpi eq, %arg1, %c0_i32_9 : i32
    %11 = arith.extui %10 : i1 to i32
    %c0_i32_10 = arith.constant 0 : i32
    %12 = arith.cmpi ne, %11, %c0_i32_10 : i32
    scf.if %12 {
      %c0_11 = arith.constant 0 : index
      %c0_12 = arith.constant 0 : index
      %13 = vector.load %arg6[%c0_11, %c0_12] : memref<16x64xf32, #tpu.memory_space<vmem>>, vector<16x64xf32>
      %c0_13 = arith.constant 0 : index
      %c0_14 = arith.constant 0 : index
      %14 = vector.load %arg4[%c0_13, %c0_14] : memref<16x1xf32, #tpu.memory_space<vmem>>, vector<16x1xf32>
      %15 = vector.broadcast %14 : vector<16x1xf32> to vector<16x64xf32>
      %16 = arith.addf %13, %15 : vector<16x64xf32>
      %c0_15 = arith.constant 0 : index
      %c0_16 = arith.constant 0 : index
      %c0_17 = arith.constant 0 : index
      %17 = vector.load %arg5[%c0_15, %c0_16, %c0_17] : memref<1x16x64xf32, #tpu.memory_space<vmem>>, vector<1x16x64xf32>
      %18 = vector.shape_cast %17 : vector<1x16x64xf32> to vector<16x64xf32>
      %19 = vector.shape_cast %16 : vector<16x64xf32> to vector<1x16x64xf32>
      tpu.vector_store %arg5[%c0_15, %c0_16, %c0_17], %19 {strides = array<i32>} : memref<1x16x64xf32, #tpu.memory_space<vmem>>, vector<1x16x64xf32>,
    } else {
    }
    return
  }
  func.func @transform_0(%arg0: i32, %arg1: i32) -> (i32, i32, i32) {
    %c0_i32 = arith.constant 0 : i32
    %c0_i32_0 = arith.constant 0 : i32
    return %arg0, %arg1, %c0_i32 : i32, i32, i32
  }
  func.func @transform_1(%arg0: i32, %arg1: i32) -> (i32, i32) {
    %c0_i32 = arith.constant 0 : i32
    %c0_i32_0 = arith.constant 0 : i32
    return %c0_i32, %arg1 : i32, i32
  }
  func.func @transform_2(%arg0: i32, %arg1: i32) -> (i32, i32) {
    %c0_i32 = arith.constant 0 : i32
    %c0_i32_0 = arith.constant 0 : i32
    %c0_i32_1 = arith.constant 0 : i32
    return %c0_i32, %c0_i32_0 : i32, i32
  }
  func.func @transform_3(%arg0: i32, %arg1: i32) -> (i32, i32, i32) {
    %c0_i32 = arith.constant 0 : i32
    %c0_i32_0 = arith.constant 0 : i32
    %c0_i32_1 = arith.constant 0 : i32
    return %arg0, %c0_i32, %c0_i32_0 : i32, i32, i32
  }
}

module attributes {stable_mosaic.version = 11 : i64} {
  func.func @_adain_mlp_kernel(%arg0: memref<2x16xf32, #tpu.memory_space<vmem>>, %arg1: memref<16x128xf32, #tpu.memory_space<vmem>>, %arg2: memref<1x128xf32, #tpu.memory_space<vmem>>, %arg3: memref<128x32xf32, #tpu.memory_space<vmem>>, %arg4: memref<1x32xf32, #tpu.memory_space<vmem>>, %arg5: memref<2x32xf32, #tpu.memory_space<vmem>>) attributes {dimension_semantics = [], scalar_prefetch = 0 : i64, scratch_operands = 0 : i64, tpu.core_type = #tpu.core_type<tc>} {
    %c0 = arith.constant 0 : index
    %c0_0 = arith.constant 0 : index
    %0 = vector.load %arg0[%c0, %c0_0] : memref<2x16xf32, #tpu.memory_space<vmem>>, vector<2x16xf32>
    %c0_1 = arith.constant 0 : index
    %c0_2 = arith.constant 0 : index
    %1 = vector.load %arg1[%c0_1, %c0_2] : memref<16x128xf32, #tpu.memory_space<vmem>>, vector<16x128xf32>
    %cst = arith.constant dense<0.000000e+00> : vector<2x128xf32>
    %2 = tpu.matmul %0, %1, %cst {dimension_numbers = #tpu.dot_dimension_numbers<[1], [0], [0], [1], [0, 0, 1, 1], [], []>} : vector<2x16xf32>, vector<16x128xf32>, vector<2x128xf32> -> vector<2x128xf32>
    %c0_3 = arith.constant 0 : index
    %c0_4 = arith.constant 0 : index
    %3 = vector.load %arg2[%c0_3, %c0_4] : memref<1x128xf32, #tpu.memory_space<vmem>>, vector<1x128xf32>
    %4 = vector.broadcast %3 : vector<1x128xf32> to vector<2x128xf32>
    %5 = arith.addf %2, %4 : vector<2x128xf32>
    %cst_5 = arith.constant 0.000000e+00 : f32
    %6 = vector.broadcast %cst_5 : f32 to vector<2x128xf32>
    %7 = arith.maximumf %5, %6 : vector<2x128xf32>
    %c0_6 = arith.constant 0 : index
    %c0_7 = arith.constant 0 : index
    %8 = vector.load %arg3[%c0_6, %c0_7] : memref<128x32xf32, #tpu.memory_space<vmem>>, vector<128x32xf32>
    %cst_8 = arith.constant dense<0.000000e+00> : vector<2x32xf32>
    %9 = tpu.matmul %7, %8, %cst_8 {dimension_numbers = #tpu.dot_dimension_numbers<[1], [0], [0], [1], [0, 0, 1, 1], [], []>} : vector<2x128xf32>, vector<128x32xf32>, vector<2x32xf32> -> vector<2x32xf32>
    %c0_9 = arith.constant 0 : index
    %c0_10 = arith.constant 0 : index
    %10 = vector.load %arg4[%c0_9, %c0_10] : memref<1x32xf32, #tpu.memory_space<vmem>>, vector<1x32xf32>
    %11 = vector.broadcast %10 : vector<1x32xf32> to vector<2x32xf32>
    %12 = arith.addf %9, %11 : vector<2x32xf32>
    %c0_11 = arith.constant 0 : index
    %c0_12 = arith.constant 0 : index
    %13 = vector.load %arg5[%c0_11, %c0_12] : memref<2x32xf32, #tpu.memory_space<vmem>>, vector<2x32xf32>
    tpu.vector_store %arg5[%c0_11, %c0_12], %12 {strides = array<i32>} : memref<2x32xf32, #tpu.memory_space<vmem>>, vector<2x32xf32>,
    return
  }
}

module attributes {stable_mosaic.version = 11 : i64} {
  func.func @_adain_lrelu_kernel(%arg0: i32, %arg1: memref<16x64xf32, #tpu.memory_space<vmem>>, %arg2: memref<16x1xf32, #tpu.memory_space<vmem>>, %arg3: memref<16x1xf32, #tpu.memory_space<vmem>>, %arg4: memref<16x64xf32, #tpu.memory_space<vmem>>) attributes {dimension_semantics = [#tpu.dimension_semantics<parallel>], iteration_bounds = array<i64: 2>, scalar_prefetch = 0 : i64, scratch_operands = 0 : i64, tpu.core_type = #tpu.core_type<tc>, window_params = [{transform_indices = @transform_0, window_bounds = array<i64: 16, 64>}, {transform_indices = @transform_1, window_bounds = array<i64: 16, 1>}, {transform_indices = @transform_2, window_bounds = array<i64: 16, 1>}, {transform_indices = @transform_3, window_bounds = array<i64: 16, 64>}]} {
    %c0 = arith.constant 0 : index
    %c0_0 = arith.constant 0 : index
    %0 = vector.load %arg1[%c0, %c0_0] : memref<16x64xf32, #tpu.memory_space<vmem>>, vector<16x64xf32>
    %cst = arith.constant dense<0.000000e+00> : vector<16xf32>
    %1 = vector.multi_reduction <add>, %0, %cst [1] : vector<16x64xf32> to vector<16xf32>
    %2 = vector.shape_cast %1 : vector<16xf32> to vector<16x1xf32>
    %cst_1 = arith.constant 6.400000e+01 : f32
    %3 = vector.broadcast %cst_1 : f32 to vector<16x1xf32>
    %4 = arith.divf %2, %3 : vector<16x1xf32>
    %5 = arith.mulf %0, %0 : vector<16x64xf32>
    %cst_2 = arith.constant dense<0.000000e+00> : vector<16xf32>
    %6 = vector.multi_reduction <add>, %5, %cst_2 [1] : vector<16x64xf32> to vector<16xf32>
    %7 = vector.shape_cast %6 : vector<16xf32> to vector<16x1xf32>
    %cst_3 = arith.constant 6.400000e+01 : f32
    %8 = vector.broadcast %cst_3 : f32 to vector<16x1xf32>
    %9 = arith.divf %7, %8 : vector<16x1xf32>
    %10 = arith.mulf %4, %4 : vector<16x1xf32>
    %11 = arith.subf %9, %10 : vector<16x1xf32>
    %cst_4 = arith.constant 9.99999974E-6 : f32
    %12 = vector.broadcast %cst_4 : f32 to vector<16x1xf32>
    %13 = arith.addf %11, %12 : vector<16x1xf32>
    %14 = math.rsqrt %13 : vector<16x1xf32>
    %15 = vector.broadcast %4 : vector<16x1xf32> to vector<16x64xf32>
    %16 = arith.subf %0, %15 : vector<16x64xf32>
    %17 = vector.broadcast %14 : vector<16x1xf32> to vector<16x64xf32>
    %18 = arith.mulf %16, %17 : vector<16x64xf32>
    %c0_5 = arith.constant 0 : index
    %c0_6 = arith.constant 0 : index
    %19 = vector.load %arg2[%c0_5, %c0_6] : memref<16x1xf32, #tpu.memory_space<vmem>>, vector<16x1xf32>
    %20 = vector.broadcast %19 : vector<16x1xf32> to vector<16x64xf32>
    %21 = arith.mulf %18, %20 : vector<16x64xf32>
    %c0_7 = arith.constant 0 : index
    %c0_8 = arith.constant 0 : index
    %22 = vector.load %arg3[%c0_7, %c0_8] : memref<16x1xf32, #tpu.memory_space<vmem>>, vector<16x1xf32>
    %23 = vector.broadcast %22 : vector<16x1xf32> to vector<16x64xf32>
    %24 = arith.addf %21, %23 : vector<16x64xf32>
    %cst_9 = arith.constant 0.000000e+00 : f32
    %25 = vector.broadcast %cst_9 : f32 to vector<16x64xf32>
    %26 = arith.cmpf oge, %24, %25 : vector<16x64xf32>
    %cst_10 = arith.constant 0.00999999977 : f32
    %27 = vector.broadcast %cst_10 : f32 to vector<16x64xf32>
    %28 = arith.mulf %27, %24 : vector<16x64xf32>
    %29 = arith.select %26, %24, %28 : vector<16x64xi1>, vector<16x64xf32>
    %c0_11 = arith.constant 0 : index
    %c0_12 = arith.constant 0 : index
    %30 = vector.load %arg4[%c0_11, %c0_12] : memref<16x64xf32, #tpu.memory_space<vmem>>, vector<16x64xf32>
    tpu.vector_store %arg4[%c0_11, %c0_12], %29 {strides = array<i32>} : memref<16x64xf32, #tpu.memory_space<vmem>>, vector<16x64xf32>,
    return
  }
  func.func @transform_0(%arg0: i32) -> (i32, i32) {
    %c0_i32 = arith.constant 0 : i32
    %c0_i32_0 = arith.constant 0 : i32
    return %arg0, %c0_i32 : i32, i32
  }
  func.func @transform_1(%arg0: i32) -> (i32, i32) {
    %c0_i32 = arith.constant 0 : i32
    %c0_i32_0 = arith.constant 0 : i32
    return %arg0, %c0_i32 : i32, i32
  }
  func.func @transform_2(%arg0: i32) -> (i32, i32) {
    %c0_i32 = arith.constant 0 : i32
    %c0_i32_0 = arith.constant 0 : i32
    return %arg0, %c0_i32 : i32, i32
  }
  func.func @transform_3(%arg0: i32) -> (i32, i32) {
    %c0_i32 = arith.constant 0 : i32
    %c0_i32_0 = arith.constant 0 : i32
    return %arg0, %c0_i32 : i32, i32
  }
}

module attributes {stable_mosaic.version = 11 : i64} {
  func.func @_conv_gemm_kernel(%arg0: i32, %arg1: i32, %arg2: memref<1x144x64xf32, #tpu.memory_space<vmem>>, %arg3: memref<16x144xf32, #tpu.memory_space<vmem>>, %arg4: memref<16x1xf32, #tpu.memory_space<vmem>>, %arg5: memref<1x16x64xf32, #tpu.memory_space<vmem>>, %arg6: memref<16x64xf32, #tpu.memory_space<vmem>>) attributes {dimension_semantics = [#tpu.dimension_semantics<parallel>, #tpu.dimension_semantics<arbitrary>], iteration_bounds = array<i64: 2, 1>, scalar_prefetch = 0 : i64, scratch_operands = 1 : i64, tpu.core_type = #tpu.core_type<tc>, window_params = [{transform_indices = @transform_0, window_bounds = array<i64: 1, 144, 64>}, {transform_indices = @transform_1, window_bounds = array<i64: 16, 144>}, {pipeline_mode = #tpu.pipeline_mode<synchronous>, transform_indices = @transform_2, window_bounds = array<i64: 16, 1>}, {transform_indices = @transform_3, window_bounds = array<i64: 1, 16, 64>}]} {
    %c0_i32 = arith.constant 0 : i32
    %0 = arith.cmpi eq, %arg1, %c0_i32 : i32
    %1 = arith.extui %0 : i1 to i32
    %c0_i32_0 = arith.constant 0 : i32
    %2 = arith.cmpi ne, %1, %c0_i32_0 : i32
    scf.if %2 {
      %cst_11 = arith.constant 0.000000e+00 : f32
      %13 = vector.broadcast %cst_11 : f32 to vector<16x64xf32>
      %c0_12 = arith.constant 0 : index
      %c0_13 = arith.constant 0 : index
      %14 = vector.load %arg6[%c0_12, %c0_13] : memref<16x64xf32, #tpu.memory_space<vmem>>, vector<16x64xf32>
      tpu.vector_store %arg6[%c0_12, %c0_13], %13 {strides = array<i32>} : memref<16x64xf32, #tpu.memory_space<vmem>>, vector<16x64xf32>,
    } else {
    }
    %c0 = arith.constant 0 : index
    %c0_1 = arith.constant 0 : index
    %3 = vector.load %arg6[%c0, %c0_1] : memref<16x64xf32, #tpu.memory_space<vmem>>, vector<16x64xf32>
    %c0_2 = arith.constant 0 : index
    %c0_3 = arith.constant 0 : index
    %4 = vector.load %arg3[%c0_2, %c0_3] : memref<16x144xf32, #tpu.memory_space<vmem>>, vector<16x144xf32>
    %c0_4 = arith.constant 0 : index
    %c0_5 = arith.constant 0 : index
    %c0_6 = arith.constant 0 : index
    %5 = vector.load %arg2[%c0_4, %c0_5, %c0_6] : memref<1x144x64xf32, #tpu.memory_space<vmem>>, vector<1x144x64xf32>
    %6 = vector.shape_cast %5 : vector<1x144x64xf32> to vector<144x64xf32>
    %cst = arith.constant dense<0.000000e+00> : vector<16x64xf32>
    %7 = tpu.matmul %4, %6, %cst {dimension_numbers = #tpu.dot_dimension_numbers<[1], [0], [0], [1], [0, 0, 1, 1], [], []>} : vector<16x144xf32>, vector<144x64xf32>, vector<16x64xf32> -> vector<16x64xf32>
    %8 = arith.addf %3, %7 : vector<16x64xf32>
    %c0_7 = arith.constant 0 : index
    %c0_8 = arith.constant 0 : index
    %9 = vector.load %arg6[%c0_7, %c0_8] : memref<16x64xf32, #tpu.memory_space<vmem>>, vector<16x64xf32>
    tpu.vector_store %arg6[%c0_7, %c0_8], %8 {strides = array<i32>} : memref<16x64xf32, #tpu.memory_space<vmem>>, vector<16x64xf32>,
    %c0_i32_9 = arith.constant 0 : i32
    %10 = arith.cmpi eq, %arg1, %c0_i32_9 : i32
    %11 = arith.extui %10 : i1 to i32
    %c0_i32_10 = arith.constant 0 : i32
    %12 = arith.cmpi ne, %11, %c0_i32_10 : i32
    scf.if %12 {
      %c0_11 = arith.constant 0 : index
      %c0_12 = arith.constant 0 : index
      %13 = vector.load %arg6[%c0_11, %c0_12] : memref<16x64xf32, #tpu.memory_space<vmem>>, vector<16x64xf32>
      %c0_13 = arith.constant 0 : index
      %c0_14 = arith.constant 0 : index
      %14 = vector.load %arg4[%c0_13, %c0_14] : memref<16x1xf32, #tpu.memory_space<vmem>>, vector<16x1xf32>
      %15 = vector.broadcast %14 : vector<16x1xf32> to vector<16x64xf32>
      %16 = arith.addf %13, %15 : vector<16x64xf32>
      %c0_15 = arith.constant 0 : index
      %c0_16 = arith.constant 0 : index
      %c0_17 = arith.constant 0 : index
      %17 = vector.load %arg5[%c0_15, %c0_16, %c0_17] : memref<1x16x64xf32, #tpu.memory_space<vmem>>, vector<1x16x64xf32>
      %18 = vector.shape_cast %17 : vector<1x16x64xf32> to vector<16x64xf32>
      %19 = vector.shape_cast %16 : vector<16x64xf32> to vector<1x16x64xf32>
      tpu.vector_store %arg5[%c0_15, %c0_16, %c0_17], %19 {strides = array<i32>} : memref<1x16x64xf32, #tpu.memory_space<vmem>>, vector<1x16x64xf32>,
    } else {
    }
    return
  }
  func.func @transform_0(%arg0: i32, %arg1: i32) -> (i32, i32, i32) {
    %c0_i32 = arith.constant 0 : i32
    %c0_i32_0 = arith.constant 0 : i32
    return %arg0, %arg1, %c0_i32 : i32, i32, i32
  }
  func.func @transform_1(%arg0: i32, %arg1: i32) -> (i32, i32) {
    %c0_i32 = arith.constant 0 : i32
    %c0_i32_0 = arith.constant 0 : i32
    return %c0_i32, %arg1 : i32, i32
  }
  func.func @transform_2(%arg0: i32, %arg1: i32) -> (i32, i32) {
    %c0_i32 = arith.constant 0 : i32
    %c0_i32_0 = arith.constant 0 : i32
    %c0_i32_1 = arith.constant 0 : i32
    return %c0_i32, %c0_i32_0 : i32, i32
  }
  func.func @transform_3(%arg0: i32, %arg1: i32) -> (i32, i32, i32) {
    %c0_i32 = arith.constant 0 : i32
    %c0_i32_0 = arith.constant 0 : i32
    %c0_i32_1 = arith.constant 0 : i32
    return %arg0, %c0_i32, %c0_i32_0 : i32, i32, i32
  }
}

module attributes {stable_mosaic.version = 11 : i64} {
  func.func @_conv_gemm_kernel(%arg0: i32, %arg1: i32, %arg2: memref<1x256x16xf32, #tpu.memory_space<vmem>>, %arg3: memref<32x256xf32, #tpu.memory_space<vmem>>, %arg4: memref<32x1xf32, #tpu.memory_space<vmem>>, %arg5: memref<1x32x16xf32, #tpu.memory_space<vmem>>, %arg6: memref<32x16xf32, #tpu.memory_space<vmem>>) attributes {dimension_semantics = [#tpu.dimension_semantics<parallel>, #tpu.dimension_semantics<arbitrary>], iteration_bounds = array<i64: 2, 1>, scalar_prefetch = 0 : i64, scratch_operands = 1 : i64, tpu.core_type = #tpu.core_type<tc>, window_params = [{transform_indices = @transform_0, window_bounds = array<i64: 1, 256, 16>}, {transform_indices = @transform_1, window_bounds = array<i64: 32, 256>}, {pipeline_mode = #tpu.pipeline_mode<synchronous>, transform_indices = @transform_2, window_bounds = array<i64: 32, 1>}, {transform_indices = @transform_3, window_bounds = array<i64: 1, 32, 16>}]} {
    %c0_i32 = arith.constant 0 : i32
    %0 = arith.cmpi eq, %arg1, %c0_i32 : i32
    %1 = arith.extui %0 : i1 to i32
    %c0_i32_0 = arith.constant 0 : i32
    %2 = arith.cmpi ne, %1, %c0_i32_0 : i32
    scf.if %2 {
      %cst_11 = arith.constant 0.000000e+00 : f32
      %13 = vector.broadcast %cst_11 : f32 to vector<32x16xf32>
      %c0_12 = arith.constant 0 : index
      %c0_13 = arith.constant 0 : index
      %14 = vector.load %arg6[%c0_12, %c0_13] : memref<32x16xf32, #tpu.memory_space<vmem>>, vector<32x16xf32>
      tpu.vector_store %arg6[%c0_12, %c0_13], %13 {strides = array<i32>} : memref<32x16xf32, #tpu.memory_space<vmem>>, vector<32x16xf32>,
    } else {
    }
    %c0 = arith.constant 0 : index
    %c0_1 = arith.constant 0 : index
    %3 = vector.load %arg6[%c0, %c0_1] : memref<32x16xf32, #tpu.memory_space<vmem>>, vector<32x16xf32>
    %c0_2 = arith.constant 0 : index
    %c0_3 = arith.constant 0 : index
    %4 = vector.load %arg3[%c0_2, %c0_3] : memref<32x256xf32, #tpu.memory_space<vmem>>, vector<32x256xf32>
    %c0_4 = arith.constant 0 : index
    %c0_5 = arith.constant 0 : index
    %c0_6 = arith.constant 0 : index
    %5 = vector.load %arg2[%c0_4, %c0_5, %c0_6] : memref<1x256x16xf32, #tpu.memory_space<vmem>>, vector<1x256x16xf32>
    %6 = vector.shape_cast %5 : vector<1x256x16xf32> to vector<256x16xf32>
    %cst = arith.constant dense<0.000000e+00> : vector<32x16xf32>
    %7 = tpu.matmul %4, %6, %cst {dimension_numbers = #tpu.dot_dimension_numbers<[1], [0], [0], [1], [0, 0, 1, 1], [], []>} : vector<32x256xf32>, vector<256x16xf32>, vector<32x16xf32> -> vector<32x16xf32>
    %8 = arith.addf %3, %7 : vector<32x16xf32>
    %c0_7 = arith.constant 0 : index
    %c0_8 = arith.constant 0 : index
    %9 = vector.load %arg6[%c0_7, %c0_8] : memref<32x16xf32, #tpu.memory_space<vmem>>, vector<32x16xf32>
    tpu.vector_store %arg6[%c0_7, %c0_8], %8 {strides = array<i32>} : memref<32x16xf32, #tpu.memory_space<vmem>>, vector<32x16xf32>,
    %c0_i32_9 = arith.constant 0 : i32
    %10 = arith.cmpi eq, %arg1, %c0_i32_9 : i32
    %11 = arith.extui %10 : i1 to i32
    %c0_i32_10 = arith.constant 0 : i32
    %12 = arith.cmpi ne, %11, %c0_i32_10 : i32
    scf.if %12 {
      %c0_11 = arith.constant 0 : index
      %c0_12 = arith.constant 0 : index
      %13 = vector.load %arg6[%c0_11, %c0_12] : memref<32x16xf32, #tpu.memory_space<vmem>>, vector<32x16xf32>
      %c0_13 = arith.constant 0 : index
      %c0_14 = arith.constant 0 : index
      %14 = vector.load %arg4[%c0_13, %c0_14] : memref<32x1xf32, #tpu.memory_space<vmem>>, vector<32x1xf32>
      %15 = vector.broadcast %14 : vector<32x1xf32> to vector<32x16xf32>
      %16 = arith.addf %13, %15 : vector<32x16xf32>
      %c0_15 = arith.constant 0 : index
      %c0_16 = arith.constant 0 : index
      %c0_17 = arith.constant 0 : index
      %17 = vector.load %arg5[%c0_15, %c0_16, %c0_17] : memref<1x32x16xf32, #tpu.memory_space<vmem>>, vector<1x32x16xf32>
      %18 = vector.shape_cast %17 : vector<1x32x16xf32> to vector<32x16xf32>
      %19 = vector.shape_cast %16 : vector<32x16xf32> to vector<1x32x16xf32>
      tpu.vector_store %arg5[%c0_15, %c0_16, %c0_17], %19 {strides = array<i32>} : memref<1x32x16xf32, #tpu.memory_space<vmem>>, vector<1x32x16xf32>,
    } else {
    }
    return
  }
  func.func @transform_0(%arg0: i32, %arg1: i32) -> (i32, i32, i32) {
    %c0_i32 = arith.constant 0 : i32
    %c0_i32_0 = arith.constant 0 : i32
    return %arg0, %arg1, %c0_i32 : i32, i32, i32
  }
  func.func @transform_1(%arg0: i32, %arg1: i32) -> (i32, i32) {
    %c0_i32 = arith.constant 0 : i32
    %c0_i32_0 = arith.constant 0 : i32
    return %c0_i32, %arg1 : i32, i32
  }
  func.func @transform_2(%arg0: i32, %arg1: i32) -> (i32, i32) {
    %c0_i32 = arith.constant 0 : i32
    %c0_i32_0 = arith.constant 0 : i32
    %c0_i32_1 = arith.constant 0 : i32
    return %c0_i32, %c0_i32_0 : i32, i32
  }
  func.func @transform_3(%arg0: i32, %arg1: i32) -> (i32, i32, i32) {
    %c0_i32 = arith.constant 0 : i32
    %c0_i32_0 = arith.constant 0 : i32
    %c0_i32_1 = arith.constant 0 : i32
    return %arg0, %c0_i32, %c0_i32_0 : i32, i32, i32
  }
}

module attributes {stable_mosaic.version = 11 : i64} {
  func.func @_adain_mlp_kernel(%arg0: memref<2x16xf32, #tpu.memory_space<vmem>>, %arg1: memref<16x128xf32, #tpu.memory_space<vmem>>, %arg2: memref<1x128xf32, #tpu.memory_space<vmem>>, %arg3: memref<128x64xf32, #tpu.memory_space<vmem>>, %arg4: memref<1x64xf32, #tpu.memory_space<vmem>>, %arg5: memref<2x64xf32, #tpu.memory_space<vmem>>) attributes {dimension_semantics = [], scalar_prefetch = 0 : i64, scratch_operands = 0 : i64, tpu.core_type = #tpu.core_type<tc>} {
    %c0 = arith.constant 0 : index
    %c0_0 = arith.constant 0 : index
    %0 = vector.load %arg0[%c0, %c0_0] : memref<2x16xf32, #tpu.memory_space<vmem>>, vector<2x16xf32>
    %c0_1 = arith.constant 0 : index
    %c0_2 = arith.constant 0 : index
    %1 = vector.load %arg1[%c0_1, %c0_2] : memref<16x128xf32, #tpu.memory_space<vmem>>, vector<16x128xf32>
    %cst = arith.constant dense<0.000000e+00> : vector<2x128xf32>
    %2 = tpu.matmul %0, %1, %cst {dimension_numbers = #tpu.dot_dimension_numbers<[1], [0], [0], [1], [0, 0, 1, 1], [], []>} : vector<2x16xf32>, vector<16x128xf32>, vector<2x128xf32> -> vector<2x128xf32>
    %c0_3 = arith.constant 0 : index
    %c0_4 = arith.constant 0 : index
    %3 = vector.load %arg2[%c0_3, %c0_4] : memref<1x128xf32, #tpu.memory_space<vmem>>, vector<1x128xf32>
    %4 = vector.broadcast %3 : vector<1x128xf32> to vector<2x128xf32>
    %5 = arith.addf %2, %4 : vector<2x128xf32>
    %cst_5 = arith.constant 0.000000e+00 : f32
    %6 = vector.broadcast %cst_5 : f32 to vector<2x128xf32>
    %7 = arith.maximumf %5, %6 : vector<2x128xf32>
    %c0_6 = arith.constant 0 : index
    %c0_7 = arith.constant 0 : index
    %8 = vector.load %arg3[%c0_6, %c0_7] : memref<128x64xf32, #tpu.memory_space<vmem>>, vector<128x64xf32>
    %cst_8 = arith.constant dense<0.000000e+00> : vector<2x64xf32>
    %9 = tpu.matmul %7, %8, %cst_8 {dimension_numbers = #tpu.dot_dimension_numbers<[1], [0], [0], [1], [0, 0, 1, 1], [], []>} : vector<2x128xf32>, vector<128x64xf32>, vector<2x64xf32> -> vector<2x64xf32>
    %c0_9 = arith.constant 0 : index
    %c0_10 = arith.constant 0 : index
    %10 = vector.load %arg4[%c0_9, %c0_10] : memref<1x64xf32, #tpu.memory_space<vmem>>, vector<1x64xf32>
    %11 = vector.broadcast %10 : vector<1x64xf32> to vector<2x64xf32>
    %12 = arith.addf %9, %11 : vector<2x64xf32>
    %c0_11 = arith.constant 0 : index
    %c0_12 = arith.constant 0 : index
    %13 = vector.load %arg5[%c0_11, %c0_12] : memref<2x64xf32, #tpu.memory_space<vmem>>, vector<2x64xf32>
    tpu.vector_store %arg5[%c0_11, %c0_12], %12 {strides = array<i32>} : memref<2x64xf32, #tpu.memory_space<vmem>>, vector<2x64xf32>,
    return
  }
}

module attributes {stable_mosaic.version = 11 : i64} {
  func.func @_adain_lrelu_kernel(%arg0: i32, %arg1: memref<32x16xf32, #tpu.memory_space<vmem>>, %arg2: memref<32x1xf32, #tpu.memory_space<vmem>>, %arg3: memref<32x1xf32, #tpu.memory_space<vmem>>, %arg4: memref<32x16xf32, #tpu.memory_space<vmem>>) attributes {dimension_semantics = [#tpu.dimension_semantics<parallel>], iteration_bounds = array<i64: 2>, scalar_prefetch = 0 : i64, scratch_operands = 0 : i64, tpu.core_type = #tpu.core_type<tc>, window_params = [{transform_indices = @transform_0, window_bounds = array<i64: 32, 16>}, {transform_indices = @transform_1, window_bounds = array<i64: 32, 1>}, {transform_indices = @transform_2, window_bounds = array<i64: 32, 1>}, {transform_indices = @transform_3, window_bounds = array<i64: 32, 16>}]} {
    %c0 = arith.constant 0 : index
    %c0_0 = arith.constant 0 : index
    %0 = vector.load %arg1[%c0, %c0_0] : memref<32x16xf32, #tpu.memory_space<vmem>>, vector<32x16xf32>
    %cst = arith.constant dense<0.000000e+00> : vector<32xf32>
    %1 = vector.multi_reduction <add>, %0, %cst [1] : vector<32x16xf32> to vector<32xf32>
    %2 = vector.shape_cast %1 : vector<32xf32> to vector<32x1xf32>
    %cst_1 = arith.constant 1.600000e+01 : f32
    %3 = vector.broadcast %cst_1 : f32 to vector<32x1xf32>
    %4 = arith.divf %2, %3 : vector<32x1xf32>
    %5 = arith.mulf %0, %0 : vector<32x16xf32>
    %cst_2 = arith.constant dense<0.000000e+00> : vector<32xf32>
    %6 = vector.multi_reduction <add>, %5, %cst_2 [1] : vector<32x16xf32> to vector<32xf32>
    %7 = vector.shape_cast %6 : vector<32xf32> to vector<32x1xf32>
    %cst_3 = arith.constant 1.600000e+01 : f32
    %8 = vector.broadcast %cst_3 : f32 to vector<32x1xf32>
    %9 = arith.divf %7, %8 : vector<32x1xf32>
    %10 = arith.mulf %4, %4 : vector<32x1xf32>
    %11 = arith.subf %9, %10 : vector<32x1xf32>
    %cst_4 = arith.constant 9.99999974E-6 : f32
    %12 = vector.broadcast %cst_4 : f32 to vector<32x1xf32>
    %13 = arith.addf %11, %12 : vector<32x1xf32>
    %14 = math.rsqrt %13 : vector<32x1xf32>
    %15 = vector.broadcast %4 : vector<32x1xf32> to vector<32x16xf32>
    %16 = arith.subf %0, %15 : vector<32x16xf32>
    %17 = vector.broadcast %14 : vector<32x1xf32> to vector<32x16xf32>
    %18 = arith.mulf %16, %17 : vector<32x16xf32>
    %c0_5 = arith.constant 0 : index
    %c0_6 = arith.constant 0 : index
    %19 = vector.load %arg2[%c0_5, %c0_6] : memref<32x1xf32, #tpu.memory_space<vmem>>, vector<32x1xf32>
    %20 = vector.broadcast %19 : vector<32x1xf32> to vector<32x16xf32>
    %21 = arith.mulf %18, %20 : vector<32x16xf32>
    %c0_7 = arith.constant 0 : index
    %c0_8 = arith.constant 0 : index
    %22 = vector.load %arg3[%c0_7, %c0_8] : memref<32x1xf32, #tpu.memory_space<vmem>>, vector<32x1xf32>
    %23 = vector.broadcast %22 : vector<32x1xf32> to vector<32x16xf32>
    %24 = arith.addf %21, %23 : vector<32x16xf32>
    %cst_9 = arith.constant 0.000000e+00 : f32
    %25 = vector.broadcast %cst_9 : f32 to vector<32x16xf32>
    %26 = arith.cmpf oge, %24, %25 : vector<32x16xf32>
    %cst_10 = arith.constant 0.00999999977 : f32
    %27 = vector.broadcast %cst_10 : f32 to vector<32x16xf32>
    %28 = arith.mulf %27, %24 : vector<32x16xf32>
    %29 = arith.select %26, %24, %28 : vector<32x16xi1>, vector<32x16xf32>
    %c0_11 = arith.constant 0 : index
    %c0_12 = arith.constant 0 : index
    %30 = vector.load %arg4[%c0_11, %c0_12] : memref<32x16xf32, #tpu.memory_space<vmem>>, vector<32x16xf32>
    tpu.vector_store %arg4[%c0_11, %c0_12], %29 {strides = array<i32>} : memref<32x16xf32, #tpu.memory_space<vmem>>, vector<32x16xf32>,
    return
  }
  func.func @transform_0(%arg0: i32) -> (i32, i32) {
    %c0_i32 = arith.constant 0 : i32
    %c0_i32_0 = arith.constant 0 : i32
    return %arg0, %c0_i32 : i32, i32
  }
  func.func @transform_1(%arg0: i32) -> (i32, i32) {
    %c0_i32 = arith.constant 0 : i32
    %c0_i32_0 = arith.constant 0 : i32
    return %arg0, %c0_i32 : i32, i32
  }
  func.func @transform_2(%arg0: i32) -> (i32, i32) {
    %c0_i32 = arith.constant 0 : i32
    %c0_i32_0 = arith.constant 0 : i32
    return %arg0, %c0_i32 : i32, i32
  }
  func.func @transform_3(%arg0: i32) -> (i32, i32) {
    %c0_i32 = arith.constant 0 : i32
    %c0_i32_0 = arith.constant 0 : i32
    return %arg0, %c0_i32 : i32, i32
  }
}

module attributes {stable_mosaic.version = 11 : i64} {
  func.func @_conv_gemm_kernel(%arg0: i32, %arg1: i32, %arg2: memref<1x288x16xf32, #tpu.memory_space<vmem>>, %arg3: memref<32x288xf32, #tpu.memory_space<vmem>>, %arg4: memref<32x1xf32, #tpu.memory_space<vmem>>, %arg5: memref<1x32x16xf32, #tpu.memory_space<vmem>>, %arg6: memref<32x16xf32, #tpu.memory_space<vmem>>) attributes {dimension_semantics = [#tpu.dimension_semantics<parallel>, #tpu.dimension_semantics<arbitrary>], iteration_bounds = array<i64: 2, 1>, scalar_prefetch = 0 : i64, scratch_operands = 1 : i64, tpu.core_type = #tpu.core_type<tc>, window_params = [{transform_indices = @transform_0, window_bounds = array<i64: 1, 288, 16>}, {transform_indices = @transform_1, window_bounds = array<i64: 32, 288>}, {pipeline_mode = #tpu.pipeline_mode<synchronous>, transform_indices = @transform_2, window_bounds = array<i64: 32, 1>}, {transform_indices = @transform_3, window_bounds = array<i64: 1, 32, 16>}]} {
    %c0_i32 = arith.constant 0 : i32
    %0 = arith.cmpi eq, %arg1, %c0_i32 : i32
    %1 = arith.extui %0 : i1 to i32
    %c0_i32_0 = arith.constant 0 : i32
    %2 = arith.cmpi ne, %1, %c0_i32_0 : i32
    scf.if %2 {
      %cst_11 = arith.constant 0.000000e+00 : f32
      %13 = vector.broadcast %cst_11 : f32 to vector<32x16xf32>
      %c0_12 = arith.constant 0 : index
      %c0_13 = arith.constant 0 : index
      %14 = vector.load %arg6[%c0_12, %c0_13] : memref<32x16xf32, #tpu.memory_space<vmem>>, vector<32x16xf32>
      tpu.vector_store %arg6[%c0_12, %c0_13], %13 {strides = array<i32>} : memref<32x16xf32, #tpu.memory_space<vmem>>, vector<32x16xf32>,
    } else {
    }
    %c0 = arith.constant 0 : index
    %c0_1 = arith.constant 0 : index
    %3 = vector.load %arg6[%c0, %c0_1] : memref<32x16xf32, #tpu.memory_space<vmem>>, vector<32x16xf32>
    %c0_2 = arith.constant 0 : index
    %c0_3 = arith.constant 0 : index
    %4 = vector.load %arg3[%c0_2, %c0_3] : memref<32x288xf32, #tpu.memory_space<vmem>>, vector<32x288xf32>
    %c0_4 = arith.constant 0 : index
    %c0_5 = arith.constant 0 : index
    %c0_6 = arith.constant 0 : index
    %5 = vector.load %arg2[%c0_4, %c0_5, %c0_6] : memref<1x288x16xf32, #tpu.memory_space<vmem>>, vector<1x288x16xf32>
    %6 = vector.shape_cast %5 : vector<1x288x16xf32> to vector<288x16xf32>
    %cst = arith.constant dense<0.000000e+00> : vector<32x16xf32>
    %7 = tpu.matmul %4, %6, %cst {dimension_numbers = #tpu.dot_dimension_numbers<[1], [0], [0], [1], [0, 0, 1, 1], [], []>} : vector<32x288xf32>, vector<288x16xf32>, vector<32x16xf32> -> vector<32x16xf32>
    %8 = arith.addf %3, %7 : vector<32x16xf32>
    %c0_7 = arith.constant 0 : index
    %c0_8 = arith.constant 0 : index
    %9 = vector.load %arg6[%c0_7, %c0_8] : memref<32x16xf32, #tpu.memory_space<vmem>>, vector<32x16xf32>
    tpu.vector_store %arg6[%c0_7, %c0_8], %8 {strides = array<i32>} : memref<32x16xf32, #tpu.memory_space<vmem>>, vector<32x16xf32>,
    %c0_i32_9 = arith.constant 0 : i32
    %10 = arith.cmpi eq, %arg1, %c0_i32_9 : i32
    %11 = arith.extui %10 : i1 to i32
    %c0_i32_10 = arith.constant 0 : i32
    %12 = arith.cmpi ne, %11, %c0_i32_10 : i32
    scf.if %12 {
      %c0_11 = arith.constant 0 : index
      %c0_12 = arith.constant 0 : index
      %13 = vector.load %arg6[%c0_11, %c0_12] : memref<32x16xf32, #tpu.memory_space<vmem>>, vector<32x16xf32>
      %c0_13 = arith.constant 0 : index
      %c0_14 = arith.constant 0 : index
      %14 = vector.load %arg4[%c0_13, %c0_14] : memref<32x1xf32, #tpu.memory_space<vmem>>, vector<32x1xf32>
      %15 = vector.broadcast %14 : vector<32x1xf32> to vector<32x16xf32>
      %16 = arith.addf %13, %15 : vector<32x16xf32>
      %c0_15 = arith.constant 0 : index
      %c0_16 = arith.constant 0 : index
      %c0_17 = arith.constant 0 : index
      %17 = vector.load %arg5[%c0_15, %c0_16, %c0_17] : memref<1x32x16xf32, #tpu.memory_space<vmem>>, vector<1x32x16xf32>
      %18 = vector.shape_cast %17 : vector<1x32x16xf32> to vector<32x16xf32>
      %19 = vector.shape_cast %16 : vector<32x16xf32> to vector<1x32x16xf32>
      tpu.vector_store %arg5[%c0_15, %c0_16, %c0_17], %19 {strides = array<i32>} : memref<1x32x16xf32, #tpu.memory_space<vmem>>, vector<1x32x16xf32>,
    } else {
    }
    return
  }
  func.func @transform_0(%arg0: i32, %arg1: i32) -> (i32, i32, i32) {
    %c0_i32 = arith.constant 0 : i32
    %c0_i32_0 = arith.constant 0 : i32
    return %arg0, %arg1, %c0_i32 : i32, i32, i32
  }
  func.func @transform_1(%arg0: i32, %arg1: i32) -> (i32, i32) {
    %c0_i32 = arith.constant 0 : i32
    %c0_i32_0 = arith.constant 0 : i32
    return %c0_i32, %arg1 : i32, i32
  }
  func.func @transform_2(%arg0: i32, %arg1: i32) -> (i32, i32) {
    %c0_i32 = arith.constant 0 : i32
    %c0_i32_0 = arith.constant 0 : i32
    %c0_i32_1 = arith.constant 0 : i32
    return %c0_i32, %c0_i32_0 : i32, i32
  }
  func.func @transform_3(%arg0: i32, %arg1: i32) -> (i32, i32, i32) {
    %c0_i32 = arith.constant 0 : i32
    %c0_i32_0 = arith.constant 0 : i32
    %c0_i32_1 = arith.constant 0 : i32
    return %arg0, %c0_i32, %c0_i32_0 : i32, i32, i32
  }
}

module attributes {stable_mosaic.version = 11 : i64} {
  func.func @_conv_gemm_kernel(%arg0: i32, %arg1: i32, %arg2: memref<1x288x64xf32, #tpu.memory_space<vmem>>, %arg3: memref<16x288xf32, #tpu.memory_space<vmem>>, %arg4: memref<16x1xf32, #tpu.memory_space<vmem>>, %arg5: memref<1x16x64xf32, #tpu.memory_space<vmem>>, %arg6: memref<16x64xf32, #tpu.memory_space<vmem>>) attributes {dimension_semantics = [#tpu.dimension_semantics<parallel>, #tpu.dimension_semantics<arbitrary>], iteration_bounds = array<i64: 2, 1>, scalar_prefetch = 0 : i64, scratch_operands = 1 : i64, tpu.core_type = #tpu.core_type<tc>, window_params = [{transform_indices = @transform_0, window_bounds = array<i64: 1, 288, 64>}, {transform_indices = @transform_1, window_bounds = array<i64: 16, 288>}, {pipeline_mode = #tpu.pipeline_mode<synchronous>, transform_indices = @transform_2, window_bounds = array<i64: 16, 1>}, {transform_indices = @transform_3, window_bounds = array<i64: 1, 16, 64>}]} {
    %c0_i32 = arith.constant 0 : i32
    %0 = arith.cmpi eq, %arg1, %c0_i32 : i32
    %1 = arith.extui %0 : i1 to i32
    %c0_i32_0 = arith.constant 0 : i32
    %2 = arith.cmpi ne, %1, %c0_i32_0 : i32
    scf.if %2 {
      %cst_11 = arith.constant 0.000000e+00 : f32
      %13 = vector.broadcast %cst_11 : f32 to vector<16x64xf32>
      %c0_12 = arith.constant 0 : index
      %c0_13 = arith.constant 0 : index
      %14 = vector.load %arg6[%c0_12, %c0_13] : memref<16x64xf32, #tpu.memory_space<vmem>>, vector<16x64xf32>
      tpu.vector_store %arg6[%c0_12, %c0_13], %13 {strides = array<i32>} : memref<16x64xf32, #tpu.memory_space<vmem>>, vector<16x64xf32>,
    } else {
    }
    %c0 = arith.constant 0 : index
    %c0_1 = arith.constant 0 : index
    %3 = vector.load %arg6[%c0, %c0_1] : memref<16x64xf32, #tpu.memory_space<vmem>>, vector<16x64xf32>
    %c0_2 = arith.constant 0 : index
    %c0_3 = arith.constant 0 : index
    %4 = vector.load %arg3[%c0_2, %c0_3] : memref<16x288xf32, #tpu.memory_space<vmem>>, vector<16x288xf32>
    %c0_4 = arith.constant 0 : index
    %c0_5 = arith.constant 0 : index
    %c0_6 = arith.constant 0 : index
    %5 = vector.load %arg2[%c0_4, %c0_5, %c0_6] : memref<1x288x64xf32, #tpu.memory_space<vmem>>, vector<1x288x64xf32>
    %6 = vector.shape_cast %5 : vector<1x288x64xf32> to vector<288x64xf32>
    %cst = arith.constant dense<0.000000e+00> : vector<16x64xf32>
    %7 = tpu.matmul %4, %6, %cst {dimension_numbers = #tpu.dot_dimension_numbers<[1], [0], [0], [1], [0, 0, 1, 1], [], []>} : vector<16x288xf32>, vector<288x64xf32>, vector<16x64xf32> -> vector<16x64xf32>
    %8 = arith.addf %3, %7 : vector<16x64xf32>
    %c0_7 = arith.constant 0 : index
    %c0_8 = arith.constant 0 : index
    %9 = vector.load %arg6[%c0_7, %c0_8] : memref<16x64xf32, #tpu.memory_space<vmem>>, vector<16x64xf32>
    tpu.vector_store %arg6[%c0_7, %c0_8], %8 {strides = array<i32>} : memref<16x64xf32, #tpu.memory_space<vmem>>, vector<16x64xf32>,
    %c0_i32_9 = arith.constant 0 : i32
    %10 = arith.cmpi eq, %arg1, %c0_i32_9 : i32
    %11 = arith.extui %10 : i1 to i32
    %c0_i32_10 = arith.constant 0 : i32
    %12 = arith.cmpi ne, %11, %c0_i32_10 : i32
    scf.if %12 {
      %c0_11 = arith.constant 0 : index
      %c0_12 = arith.constant 0 : index
      %13 = vector.load %arg6[%c0_11, %c0_12] : memref<16x64xf32, #tpu.memory_space<vmem>>, vector<16x64xf32>
      %c0_13 = arith.constant 0 : index
      %c0_14 = arith.constant 0 : index
      %14 = vector.load %arg4[%c0_13, %c0_14] : memref<16x1xf32, #tpu.memory_space<vmem>>, vector<16x1xf32>
      %15 = vector.broadcast %14 : vector<16x1xf32> to vector<16x64xf32>
      %16 = arith.addf %13, %15 : vector<16x64xf32>
      %c0_15 = arith.constant 0 : index
      %c0_16 = arith.constant 0 : index
      %c0_17 = arith.constant 0 : index
      %17 = vector.load %arg5[%c0_15, %c0_16, %c0_17] : memref<1x16x64xf32, #tpu.memory_space<vmem>>, vector<1x16x64xf32>
      %18 = vector.shape_cast %17 : vector<1x16x64xf32> to vector<16x64xf32>
      %19 = vector.shape_cast %16 : vector<16x64xf32> to vector<1x16x64xf32>
      tpu.vector_store %arg5[%c0_15, %c0_16, %c0_17], %19 {strides = array<i32>} : memref<1x16x64xf32, #tpu.memory_space<vmem>>, vector<1x16x64xf32>,
    } else {
    }
    return
  }
  func.func @transform_0(%arg0: i32, %arg1: i32) -> (i32, i32, i32) {
    %c0_i32 = arith.constant 0 : i32
    %c0_i32_0 = arith.constant 0 : i32
    return %arg0, %arg1, %c0_i32 : i32, i32, i32
  }
  func.func @transform_1(%arg0: i32, %arg1: i32) -> (i32, i32) {
    %c0_i32 = arith.constant 0 : i32
    %c0_i32_0 = arith.constant 0 : i32
    return %c0_i32, %arg1 : i32, i32
  }
  func.func @transform_2(%arg0: i32, %arg1: i32) -> (i32, i32) {
    %c0_i32 = arith.constant 0 : i32
    %c0_i32_0 = arith.constant 0 : i32
    %c0_i32_1 = arith.constant 0 : i32
    return %c0_i32, %c0_i32_0 : i32, i32
  }
  func.func @transform_3(%arg0: i32, %arg1: i32) -> (i32, i32, i32) {
    %c0_i32 = arith.constant 0 : i32
    %c0_i32_0 = arith.constant 0 : i32
    %c0_i32_1 = arith.constant 0 : i32
    return %arg0, %c0_i32, %c0_i32_0 : i32, i32, i32
  }
}

module attributes {stable_mosaic.version = 11 : i64} {
  func.func @_conv_gemm_kernel(%arg0: i32, %arg1: i32, %arg2: memref<1x288x16xf32, #tpu.memory_space<vmem>>, %arg3: memref<16x288xf32, #tpu.memory_space<vmem>>, %arg4: memref<16x1xf32, #tpu.memory_space<vmem>>, %arg5: memref<1x16x16xf32, #tpu.memory_space<vmem>>, %arg6: memref<16x16xf32, #tpu.memory_space<vmem>>) attributes {dimension_semantics = [#tpu.dimension_semantics<parallel>, #tpu.dimension_semantics<arbitrary>], iteration_bounds = array<i64: 2, 1>, scalar_prefetch = 0 : i64, scratch_operands = 1 : i64, tpu.core_type = #tpu.core_type<tc>, window_params = [{transform_indices = @transform_0, window_bounds = array<i64: 1, 288, 16>}, {transform_indices = @transform_1, window_bounds = array<i64: 16, 288>}, {pipeline_mode = #tpu.pipeline_mode<synchronous>, transform_indices = @transform_2, window_bounds = array<i64: 16, 1>}, {transform_indices = @transform_3, window_bounds = array<i64: 1, 16, 16>}]} {
    %c0_i32 = arith.constant 0 : i32
    %0 = arith.cmpi eq, %arg1, %c0_i32 : i32
    %1 = arith.extui %0 : i1 to i32
    %c0_i32_0 = arith.constant 0 : i32
    %2 = arith.cmpi ne, %1, %c0_i32_0 : i32
    scf.if %2 {
      %cst_11 = arith.constant 0.000000e+00 : f32
      %13 = vector.broadcast %cst_11 : f32 to vector<16x16xf32>
      %c0_12 = arith.constant 0 : index
      %c0_13 = arith.constant 0 : index
      %14 = vector.load %arg6[%c0_12, %c0_13] : memref<16x16xf32, #tpu.memory_space<vmem>>, vector<16x16xf32>
      tpu.vector_store %arg6[%c0_12, %c0_13], %13 {strides = array<i32>} : memref<16x16xf32, #tpu.memory_space<vmem>>, vector<16x16xf32>,
    } else {
    }
    %c0 = arith.constant 0 : index
    %c0_1 = arith.constant 0 : index
    %3 = vector.load %arg6[%c0, %c0_1] : memref<16x16xf32, #tpu.memory_space<vmem>>, vector<16x16xf32>
    %c0_2 = arith.constant 0 : index
    %c0_3 = arith.constant 0 : index
    %4 = vector.load %arg3[%c0_2, %c0_3] : memref<16x288xf32, #tpu.memory_space<vmem>>, vector<16x288xf32>
    %c0_4 = arith.constant 0 : index
    %c0_5 = arith.constant 0 : index
    %c0_6 = arith.constant 0 : index
    %5 = vector.load %arg2[%c0_4, %c0_5, %c0_6] : memref<1x288x16xf32, #tpu.memory_space<vmem>>, vector<1x288x16xf32>
    %6 = vector.shape_cast %5 : vector<1x288x16xf32> to vector<288x16xf32>
    %cst = arith.constant dense<0.000000e+00> : vector<16x16xf32>
    %7 = tpu.matmul %4, %6, %cst {dimension_numbers = #tpu.dot_dimension_numbers<[1], [0], [0], [1], [0, 0, 1, 1], [], []>} : vector<16x288xf32>, vector<288x16xf32>, vector<16x16xf32> -> vector<16x16xf32>
    %8 = arith.addf %3, %7 : vector<16x16xf32>
    %c0_7 = arith.constant 0 : index
    %c0_8 = arith.constant 0 : index
    %9 = vector.load %arg6[%c0_7, %c0_8] : memref<16x16xf32, #tpu.memory_space<vmem>>, vector<16x16xf32>
    tpu.vector_store %arg6[%c0_7, %c0_8], %8 {strides = array<i32>} : memref<16x16xf32, #tpu.memory_space<vmem>>, vector<16x16xf32>,
    %c0_i32_9 = arith.constant 0 : i32
    %10 = arith.cmpi eq, %arg1, %c0_i32_9 : i32
    %11 = arith.extui %10 : i1 to i32
    %c0_i32_10 = arith.constant 0 : i32
    %12 = arith.cmpi ne, %11, %c0_i32_10 : i32
    scf.if %12 {
      %c0_11 = arith.constant 0 : index
      %c0_12 = arith.constant 0 : index
      %13 = vector.load %arg6[%c0_11, %c0_12] : memref<16x16xf32, #tpu.memory_space<vmem>>, vector<16x16xf32>
      %c0_13 = arith.constant 0 : index
      %c0_14 = arith.constant 0 : index
      %14 = vector.load %arg4[%c0_13, %c0_14] : memref<16x1xf32, #tpu.memory_space<vmem>>, vector<16x1xf32>
      %15 = vector.broadcast %14 : vector<16x1xf32> to vector<16x16xf32>
      %16 = arith.addf %13, %15 : vector<16x16xf32>
      %c0_15 = arith.constant 0 : index
      %c0_16 = arith.constant 0 : index
      %c0_17 = arith.constant 0 : index
      %17 = vector.load %arg5[%c0_15, %c0_16, %c0_17] : memref<1x16x16xf32, #tpu.memory_space<vmem>>, vector<1x16x16xf32>
      %18 = vector.shape_cast %17 : vector<1x16x16xf32> to vector<16x16xf32>
      %19 = vector.shape_cast %16 : vector<16x16xf32> to vector<1x16x16xf32>
      tpu.vector_store %arg5[%c0_15, %c0_16, %c0_17], %19 {strides = array<i32>} : memref<1x16x16xf32, #tpu.memory_space<vmem>>, vector<1x16x16xf32>,
    } else {
    }
    return
  }
  func.func @transform_0(%arg0: i32, %arg1: i32) -> (i32, i32, i32) {
    %c0_i32 = arith.constant 0 : i32
    %c0_i32_0 = arith.constant 0 : i32
    return %arg0, %arg1, %c0_i32 : i32, i32, i32
  }
  func.func @transform_1(%arg0: i32, %arg1: i32) -> (i32, i32) {
    %c0_i32 = arith.constant 0 : i32
    %c0_i32_0 = arith.constant 0 : i32
    return %c0_i32, %arg1 : i32, i32
  }
  func.func @transform_2(%arg0: i32, %arg1: i32) -> (i32, i32) {
    %c0_i32 = arith.constant 0 : i32
    %c0_i32_0 = arith.constant 0 : i32
    %c0_i32_1 = arith.constant 0 : i32
    return %c0_i32, %c0_i32_0 : i32, i32
  }
  func.func @transform_3(%arg0: i32, %arg1: i32) -> (i32, i32, i32) {
    %c0_i32 = arith.constant 0 : i32
    %c0_i32_0 = arith.constant 0 : i32
    %c0_i32_1 = arith.constant 0 : i32
    return %arg0, %c0_i32, %c0_i32_0 : i32, i32, i32
  }
}

module attributes {stable_mosaic.version = 11 : i64} {
  func.func @_adain_lrelu_kernel(%arg0: i32, %arg1: memref<16x16xf32, #tpu.memory_space<vmem>>, %arg2: memref<16x1xf32, #tpu.memory_space<vmem>>, %arg3: memref<16x1xf32, #tpu.memory_space<vmem>>, %arg4: memref<16x16xf32, #tpu.memory_space<vmem>>) attributes {dimension_semantics = [#tpu.dimension_semantics<parallel>], iteration_bounds = array<i64: 2>, scalar_prefetch = 0 : i64, scratch_operands = 0 : i64, tpu.core_type = #tpu.core_type<tc>, window_params = [{transform_indices = @transform_0, window_bounds = array<i64: 16, 16>}, {transform_indices = @transform_1, window_bounds = array<i64: 16, 1>}, {transform_indices = @transform_2, window_bounds = array<i64: 16, 1>}, {transform_indices = @transform_3, window_bounds = array<i64: 16, 16>}]} {
    %c0 = arith.constant 0 : index
    %c0_0 = arith.constant 0 : index
    %0 = vector.load %arg1[%c0, %c0_0] : memref<16x16xf32, #tpu.memory_space<vmem>>, vector<16x16xf32>
    %cst = arith.constant dense<0.000000e+00> : vector<16xf32>
    %1 = vector.multi_reduction <add>, %0, %cst [1] : vector<16x16xf32> to vector<16xf32>
    %2 = vector.shape_cast %1 : vector<16xf32> to vector<16x1xf32>
    %cst_1 = arith.constant 1.600000e+01 : f32
    %3 = vector.broadcast %cst_1 : f32 to vector<16x1xf32>
    %4 = arith.divf %2, %3 : vector<16x1xf32>
    %5 = arith.mulf %0, %0 : vector<16x16xf32>
    %cst_2 = arith.constant dense<0.000000e+00> : vector<16xf32>
    %6 = vector.multi_reduction <add>, %5, %cst_2 [1] : vector<16x16xf32> to vector<16xf32>
    %7 = vector.shape_cast %6 : vector<16xf32> to vector<16x1xf32>
    %cst_3 = arith.constant 1.600000e+01 : f32
    %8 = vector.broadcast %cst_3 : f32 to vector<16x1xf32>
    %9 = arith.divf %7, %8 : vector<16x1xf32>
    %10 = arith.mulf %4, %4 : vector<16x1xf32>
    %11 = arith.subf %9, %10 : vector<16x1xf32>
    %cst_4 = arith.constant 9.99999974E-6 : f32
    %12 = vector.broadcast %cst_4 : f32 to vector<16x1xf32>
    %13 = arith.addf %11, %12 : vector<16x1xf32>
    %14 = math.rsqrt %13 : vector<16x1xf32>
    %15 = vector.broadcast %4 : vector<16x1xf32> to vector<16x16xf32>
    %16 = arith.subf %0, %15 : vector<16x16xf32>
    %17 = vector.broadcast %14 : vector<16x1xf32> to vector<16x16xf32>
    %18 = arith.mulf %16, %17 : vector<16x16xf32>
    %c0_5 = arith.constant 0 : index
    %c0_6 = arith.constant 0 : index
    %19 = vector.load %arg2[%c0_5, %c0_6] : memref<16x1xf32, #tpu.memory_space<vmem>>, vector<16x1xf32>
    %20 = vector.broadcast %19 : vector<16x1xf32> to vector<16x16xf32>
    %21 = arith.mulf %18, %20 : vector<16x16xf32>
    %c0_7 = arith.constant 0 : index
    %c0_8 = arith.constant 0 : index
    %22 = vector.load %arg3[%c0_7, %c0_8] : memref<16x1xf32, #tpu.memory_space<vmem>>, vector<16x1xf32>
    %23 = vector.broadcast %22 : vector<16x1xf32> to vector<16x16xf32>
    %24 = arith.addf %21, %23 : vector<16x16xf32>
    %cst_9 = arith.constant 0.000000e+00 : f32
    %25 = vector.broadcast %cst_9 : f32 to vector<16x16xf32>
    %26 = arith.cmpf oge, %24, %25 : vector<16x16xf32>
    %cst_10 = arith.constant 0.00999999977 : f32
    %27 = vector.broadcast %cst_10 : f32 to vector<16x16xf32>
    %28 = arith.mulf %27, %24 : vector<16x16xf32>
    %29 = arith.select %26, %24, %28 : vector<16x16xi1>, vector<16x16xf32>
    %c0_11 = arith.constant 0 : index
    %c0_12 = arith.constant 0 : index
    %30 = vector.load %arg4[%c0_11, %c0_12] : memref<16x16xf32, #tpu.memory_space<vmem>>, vector<16x16xf32>
    tpu.vector_store %arg4[%c0_11, %c0_12], %29 {strides = array<i32>} : memref<16x16xf32, #tpu.memory_space<vmem>>, vector<16x16xf32>,
    return
  }
  func.func @transform_0(%arg0: i32) -> (i32, i32) {
    %c0_i32 = arith.constant 0 : i32
    %c0_i32_0 = arith.constant 0 : i32
    return %arg0, %c0_i32 : i32, i32
  }
  func.func @transform_1(%arg0: i32) -> (i32, i32) {
    %c0_i32 = arith.constant 0 : i32
    %c0_i32_0 = arith.constant 0 : i32
    return %arg0, %c0_i32 : i32, i32
  }
  func.func @transform_2(%arg0: i32) -> (i32, i32) {
    %c0_i32 = arith.constant 0 : i32
    %c0_i32_0 = arith.constant 0 : i32
    return %arg0, %c0_i32 : i32, i32
  }
  func.func @transform_3(%arg0: i32) -> (i32, i32) {
    %c0_i32 = arith.constant 0 : i32
    %c0_i32_0 = arith.constant 0 : i32
    return %arg0, %c0_i32 : i32, i32
  }
}

module attributes {stable_mosaic.version = 11 : i64} {
  func.func @_conv_gemm_residual_kernel(%arg0: i32, %arg1: i32, %arg2: memref<1x144x64xf32, #tpu.memory_space<vmem>>, %arg3: memref<16x144xf32, #tpu.memory_space<vmem>>, %arg4: memref<16x1xf32, #tpu.memory_space<vmem>>, %arg5: memref<1x16x64xf32, #tpu.memory_space<vmem>>, %arg6: memref<1x16x64xf32, #tpu.memory_space<vmem>>, %arg7: memref<16x64xf32, #tpu.memory_space<vmem>>) attributes {dimension_semantics = [#tpu.dimension_semantics<parallel>, #tpu.dimension_semantics<arbitrary>], iteration_bounds = array<i64: 2, 1>, scalar_prefetch = 0 : i64, scratch_operands = 1 : i64, tpu.core_type = #tpu.core_type<tc>, window_params = [{transform_indices = @transform_0, window_bounds = array<i64: 1, 144, 64>}, {transform_indices = @transform_1, window_bounds = array<i64: 16, 144>}, {pipeline_mode = #tpu.pipeline_mode<synchronous>, transform_indices = @transform_2, window_bounds = array<i64: 16, 1>}, {transform_indices = @transform_3, window_bounds = array<i64: 1, 16, 64>}, {transform_indices = @transform_4, window_bounds = array<i64: 1, 16, 64>}]} {
    %c0_i32 = arith.constant 0 : i32
    %0 = arith.cmpi eq, %arg1, %c0_i32 : i32
    %1 = arith.extui %0 : i1 to i32
    %c0_i32_0 = arith.constant 0 : i32
    %2 = arith.cmpi ne, %1, %c0_i32_0 : i32
    scf.if %2 {
      %cst_11 = arith.constant 0.000000e+00 : f32
      %13 = vector.broadcast %cst_11 : f32 to vector<16x64xf32>
      %c0_12 = arith.constant 0 : index
      %c0_13 = arith.constant 0 : index
      %14 = vector.load %arg7[%c0_12, %c0_13] : memref<16x64xf32, #tpu.memory_space<vmem>>, vector<16x64xf32>
      tpu.vector_store %arg7[%c0_12, %c0_13], %13 {strides = array<i32>} : memref<16x64xf32, #tpu.memory_space<vmem>>, vector<16x64xf32>,
    } else {
    }
    %c0 = arith.constant 0 : index
    %c0_1 = arith.constant 0 : index
    %3 = vector.load %arg7[%c0, %c0_1] : memref<16x64xf32, #tpu.memory_space<vmem>>, vector<16x64xf32>
    %c0_2 = arith.constant 0 : index
    %c0_3 = arith.constant 0 : index
    %4 = vector.load %arg3[%c0_2, %c0_3] : memref<16x144xf32, #tpu.memory_space<vmem>>, vector<16x144xf32>
    %c0_4 = arith.constant 0 : index
    %c0_5 = arith.constant 0 : index
    %c0_6 = arith.constant 0 : index
    %5 = vector.load %arg2[%c0_4, %c0_5, %c0_6] : memref<1x144x64xf32, #tpu.memory_space<vmem>>, vector<1x144x64xf32>
    %6 = vector.shape_cast %5 : vector<1x144x64xf32> to vector<144x64xf32>
    %cst = arith.constant dense<0.000000e+00> : vector<16x64xf32>
    %7 = tpu.matmul %4, %6, %cst {dimension_numbers = #tpu.dot_dimension_numbers<[1], [0], [0], [1], [0, 0, 1, 1], [], []>} : vector<16x144xf32>, vector<144x64xf32>, vector<16x64xf32> -> vector<16x64xf32>
    %8 = arith.addf %3, %7 : vector<16x64xf32>
    %c0_7 = arith.constant 0 : index
    %c0_8 = arith.constant 0 : index
    %9 = vector.load %arg7[%c0_7, %c0_8] : memref<16x64xf32, #tpu.memory_space<vmem>>, vector<16x64xf32>
    tpu.vector_store %arg7[%c0_7, %c0_8], %8 {strides = array<i32>} : memref<16x64xf32, #tpu.memory_space<vmem>>, vector<16x64xf32>,
    %c0_i32_9 = arith.constant 0 : i32
    %10 = arith.cmpi eq, %arg1, %c0_i32_9 : i32
    %11 = arith.extui %10 : i1 to i32
    %c0_i32_10 = arith.constant 0 : i32
    %12 = arith.cmpi ne, %11, %c0_i32_10 : i32
    scf.if %12 {
      %c0_11 = arith.constant 0 : index
      %c0_12 = arith.constant 0 : index
      %13 = vector.load %arg7[%c0_11, %c0_12] : memref<16x64xf32, #tpu.memory_space<vmem>>, vector<16x64xf32>
      %c0_13 = arith.constant 0 : index
      %c0_14 = arith.constant 0 : index
      %14 = vector.load %arg4[%c0_13, %c0_14] : memref<16x1xf32, #tpu.memory_space<vmem>>, vector<16x1xf32>
      %15 = vector.broadcast %14 : vector<16x1xf32> to vector<16x64xf32>
      %16 = arith.addf %13, %15 : vector<16x64xf32>
      %c0_15 = arith.constant 0 : index
      %c0_16 = arith.constant 0 : index
      %c0_17 = arith.constant 0 : index
      %17 = vector.load %arg5[%c0_15, %c0_16, %c0_17] : memref<1x16x64xf32, #tpu.memory_space<vmem>>, vector<1x16x64xf32>
      %18 = vector.shape_cast %17 : vector<1x16x64xf32> to vector<16x64xf32>
      %19 = arith.addf %16, %18 : vector<16x64xf32>
      %c0_18 = arith.constant 0 : index
      %c0_19 = arith.constant 0 : index
      %c0_20 = arith.constant 0 : index
      %20 = vector.load %arg6[%c0_18, %c0_19, %c0_20] : memref<1x16x64xf32, #tpu.memory_space<vmem>>, vector<1x16x64xf32>
      %21 = vector.shape_cast %20 : vector<1x16x64xf32> to vector<16x64xf32>
      %22 = vector.shape_cast %19 : vector<16x64xf32> to vector<1x16x64xf32>
      tpu.vector_store %arg6[%c0_18, %c0_19, %c0_20], %22 {strides = array<i32>} : memref<1x16x64xf32, #tpu.memory_space<vmem>>, vector<1x16x64xf32>,
    } else {
    }
    return
  }
  func.func @transform_0(%arg0: i32, %arg1: i32) -> (i32, i32, i32) {
    %c0_i32 = arith.constant 0 : i32
    %c0_i32_0 = arith.constant 0 : i32
    return %arg0, %arg1, %c0_i32 : i32, i32, i32
  }
  func.func @transform_1(%arg0: i32, %arg1: i32) -> (i32, i32) {
    %c0_i32 = arith.constant 0 : i32
    %c0_i32_0 = arith.constant 0 : i32
    return %c0_i32, %arg1 : i32, i32
  }
  func.func @transform_2(%arg0: i32, %arg1: i32) -> (i32, i32) {
    %c0_i32 = arith.constant 0 : i32
    %c0_i32_0 = arith.constant 0 : i32
    %c0_i32_1 = arith.constant 0 : i32
    return %c0_i32, %c0_i32_0 : i32, i32
  }
  func.func @transform_3(%arg0: i32, %arg1: i32) -> (i32, i32, i32) {
    %c0_i32 = arith.constant 0 : i32
    %c0_i32_0 = arith.constant 0 : i32
    %c0_i32_1 = arith.constant 0 : i32
    return %arg0, %c0_i32, %c0_i32_0 : i32, i32, i32
  }
  func.func @transform_4(%arg0: i32, %arg1: i32) -> (i32, i32, i32) {
    %c0_i32 = arith.constant 0 : i32
    %c0_i32_0 = arith.constant 0 : i32
    %c0_i32_1 = arith.constant 0 : i32
    return %arg0, %c0_i32, %c0_i32_0 : i32, i32, i32
  }
}

module attributes {stable_mosaic.version = 11 : i64} {
  func.func @_adain_lrelu_kernel(%arg0: i32, %arg1: memref<32x64xf32, #tpu.memory_space<vmem>>, %arg2: memref<32x1xf32, #tpu.memory_space<vmem>>, %arg3: memref<32x1xf32, #tpu.memory_space<vmem>>, %arg4: memref<32x64xf32, #tpu.memory_space<vmem>>) attributes {dimension_semantics = [#tpu.dimension_semantics<parallel>], iteration_bounds = array<i64: 2>, scalar_prefetch = 0 : i64, scratch_operands = 0 : i64, tpu.core_type = #tpu.core_type<tc>, window_params = [{transform_indices = @transform_0, window_bounds = array<i64: 32, 64>}, {transform_indices = @transform_1, window_bounds = array<i64: 32, 1>}, {transform_indices = @transform_2, window_bounds = array<i64: 32, 1>}, {transform_indices = @transform_3, window_bounds = array<i64: 32, 64>}]} {
    %c0 = arith.constant 0 : index
    %c0_0 = arith.constant 0 : index
    %0 = vector.load %arg1[%c0, %c0_0] : memref<32x64xf32, #tpu.memory_space<vmem>>, vector<32x64xf32>
    %cst = arith.constant dense<0.000000e+00> : vector<32xf32>
    %1 = vector.multi_reduction <add>, %0, %cst [1] : vector<32x64xf32> to vector<32xf32>
    %2 = vector.shape_cast %1 : vector<32xf32> to vector<32x1xf32>
    %cst_1 = arith.constant 6.400000e+01 : f32
    %3 = vector.broadcast %cst_1 : f32 to vector<32x1xf32>
    %4 = arith.divf %2, %3 : vector<32x1xf32>
    %5 = arith.mulf %0, %0 : vector<32x64xf32>
    %cst_2 = arith.constant dense<0.000000e+00> : vector<32xf32>
    %6 = vector.multi_reduction <add>, %5, %cst_2 [1] : vector<32x64xf32> to vector<32xf32>
    %7 = vector.shape_cast %6 : vector<32xf32> to vector<32x1xf32>
    %cst_3 = arith.constant 6.400000e+01 : f32
    %8 = vector.broadcast %cst_3 : f32 to vector<32x1xf32>
    %9 = arith.divf %7, %8 : vector<32x1xf32>
    %10 = arith.mulf %4, %4 : vector<32x1xf32>
    %11 = arith.subf %9, %10 : vector<32x1xf32>
    %cst_4 = arith.constant 9.99999974E-6 : f32
    %12 = vector.broadcast %cst_4 : f32 to vector<32x1xf32>
    %13 = arith.addf %11, %12 : vector<32x1xf32>
    %14 = math.rsqrt %13 : vector<32x1xf32>
    %15 = vector.broadcast %4 : vector<32x1xf32> to vector<32x64xf32>
    %16 = arith.subf %0, %15 : vector<32x64xf32>
    %17 = vector.broadcast %14 : vector<32x1xf32> to vector<32x64xf32>
    %18 = arith.mulf %16, %17 : vector<32x64xf32>
    %c0_5 = arith.constant 0 : index
    %c0_6 = arith.constant 0 : index
    %19 = vector.load %arg2[%c0_5, %c0_6] : memref<32x1xf32, #tpu.memory_space<vmem>>, vector<32x1xf32>
    %20 = vector.broadcast %19 : vector<32x1xf32> to vector<32x64xf32>
    %21 = arith.mulf %18, %20 : vector<32x64xf32>
    %c0_7 = arith.constant 0 : index
    %c0_8 = arith.constant 0 : index
    %22 = vector.load %arg3[%c0_7, %c0_8] : memref<32x1xf32, #tpu.memory_space<vmem>>, vector<32x1xf32>
    %23 = vector.broadcast %22 : vector<32x1xf32> to vector<32x64xf32>
    %24 = arith.addf %21, %23 : vector<32x64xf32>
    %cst_9 = arith.constant 0.000000e+00 : f32
    %25 = vector.broadcast %cst_9 : f32 to vector<32x64xf32>
    %26 = arith.cmpf oge, %24, %25 : vector<32x64xf32>
    %cst_10 = arith.constant 0.00999999977 : f32
    %27 = vector.broadcast %cst_10 : f32 to vector<32x64xf32>
    %28 = arith.mulf %27, %24 : vector<32x64xf32>
    %29 = arith.select %26, %24, %28 : vector<32x64xi1>, vector<32x64xf32>
    %c0_11 = arith.constant 0 : index
    %c0_12 = arith.constant 0 : index
    %30 = vector.load %arg4[%c0_11, %c0_12] : memref<32x64xf32, #tpu.memory_space<vmem>>, vector<32x64xf32>
    tpu.vector_store %arg4[%c0_11, %c0_12], %29 {strides = array<i32>} : memref<32x64xf32, #tpu.memory_space<vmem>>, vector<32x64xf32>,
    return
  }
  func.func @transform_0(%arg0: i32) -> (i32, i32) {
    %c0_i32 = arith.constant 0 : i32
    %c0_i32_0 = arith.constant 0 : i32
    return %arg0, %c0_i32 : i32, i32
  }
  func.func @transform_1(%arg0: i32) -> (i32, i32) {
    %c0_i32 = arith.constant 0 : i32
    %c0_i32_0 = arith.constant 0 : i32
    return %arg0, %c0_i32 : i32, i32
  }
  func.func @transform_2(%arg0: i32) -> (i32, i32) {
    %c0_i32 = arith.constant 0 : i32
    %c0_i32_0 = arith.constant 0 : i32
    return %arg0, %c0_i32 : i32, i32
  }
  func.func @transform_3(%arg0: i32) -> (i32, i32) {
    %c0_i32 = arith.constant 0 : i32
    %c0_i32_0 = arith.constant 0 : i32
    return %arg0, %c0_i32 : i32, i32
  }
}

module attributes {stable_mosaic.version = 11 : i64} {
  func.func @_conv_gemm_kernel(%arg0: i32, %arg1: i32, %arg2: memref<1x288x256xf32, #tpu.memory_space<vmem>>, %arg3: memref<8x288xf32, #tpu.memory_space<vmem>>, %arg4: memref<8x1xf32, #tpu.memory_space<vmem>>, %arg5: memref<1x8x256xf32, #tpu.memory_space<vmem>>, %arg6: memref<8x256xf32, #tpu.memory_space<vmem>>) attributes {dimension_semantics = [#tpu.dimension_semantics<parallel>, #tpu.dimension_semantics<arbitrary>], iteration_bounds = array<i64: 2, 1>, scalar_prefetch = 0 : i64, scratch_operands = 1 : i64, tpu.core_type = #tpu.core_type<tc>, window_params = [{transform_indices = @transform_0, window_bounds = array<i64: 1, 288, 256>}, {transform_indices = @transform_1, window_bounds = array<i64: 8, 288>}, {pipeline_mode = #tpu.pipeline_mode<synchronous>, transform_indices = @transform_2, window_bounds = array<i64: 8, 1>}, {transform_indices = @transform_3, window_bounds = array<i64: 1, 8, 256>}]} {
    %c0_i32 = arith.constant 0 : i32
    %0 = arith.cmpi eq, %arg1, %c0_i32 : i32
    %1 = arith.extui %0 : i1 to i32
    %c0_i32_0 = arith.constant 0 : i32
    %2 = arith.cmpi ne, %1, %c0_i32_0 : i32
    scf.if %2 {
      %cst_11 = arith.constant 0.000000e+00 : f32
      %13 = vector.broadcast %cst_11 : f32 to vector<8x256xf32>
      %c0_12 = arith.constant 0 : index
      %c0_13 = arith.constant 0 : index
      %14 = vector.load %arg6[%c0_12, %c0_13] : memref<8x256xf32, #tpu.memory_space<vmem>>, vector<8x256xf32>
      tpu.vector_store %arg6[%c0_12, %c0_13], %13 {strides = array<i32>} : memref<8x256xf32, #tpu.memory_space<vmem>>, vector<8x256xf32>,
    } else {
    }
    %c0 = arith.constant 0 : index
    %c0_1 = arith.constant 0 : index
    %3 = vector.load %arg6[%c0, %c0_1] : memref<8x256xf32, #tpu.memory_space<vmem>>, vector<8x256xf32>
    %c0_2 = arith.constant 0 : index
    %c0_3 = arith.constant 0 : index
    %4 = vector.load %arg3[%c0_2, %c0_3] : memref<8x288xf32, #tpu.memory_space<vmem>>, vector<8x288xf32>
    %c0_4 = arith.constant 0 : index
    %c0_5 = arith.constant 0 : index
    %c0_6 = arith.constant 0 : index
    %5 = vector.load %arg2[%c0_4, %c0_5, %c0_6] : memref<1x288x256xf32, #tpu.memory_space<vmem>>, vector<1x288x256xf32>
    %6 = vector.shape_cast %5 : vector<1x288x256xf32> to vector<288x256xf32>
    %cst = arith.constant dense<0.000000e+00> : vector<8x256xf32>
    %7 = tpu.matmul %4, %6, %cst {dimension_numbers = #tpu.dot_dimension_numbers<[1], [0], [0], [1], [0, 0, 1, 1], [], []>} : vector<8x288xf32>, vector<288x256xf32>, vector<8x256xf32> -> vector<8x256xf32>
    %8 = arith.addf %3, %7 : vector<8x256xf32>
    %c0_7 = arith.constant 0 : index
    %c0_8 = arith.constant 0 : index
    %9 = vector.load %arg6[%c0_7, %c0_8] : memref<8x256xf32, #tpu.memory_space<vmem>>, vector<8x256xf32>
    tpu.vector_store %arg6[%c0_7, %c0_8], %8 {strides = array<i32>} : memref<8x256xf32, #tpu.memory_space<vmem>>, vector<8x256xf32>,
    %c0_i32_9 = arith.constant 0 : i32
    %10 = arith.cmpi eq, %arg1, %c0_i32_9 : i32
    %11 = arith.extui %10 : i1 to i32
    %c0_i32_10 = arith.constant 0 : i32
    %12 = arith.cmpi ne, %11, %c0_i32_10 : i32
    scf.if %12 {
      %c0_11 = arith.constant 0 : index
      %c0_12 = arith.constant 0 : index
      %13 = vector.load %arg6[%c0_11, %c0_12] : memref<8x256xf32, #tpu.memory_space<vmem>>, vector<8x256xf32>
      %c0_13 = arith.constant 0 : index
      %c0_14 = arith.constant 0 : index
      %14 = vector.load %arg4[%c0_13, %c0_14] : memref<8x1xf32, #tpu.memory_space<vmem>>, vector<8x1xf32>
      %15 = vector.broadcast %14 : vector<8x1xf32> to vector<8x256xf32>
      %16 = arith.addf %13, %15 : vector<8x256xf32>
      %c0_15 = arith.constant 0 : index
      %c0_16 = arith.constant 0 : index
      %c0_17 = arith.constant 0 : index
      %17 = vector.load %arg5[%c0_15, %c0_16, %c0_17] : memref<1x8x256xf32, #tpu.memory_space<vmem>>, vector<1x8x256xf32>
      %18 = vector.shape_cast %17 : vector<1x8x256xf32> to vector<8x256xf32>
      %19 = vector.shape_cast %16 : vector<8x256xf32> to vector<1x8x256xf32>
      tpu.vector_store %arg5[%c0_15, %c0_16, %c0_17], %19 {strides = array<i32>} : memref<1x8x256xf32, #tpu.memory_space<vmem>>, vector<1x8x256xf32>,
    } else {
    }
    return
  }
  func.func @transform_0(%arg0: i32, %arg1: i32) -> (i32, i32, i32) {
    %c0_i32 = arith.constant 0 : i32
    %c0_i32_0 = arith.constant 0 : i32
    return %arg0, %arg1, %c0_i32 : i32, i32, i32
  }
  func.func @transform_1(%arg0: i32, %arg1: i32) -> (i32, i32) {
    %c0_i32 = arith.constant 0 : i32
    %c0_i32_0 = arith.constant 0 : i32
    return %c0_i32, %arg1 : i32, i32
  }
  func.func @transform_2(%arg0: i32, %arg1: i32) -> (i32, i32) {
    %c0_i32 = arith.constant 0 : i32
    %c0_i32_0 = arith.constant 0 : i32
    %c0_i32_1 = arith.constant 0 : i32
    return %c0_i32, %c0_i32_0 : i32, i32
  }
  func.func @transform_3(%arg0: i32, %arg1: i32) -> (i32, i32, i32) {
    %c0_i32 = arith.constant 0 : i32
    %c0_i32_0 = arith.constant 0 : i32
    %c0_i32_1 = arith.constant 0 : i32
    return %arg0, %c0_i32, %c0_i32_0 : i32, i32, i32
  }
}

module attributes {stable_mosaic.version = 11 : i64} {
  func.func @_adain_lrelu_kernel(%arg0: i32, %arg1: memref<8x64xf32, #tpu.memory_space<vmem>>, %arg2: memref<8x1xf32, #tpu.memory_space<vmem>>, %arg3: memref<8x1xf32, #tpu.memory_space<vmem>>, %arg4: memref<8x64xf32, #tpu.memory_space<vmem>>) attributes {dimension_semantics = [#tpu.dimension_semantics<parallel>], iteration_bounds = array<i64: 2>, scalar_prefetch = 0 : i64, scratch_operands = 0 : i64, tpu.core_type = #tpu.core_type<tc>, window_params = [{transform_indices = @transform_0, window_bounds = array<i64: 8, 64>}, {transform_indices = @transform_1, window_bounds = array<i64: 8, 1>}, {transform_indices = @transform_2, window_bounds = array<i64: 8, 1>}, {transform_indices = @transform_3, window_bounds = array<i64: 8, 64>}]} {
    %c0 = arith.constant 0 : index
    %c0_0 = arith.constant 0 : index
    %0 = vector.load %arg1[%c0, %c0_0] : memref<8x64xf32, #tpu.memory_space<vmem>>, vector<8x64xf32>
    %cst = arith.constant dense<0.000000e+00> : vector<8xf32>
    %1 = vector.multi_reduction <add>, %0, %cst [1] : vector<8x64xf32> to vector<8xf32>
    %2 = vector.shape_cast %1 : vector<8xf32> to vector<8x1xf32>
    %cst_1 = arith.constant 6.400000e+01 : f32
    %3 = vector.broadcast %cst_1 : f32 to vector<8x1xf32>
    %4 = arith.divf %2, %3 : vector<8x1xf32>
    %5 = arith.mulf %0, %0 : vector<8x64xf32>
    %cst_2 = arith.constant dense<0.000000e+00> : vector<8xf32>
    %6 = vector.multi_reduction <add>, %5, %cst_2 [1] : vector<8x64xf32> to vector<8xf32>
    %7 = vector.shape_cast %6 : vector<8xf32> to vector<8x1xf32>
    %cst_3 = arith.constant 6.400000e+01 : f32
    %8 = vector.broadcast %cst_3 : f32 to vector<8x1xf32>
    %9 = arith.divf %7, %8 : vector<8x1xf32>
    %10 = arith.mulf %4, %4 : vector<8x1xf32>
    %11 = arith.subf %9, %10 : vector<8x1xf32>
    %cst_4 = arith.constant 9.99999974E-6 : f32
    %12 = vector.broadcast %cst_4 : f32 to vector<8x1xf32>
    %13 = arith.addf %11, %12 : vector<8x1xf32>
    %14 = math.rsqrt %13 : vector<8x1xf32>
    %15 = vector.broadcast %4 : vector<8x1xf32> to vector<8x64xf32>
    %16 = arith.subf %0, %15 : vector<8x64xf32>
    %17 = vector.broadcast %14 : vector<8x1xf32> to vector<8x64xf32>
    %18 = arith.mulf %16, %17 : vector<8x64xf32>
    %c0_5 = arith.constant 0 : index
    %c0_6 = arith.constant 0 : index
    %19 = vector.load %arg2[%c0_5, %c0_6] : memref<8x1xf32, #tpu.memory_space<vmem>>, vector<8x1xf32>
    %20 = vector.broadcast %19 : vector<8x1xf32> to vector<8x64xf32>
    %21 = arith.mulf %18, %20 : vector<8x64xf32>
    %c0_7 = arith.constant 0 : index
    %c0_8 = arith.constant 0 : index
    %22 = vector.load %arg3[%c0_7, %c0_8] : memref<8x1xf32, #tpu.memory_space<vmem>>, vector<8x1xf32>
    %23 = vector.broadcast %22 : vector<8x1xf32> to vector<8x64xf32>
    %24 = arith.addf %21, %23 : vector<8x64xf32>
    %cst_9 = arith.constant 0.000000e+00 : f32
    %25 = vector.broadcast %cst_9 : f32 to vector<8x64xf32>
    %26 = arith.cmpf oge, %24, %25 : vector<8x64xf32>
    %cst_10 = arith.constant 0.00999999977 : f32
    %27 = vector.broadcast %cst_10 : f32 to vector<8x64xf32>
    %28 = arith.mulf %27, %24 : vector<8x64xf32>
    %29 = arith.select %26, %24, %28 : vector<8x64xi1>, vector<8x64xf32>
    %c0_11 = arith.constant 0 : index
    %c0_12 = arith.constant 0 : index
    %30 = vector.load %arg4[%c0_11, %c0_12] : memref<8x64xf32, #tpu.memory_space<vmem>>, vector<8x64xf32>
    tpu.vector_store %arg4[%c0_11, %c0_12], %29 {strides = array<i32>} : memref<8x64xf32, #tpu.memory_space<vmem>>, vector<8x64xf32>,
    return
  }
  func.func @transform_0(%arg0: i32) -> (i32, i32) {
    %c0_i32 = arith.constant 0 : i32
    %c0_i32_0 = arith.constant 0 : i32
    return %arg0, %c0_i32 : i32, i32
  }
  func.func @transform_1(%arg0: i32) -> (i32, i32) {
    %c0_i32 = arith.constant 0 : i32
    %c0_i32_0 = arith.constant 0 : i32
    return %arg0, %c0_i32 : i32, i32
  }
  func.func @transform_2(%arg0: i32) -> (i32, i32) {
    %c0_i32 = arith.constant 0 : i32
    %c0_i32_0 = arith.constant 0 : i32
    return %arg0, %c0_i32 : i32, i32
  }
  func.func @transform_3(%arg0: i32) -> (i32, i32) {
    %c0_i32 = arith.constant 0 : i32
    %c0_i32_0 = arith.constant 0 : i32
    return %arg0, %c0_i32 : i32, i32
  }
}

module attributes {stable_mosaic.version = 11 : i64} {
  func.func @_conv_gemm_kernel(%arg0: i32, %arg1: i32, %arg2: memref<1x288x64xf32, #tpu.memory_space<vmem>>, %arg3: memref<8x288xf32, #tpu.memory_space<vmem>>, %arg4: memref<8x1xf32, #tpu.memory_space<vmem>>, %arg5: memref<1x8x64xf32, #tpu.memory_space<vmem>>, %arg6: memref<8x64xf32, #tpu.memory_space<vmem>>) attributes {dimension_semantics = [#tpu.dimension_semantics<parallel>, #tpu.dimension_semantics<arbitrary>], iteration_bounds = array<i64: 2, 1>, scalar_prefetch = 0 : i64, scratch_operands = 1 : i64, tpu.core_type = #tpu.core_type<tc>, window_params = [{transform_indices = @transform_0, window_bounds = array<i64: 1, 288, 64>}, {transform_indices = @transform_1, window_bounds = array<i64: 8, 288>}, {pipeline_mode = #tpu.pipeline_mode<synchronous>, transform_indices = @transform_2, window_bounds = array<i64: 8, 1>}, {transform_indices = @transform_3, window_bounds = array<i64: 1, 8, 64>}]} {
    %c0_i32 = arith.constant 0 : i32
    %0 = arith.cmpi eq, %arg1, %c0_i32 : i32
    %1 = arith.extui %0 : i1 to i32
    %c0_i32_0 = arith.constant 0 : i32
    %2 = arith.cmpi ne, %1, %c0_i32_0 : i32
    scf.if %2 {
      %cst_11 = arith.constant 0.000000e+00 : f32
      %13 = vector.broadcast %cst_11 : f32 to vector<8x64xf32>
      %c0_12 = arith.constant 0 : index
      %c0_13 = arith.constant 0 : index
      %14 = vector.load %arg6[%c0_12, %c0_13] : memref<8x64xf32, #tpu.memory_space<vmem>>, vector<8x64xf32>
      tpu.vector_store %arg6[%c0_12, %c0_13], %13 {strides = array<i32>} : memref<8x64xf32, #tpu.memory_space<vmem>>, vector<8x64xf32>,
    } else {
    }
    %c0 = arith.constant 0 : index
    %c0_1 = arith.constant 0 : index
    %3 = vector.load %arg6[%c0, %c0_1] : memref<8x64xf32, #tpu.memory_space<vmem>>, vector<8x64xf32>
    %c0_2 = arith.constant 0 : index
    %c0_3 = arith.constant 0 : index
    %4 = vector.load %arg3[%c0_2, %c0_3] : memref<8x288xf32, #tpu.memory_space<vmem>>, vector<8x288xf32>
    %c0_4 = arith.constant 0 : index
    %c0_5 = arith.constant 0 : index
    %c0_6 = arith.constant 0 : index
    %5 = vector.load %arg2[%c0_4, %c0_5, %c0_6] : memref<1x288x64xf32, #tpu.memory_space<vmem>>, vector<1x288x64xf32>
    %6 = vector.shape_cast %5 : vector<1x288x64xf32> to vector<288x64xf32>
    %cst = arith.constant dense<0.000000e+00> : vector<8x64xf32>
    %7 = tpu.matmul %4, %6, %cst {dimension_numbers = #tpu.dot_dimension_numbers<[1], [0], [0], [1], [0, 0, 1, 1], [], []>} : vector<8x288xf32>, vector<288x64xf32>, vector<8x64xf32> -> vector<8x64xf32>
    %8 = arith.addf %3, %7 : vector<8x64xf32>
    %c0_7 = arith.constant 0 : index
    %c0_8 = arith.constant 0 : index
    %9 = vector.load %arg6[%c0_7, %c0_8] : memref<8x64xf32, #tpu.memory_space<vmem>>, vector<8x64xf32>
    tpu.vector_store %arg6[%c0_7, %c0_8], %8 {strides = array<i32>} : memref<8x64xf32, #tpu.memory_space<vmem>>, vector<8x64xf32>,
    %c0_i32_9 = arith.constant 0 : i32
    %10 = arith.cmpi eq, %arg1, %c0_i32_9 : i32
    %11 = arith.extui %10 : i1 to i32
    %c0_i32_10 = arith.constant 0 : i32
    %12 = arith.cmpi ne, %11, %c0_i32_10 : i32
    scf.if %12 {
      %c0_11 = arith.constant 0 : index
      %c0_12 = arith.constant 0 : index
      %13 = vector.load %arg6[%c0_11, %c0_12] : memref<8x64xf32, #tpu.memory_space<vmem>>, vector<8x64xf32>
      %c0_13 = arith.constant 0 : index
      %c0_14 = arith.constant 0 : index
      %14 = vector.load %arg4[%c0_13, %c0_14] : memref<8x1xf32, #tpu.memory_space<vmem>>, vector<8x1xf32>
      %15 = vector.broadcast %14 : vector<8x1xf32> to vector<8x64xf32>
      %16 = arith.addf %13, %15 : vector<8x64xf32>
      %c0_15 = arith.constant 0 : index
      %c0_16 = arith.constant 0 : index
      %c0_17 = arith.constant 0 : index
      %17 = vector.load %arg5[%c0_15, %c0_16, %c0_17] : memref<1x8x64xf32, #tpu.memory_space<vmem>>, vector<1x8x64xf32>
      %18 = vector.shape_cast %17 : vector<1x8x64xf32> to vector<8x64xf32>
      %19 = vector.shape_cast %16 : vector<8x64xf32> to vector<1x8x64xf32>
      tpu.vector_store %arg5[%c0_15, %c0_16, %c0_17], %19 {strides = array<i32>} : memref<1x8x64xf32, #tpu.memory_space<vmem>>, vector<1x8x64xf32>,
    } else {
    }
    return
  }
  func.func @transform_0(%arg0: i32, %arg1: i32) -> (i32, i32, i32) {
    %c0_i32 = arith.constant 0 : i32
    %c0_i32_0 = arith.constant 0 : i32
    return %arg0, %arg1, %c0_i32 : i32, i32, i32
  }
  func.func @transform_1(%arg0: i32, %arg1: i32) -> (i32, i32) {
    %c0_i32 = arith.constant 0 : i32
    %c0_i32_0 = arith.constant 0 : i32
    return %c0_i32, %arg1 : i32, i32
  }
  func.func @transform_2(%arg0: i32, %arg1: i32) -> (i32, i32) {
    %c0_i32 = arith.constant 0 : i32
    %c0_i32_0 = arith.constant 0 : i32
    %c0_i32_1 = arith.constant 0 : i32
    return %c0_i32, %c0_i32_0 : i32, i32
  }
  func.func @transform_3(%arg0: i32, %arg1: i32) -> (i32, i32, i32) {
    %c0_i32 = arith.constant 0 : i32
    %c0_i32_0 = arith.constant 0 : i32
    %c0_i32_1 = arith.constant 0 : i32
    return %arg0, %c0_i32, %c0_i32_0 : i32, i32, i32
  }
}

module attributes {stable_mosaic.version = 11 : i64} {
  func.func @_conv_gemm_residual_kernel(%arg0: i32, %arg1: i32, %arg2: memref<1x72x256xf32, #tpu.memory_space<vmem>>, %arg3: memref<8x72xf32, #tpu.memory_space<vmem>>, %arg4: memref<8x1xf32, #tpu.memory_space<vmem>>, %arg5: memref<1x8x256xf32, #tpu.memory_space<vmem>>, %arg6: memref<1x8x256xf32, #tpu.memory_space<vmem>>, %arg7: memref<8x256xf32, #tpu.memory_space<vmem>>) attributes {dimension_semantics = [#tpu.dimension_semantics<parallel>, #tpu.dimension_semantics<arbitrary>], iteration_bounds = array<i64: 2, 1>, scalar_prefetch = 0 : i64, scratch_operands = 1 : i64, tpu.core_type = #tpu.core_type<tc>, window_params = [{transform_indices = @transform_0, window_bounds = array<i64: 1, 72, 256>}, {transform_indices = @transform_1, window_bounds = array<i64: 8, 72>}, {pipeline_mode = #tpu.pipeline_mode<synchronous>, transform_indices = @transform_2, window_bounds = array<i64: 8, 1>}, {transform_indices = @transform_3, window_bounds = array<i64: 1, 8, 256>}, {transform_indices = @transform_4, window_bounds = array<i64: 1, 8, 256>}]} {
    %c0_i32 = arith.constant 0 : i32
    %0 = arith.cmpi eq, %arg1, %c0_i32 : i32
    %1 = arith.extui %0 : i1 to i32
    %c0_i32_0 = arith.constant 0 : i32
    %2 = arith.cmpi ne, %1, %c0_i32_0 : i32
    scf.if %2 {
      %cst_11 = arith.constant 0.000000e+00 : f32
      %13 = vector.broadcast %cst_11 : f32 to vector<8x256xf32>
      %c0_12 = arith.constant 0 : index
      %c0_13 = arith.constant 0 : index
      %14 = vector.load %arg7[%c0_12, %c0_13] : memref<8x256xf32, #tpu.memory_space<vmem>>, vector<8x256xf32>
      tpu.vector_store %arg7[%c0_12, %c0_13], %13 {strides = array<i32>} : memref<8x256xf32, #tpu.memory_space<vmem>>, vector<8x256xf32>,
    } else {
    }
    %c0 = arith.constant 0 : index
    %c0_1 = arith.constant 0 : index
    %3 = vector.load %arg7[%c0, %c0_1] : memref<8x256xf32, #tpu.memory_space<vmem>>, vector<8x256xf32>
    %c0_2 = arith.constant 0 : index
    %c0_3 = arith.constant 0 : index
    %4 = vector.load %arg3[%c0_2, %c0_3] : memref<8x72xf32, #tpu.memory_space<vmem>>, vector<8x72xf32>
    %c0_4 = arith.constant 0 : index
    %c0_5 = arith.constant 0 : index
    %c0_6 = arith.constant 0 : index
    %5 = vector.load %arg2[%c0_4, %c0_5, %c0_6] : memref<1x72x256xf32, #tpu.memory_space<vmem>>, vector<1x72x256xf32>
    %6 = vector.shape_cast %5 : vector<1x72x256xf32> to vector<72x256xf32>
    %cst = arith.constant dense<0.000000e+00> : vector<8x256xf32>
    %7 = tpu.matmul %4, %6, %cst {dimension_numbers = #tpu.dot_dimension_numbers<[1], [0], [0], [1], [0, 0, 1, 1], [], []>} : vector<8x72xf32>, vector<72x256xf32>, vector<8x256xf32> -> vector<8x256xf32>
    %8 = arith.addf %3, %7 : vector<8x256xf32>
    %c0_7 = arith.constant 0 : index
    %c0_8 = arith.constant 0 : index
    %9 = vector.load %arg7[%c0_7, %c0_8] : memref<8x256xf32, #tpu.memory_space<vmem>>, vector<8x256xf32>
    tpu.vector_store %arg7[%c0_7, %c0_8], %8 {strides = array<i32>} : memref<8x256xf32, #tpu.memory_space<vmem>>, vector<8x256xf32>,
    %c0_i32_9 = arith.constant 0 : i32
    %10 = arith.cmpi eq, %arg1, %c0_i32_9 : i32
    %11 = arith.extui %10 : i1 to i32
    %c0_i32_10 = arith.constant 0 : i32
    %12 = arith.cmpi ne, %11, %c0_i32_10 : i32
    scf.if %12 {
      %c0_11 = arith.constant 0 : index
      %c0_12 = arith.constant 0 : index
      %13 = vector.load %arg7[%c0_11, %c0_12] : memref<8x256xf32, #tpu.memory_space<vmem>>, vector<8x256xf32>
      %c0_13 = arith.constant 0 : index
      %c0_14 = arith.constant 0 : index
      %14 = vector.load %arg4[%c0_13, %c0_14] : memref<8x1xf32, #tpu.memory_space<vmem>>, vector<8x1xf32>
      %15 = vector.broadcast %14 : vector<8x1xf32> to vector<8x256xf32>
      %16 = arith.addf %13, %15 : vector<8x256xf32>
      %c0_15 = arith.constant 0 : index
      %c0_16 = arith.constant 0 : index
      %c0_17 = arith.constant 0 : index
      %17 = vector.load %arg5[%c0_15, %c0_16, %c0_17] : memref<1x8x256xf32, #tpu.memory_space<vmem>>, vector<1x8x256xf32>
      %18 = vector.shape_cast %17 : vector<1x8x256xf32> to vector<8x256xf32>
      %19 = arith.addf %16, %18 : vector<8x256xf32>
      %c0_18 = arith.constant 0 : index
      %c0_19 = arith.constant 0 : index
      %c0_20 = arith.constant 0 : index
      %20 = vector.load %arg6[%c0_18, %c0_19, %c0_20] : memref<1x8x256xf32, #tpu.memory_space<vmem>>, vector<1x8x256xf32>
      %21 = vector.shape_cast %20 : vector<1x8x256xf32> to vector<8x256xf32>
      %22 = vector.shape_cast %19 : vector<8x256xf32> to vector<1x8x256xf32>
      tpu.vector_store %arg6[%c0_18, %c0_19, %c0_20], %22 {strides = array<i32>} : memref<1x8x256xf32, #tpu.memory_space<vmem>>, vector<1x8x256xf32>,
    } else {
    }
    return
  }
  func.func @transform_0(%arg0: i32, %arg1: i32) -> (i32, i32, i32) {
    %c0_i32 = arith.constant 0 : i32
    %c0_i32_0 = arith.constant 0 : i32
    return %arg0, %arg1, %c0_i32 : i32, i32, i32
  }
  func.func @transform_1(%arg0: i32, %arg1: i32) -> (i32, i32) {
    %c0_i32 = arith.constant 0 : i32
    %c0_i32_0 = arith.constant 0 : i32
    return %c0_i32, %arg1 : i32, i32
  }
  func.func @transform_2(%arg0: i32, %arg1: i32) -> (i32, i32) {
    %c0_i32 = arith.constant 0 : i32
    %c0_i32_0 = arith.constant 0 : i32
    %c0_i32_1 = arith.constant 0 : i32
    return %c0_i32, %c0_i32_0 : i32, i32
  }
  func.func @transform_3(%arg0: i32, %arg1: i32) -> (i32, i32, i32) {
    %c0_i32 = arith.constant 0 : i32
    %c0_i32_0 = arith.constant 0 : i32
    %c0_i32_1 = arith.constant 0 : i32
    return %arg0, %c0_i32, %c0_i32_0 : i32, i32, i32
  }
  func.func @transform_4(%arg0: i32, %arg1: i32) -> (i32, i32, i32) {
    %c0_i32 = arith.constant 0 : i32
    %c0_i32_0 = arith.constant 0 : i32
    %c0_i32_1 = arith.constant 0 : i32
    return %arg0, %c0_i32, %c0_i32_0 : i32, i32, i32
  }
}

</mosaic_0001>

<bundles_post_ra>
// kernel: hourglass_forward.32
= control target key start
LH: loop header
LB: loop body
LE: loop exit
PB: predicated region body
PF: predicated region fallthrough
CT: control target
= control target key end

     0   :  { %v299_v0 = vmov 0.0|0.0   ;;  %vm300_vm0 = vmmov 0   ;;  %v301_v3 = vmov 0.0   ;;  %vm30_vm1 = vcmask 130048   ;;  %s398_s1 = inlined_call_operand.vmem [shape: f32[16,128], index: 1, kind: input, shape index: {}]   ;;  %s399_s3 = inlined_call_operand.vmem [shape: f32[128,16], index: 3, kind: input, shape index: {}]   ;;  %s400_s0 = inlined_call_operand.vmem [shape: f32[2,16], index: 0, kind: input, shape index: {}]   ;;  %s401_s2 = inlined_call_operand.vmem [shape: f32[1,128], index: 2, kind: input, shape index: {}]   ;;  %s402_s4 = inlined_call_operand.vmem [shape: f32[1,16], index: 4, kind: input, shape index: {}]   ;;  %s403_s5 = inlined_call_operand.vmem [shape: f32[2,16], index: 5, kind: output, shape index: {}]  }
   0x1   :  { %269 = vmatprep.subr.bf16.mxu0 %v299_v0  ;;  %v21_v1 = vld [vmem:[%s398_s1] sm:$0xff]  ;;  %v22_v2 = vld [vmem:[%s398_s1 + $0x8] sm:$0xff]  ;;  %231 = vmatprep.mubr.msk.f32.mxu0 %vm300_vm0, %v301_v3  ;;  %v107_v7 = vld [vmem:[%s399_s3 + $0x10] sm:$0xff]  ;;  %vm198_vm2 = vcmask 123904  }
   0x2   :  { %v270_v4 = vpack.c.bf16 %v22_v2, %v21_v1  ;;  %272 = vmatprep.subr.bf16.mxu1 %v299_v0  ;;  %v105_v5 = vld [vmem:[%s399_s3] sm:$0xff]  ;;  %v106_v6 = vld [vmem:[%s399_s3 + $0x8] sm:$0xff]  ;;  %266 = vmatprep.mubr.msk.f32.mxu1 %vm300_vm0, %v301_v3  ;;  %v108_v9 = vld [vmem:[%s399_s3 + $0x18] sm:$0xff] }
   0x3   :  { %v273_v8 = vpack.c.bf16 %v106_v6, %v105_v5  ;;  %v20_v10 = vld [vmem:[%s400_s0] sm:$0x3]  ;;  %v276_v11 = vpack.c.bf16 %v108_v9, %v107_v7  ;;  %v110_v13 = vld [vmem:[%s399_s3 + $0x28] sm:$0xff]  ;;  %v111_v15 = vld [vmem:[%s399_s3 + $0x30] sm:$0xff] }
   0x4   :  { %271 = vmatpush3.bf16.msra.mxu0 %v270_v4  ;;  %v109_v12 = vld [vmem:[%s399_s3 + $0x20] sm:$0xff]  ;;  %v112_v16 = vld [vmem:[%s399_s3 + $0x38] sm:$0xff]  ;;  %v114_v19 = vld [vmem:[%s399_s3 + $0x48] sm:$0xff] }
   0x5   :  { %274 = vmatpush3.bf16.msra.mxu1 %v273_v8  ;;  %v279_v14 = vpack.c.bf16 %v110_v13, %v109_v12  ;;  %v282_v17 = vpack.c.bf16 %v112_v16, %v111_v15  ;;  %v113_v18 = vld [vmem:[%s399_s3 + $0x40] sm:$0xff]  ;;  %v115_v21 = vld [vmem:[%s399_s3 + $0x50] sm:$0xff]  ;;  %v116_v22 = vld [vmem:[%s399_s3 + $0x58] sm:$0xff] }
   0x6   :  { %275 = vmatprep.subr.bf16.mxu1 %v299_v0  ;;  %v285_v20 = vpack.c.bf16 %v114_v19, %v113_v18  ;;  %v288_v23 = vpack.c.bf16 %v116_v22, %v115_v21  ;;  %v117_v24 = vld [vmem:[%s399_s3 + $0x60] sm:$0xff]  ;;  %v118_v25 = vld [vmem:[%s399_s3 + $0x68] sm:$0xff]  ;;  %v119_v27 = vld [vmem:[%s399_s3 + $0x70] sm:$0xff] }
   0x7   :  { %232 = vmatmul.mubr.msk.f32.vlgmr.msra.gmra.mrb[0].mxu0 %vm30_vm1, %v20_v10  ;;  %v291_v26 = vpack.c.bf16 %v118_v25, %v117_v24  ;;  %v120_v28 = vld [vmem:[%s399_s3 + $0x78] sm:$0xff]  ;;  %v204_v30 = vld [vmem:[%s401_s2] ss:$0 sm:$0xff] }
   0x8   :  { %v294_v29 = vpack.c.bf16 %v120_v28, %v119_v27  ;;  %v206_v35 = vld [vmem:[%s402_s4] ss:$0 sm:$0xff] }
   0x9   :  { %277 = vmatpush3.bf16.msra.mxu1 %v276_v11 }
   0xa   :  { %278 = vmatprep.subr.bf16.mxu1 %v299_v0 }
   0xd   :  { %280 = vmatpush3.bf16.msra.mxu1 %v279_v14 }
   0xe   :  { %281 = vmatprep.subr.bf16.mxu1 %v299_v0 }
  0x11   :  { %283 = vmatpush3.bf16.msra.mxu1 %v282_v17 }
  0x12   :  { %284 = vmatprep.subr.bf16.mxu1 %v299_v0 }
  0x15   :  { %286 = vmatpush3.bf16.msra.mxu1 %v285_v20 }
  0x16   :  { %287 = vmatprep.subr.bf16.mxu1 %v299_v0 }
  0x19   :  { %289 = vmatpush3.bf16.msra.mxu1 %v288_v23 }
  0x1a   :  { %290 = vmatprep.subr.bf16.mxu1 %v299_v0 }
  0x1d   :  { %292 = vmatpush3.bf16.msra.mxu1 %v291_v26 }
  0x1e   :  { %293 = vmatprep.subr.bf16.mxu1 %v299_v0 }
  0x21   :  { %295 = vmatpush3.bf16.msra.mxu1 %v294_v29 }
  0xda   :  { %v100_v31 = vpop.f32.mrb[0].mxu0 }
  0xdb   :  { %v101_v32 = vadd.f32 %v204_v30, %v100_v31  ;;  %v233_v33 = vpop.f32.mrb[1].mxu0 }
  0xdd   :  { %v104_v34 = vmax.f32 %v101_v32, 0.0 }
  0xdf   :  { %267 = vmatmul.mubr.f32.vlgmr.msra.gmra.mrb[0].mxu1 %v104_v34 }
 0x1b2   :  { %v194_v36 = vpop.f32.mrb[0].mxu1 }
 0x1b3   :  { %v195_v37 = vadd.f32 %v206_v35, %v194_v36  ;;  %v268_v38 = vpop.f32.mrb[1].mxu1 }
 0x1b5   :  { %199 = vst.msk [vmem:[%s403_s5] sm:$0x3] %vm198_vm2, %v195_v37 }

// kernel: hourglass_forward.31
= control target key start
LH: loop header
LB: loop body
LE: loop exit
PB: predicated region body
PF: predicated region fallthrough
CT: control target
= control target key end

     0   :  { %s584_s12 = smov 0   ;;  %s586_s13 = smov 0   ;;  %s670_s0 = inlined_call_operand.vmem [shape: f32[2,147,256], index: 0, kind: input, shape index: {}]   ;;  %s671_s1 = inlined_call_operand.vmem [shape: f32[8,147], index: 1, kind: input, shape index: {}]   ;;  %s672_s2 = inlined_call_operand.vmem [shape: f32[8,1], index: 2, kind: input, shape index: {}]   ;;  %s673_s3 = inlined_call_operand.vmem [shape: f32[2,8,256], index: 3, kind: output, shape index: {}]  }
   0x1   :  { %s588_s14 = smov 0  }
   0x2 LB: > { %s25_s15 = sadd.s32 1, %s557_s13  ;;  %p466_p0 = scmp.ge.s32.totalorder %s561_s14, 1  ;;  %s561_s14 = sphi %s588_s14, %s13_s14   ;;  %s557_s13 = sphi %s586_s13, %s675_s13   ;;  %s553_s12 = sphi %s584_s12, %s674_s12  }
   0x3   : > { %p27_p1 = scmp.ge.s32.totalorder %s25_s15, 2  ;;  %p168_p2 = scmp.lt.s32.totalorder %s561_s14, 3 }
   0x5   : > { %s677_s15 = smov (%p27_p1, %s25_s15), 0  ;;  %p169_p3 = pnand %p466_p0, %p168_p2 }
   0x6   : > { %p203_p4 = scmp.lt.s32.totalorder (!%p169_p3), %s553_s12, 1  ;;  %v233_v0 = vld [vmem:[%s671_s1 + $0x8] sm:$0xff] (!%p169_p3)  ;;  %vm272_vm0 = vcmask (!%p169_p3), 154624   ;;  %v563_v1 = vmov (!%p169_p3), 0   ;;  %v363_v2 = vld [vmem:[%s672_s2] sm:$0xff] (!%p169_p3)  ;;  %vm276_vm1 = vcmask (!%p169_p3), 1042432  }
   0x7   : > { %172 = sbr.rel (%p169_p3) target bundleno = 275 (0x113), region = 32  ;;  %472 = vmatprep.mubr.msk.f32.mxu0 (!%p169_p3), %vm272_vm0, %v233_v0  ;;  %538 = vset.pattern.permute.xlu0 (!%p169_p3), %v563_v1  ;;  %v232_v59 = vld [vmem:[%s671_s1] sm:$0xff] (!%p169_p3) }
   0x8   : > { %366 = vperm.xlu0 (!%p169_p3), %538, %v363_v2  }
   0xe   : > { %s679_s12 = smov (!%p203_p4, %s553_s12), 1 }
   0xf   : > { %s512_s20 = smul.u32 304, %s679_s12  ;;  %s475_s26 = sshll.u32 %s679_s12, 4 }
  0x10   : > { %s223_s29 = scalar_lea.vmem %s673_s3, %s475_s26 }
  0x11   : > { %s614_s23 = scalar_lea.vmem %s670_s0, %s512_s20 }
  0x12   : > { %v235_v3 = vld [vmem:[%s614_s23 + $0x8] sm:$0xff]  ;;  %v237_v4 = vld [vmem:[%s614_s23 + $0x18] sm:$0xff]  ;;  %v234_v5 = vld [vmem:[%s614_s23] sm:$0xff] }
  0x13   : > { %v476_v6 = vpack.c.bf16 %v237_v4, %v235_v3  ;;  %v236_v7 = vld [vmem:[%s614_s23 + $0x10] sm:$0xff]  ;;  %v239_v8 = vld [vmem:[%s614_s23 + $0x28] sm:$0xff]  ;;  %v241_v9 = vld [vmem:[%s614_s23 + $0x38] sm:$0xff] }
  0x14   : > { %v478_v10 = vpack.c.bf16 %v236_v7, %v234_v5  ;;  %v480_v11 = vpack.c.bf16 %v241_v9, %v239_v8  ;;  %v238_v12 = vld [vmem:[%s614_s23 + $0x20] sm:$0xff]  ;;  %v240_v13 = vld [vmem:[%s614_s23 + $0x30] sm:$0xff]  ;;  %v243_v14 = vld [vmem:[%s614_s23 + $0x48] sm:$0xff] }
  0x15   : > { %477 = vmatprep.subr.bf16.mxu0 %v476_v6  ;;  %v245_v15 = vld [vmem:[%s614_s23 + $0x58] sm:$0xff]  ;;  %v482_v16 = vpack.c.bf16 %v240_v13, %v238_v12  ;;  %v242_v18 = vld [vmem:[%s614_s23 + $0x40] sm:$0xff]  ;;  %v244_v19 = vld [vmem:[%s614_s23 + $0x50] sm:$0xff] }
  0x16   : > { %479 = vmatpush1.bf16.msra.mxu0 %v478_v10  ;;  %v484_v17 = vpack.c.bf16 %v245_v15, %v243_v14  ;;  %v247_v20 = vld [vmem:[%s614_s23 + $0x68] sm:$0xff]  ;;  %v249_v21 = vld [vmem:[%s614_s23 + $0x78] sm:$0xff]  ;;  %v486_v22 = vpack.c.bf16 %v244_v19, %v242_v18  ;;  %v246_v24 = vld [vmem:[%s614_s23 + $0x60] sm:$0xff] }
  0x17   : > { %481 = vmatprep.subr.bf16.mxu0 %v480_v11  ;;  %v488_v23 = vpack.c.bf16 %v249_v21, %v247_v20  ;;  %v248_v25 = vld [vmem:[%s614_s23 + $0x70] sm:$0xff]  ;;  %v251_v26 = vld [vmem:[%s614_s23 + $0x88] sm:$0xff]  ;;  %v253_v27 = vld [vmem:[%s614_s23 + $0x98] sm:$0xff] }
  0x18   : > { %v490_v28 = vpack.c.bf16 %v248_v25, %v246_v24  ;;  %v492_v29 = vpack.c.bf16 %v253_v27, %v251_v26  ;;  %v250_v30 = vld [vmem:[%s614_s23 + $0x80] sm:$0xff]  ;;  %v252_v31 = vld [vmem:[%s614_s23 + $0x90] sm:$0xff]  ;;  %v255_v32 = vld [vmem:[%s614_s23 + $0xa8] sm:$0xff] }
  0x19   : > { %v257_v33 = vld [vmem:[%s614_s23 + $0xb8] sm:$0xff]  ;;  %v494_v34 = vpack.c.bf16 %v252_v31, %v250_v30  ;;  %v254_v36 = vld [vmem:[%s614_s23 + $0xa0] sm:$0xff]  ;;  %v256_v37 = vld [vmem:[%s614_s23 + $0xb0] sm:$0xff] }
  0x1a   : > { %483 = vmatpush1.bf16.msra.mxu0 %v482_v16  ;;  %v496_v35 = vpack.c.bf16 %v257_v33, %v255_v32  ;;  %v259_v38 = vld [vmem:[%s614_s23 + $0xc8] sm:$0xff]  ;;  %v261_v39 = vld [vmem:[%s614_s23 + $0xd8] sm:$0xff]  ;;  %v498_v40 = vpack.c.bf16 %v256_v37, %v254_v36  ;;  %v258_v42 = vld [vmem:[%s614_s23 + $0xc0] sm:$0xff] }
  0x1b   : > { %485 = vmatprep.subr.bf16.mxu0 %v484_v17  ;;  %v500_v41 = vpack.c.bf16 %v261_v39, %v259_v38  ;;  %v260_v43 = vld [vmem:[%s614_s23 + $0xd0] sm:$0xff]  ;;  %v263_v44 = vld [vmem:[%s614_s23 + $0xe8] sm:$0xff]  ;;  %v265_v45 = vld [vmem:[%s614_s23 + $0xf8] sm:$0xff] }
  0x1c   : > { %v502_v46 = vpack.c.bf16 %v260_v43, %v258_v42  ;;  %v504_v47 = vpack.c.bf16 %v265_v45, %v263_v44  ;;  %v262_v48 = vld [vmem:[%s614_s23 + $0xe0] sm:$0xff]  ;;  %v264_v49 = vld [vmem:[%s614_s23 + $0xf0] sm:$0xff]  ;;  %v267_v50 = vld [vmem:[%s614_s23 + $0x108] sm:$0xff] }
  0x1d   : > { %v269_v51 = vld [vmem:[%s614_s23 + $0x118] sm:$0xff]  ;;  %v506_v52 = vpack.c.bf16 %v264_v49, %v262_v48  ;;  %v266_v54 = vld [vmem:[%s614_s23 + $0x100] sm:$0xff]  ;;  %v268_v55 = vld [vmem:[%s614_s23 + $0x110] sm:$0xff] }
  0x1e   : > { %487 = vmatpush1.bf16.msra.mxu0 %v486_v22  ;;  %v508_v53 = vpack.c.bf16 %v269_v51, %v267_v50  ;;  %v510_v56 = vpack.c.bf16 %v268_v55, %v266_v54  ;;  %v271_v57 = vld [vmem:[%s614_s23 + $0x128] sm:$0x7]  ;;  %v270_v58 = vld [vmem:[%s614_s23 + $0x120] sm:$0x7] }
  0x1f   : > { %489 = vmatprep.subr.bf16.mxu0 %v488_v23 }
  0x22   : > { %491 = vmatpush1.bf16.msra.mxu0 %v490_v28 }
  0x23   : > { %493 = vmatprep.subr.bf16.mxu0 %v492_v29 }
  0x26   : > { %495 = vmatpush1.bf16.msra.mxu0 %v494_v34 }
  0x27   : > { %497 = vmatprep.subr.bf16.mxu0 %v496_v35 }
  0x2a   : > { %499 = vmatpush1.bf16.msra.mxu0 %v498_v40 }
  0x2b   : > { %501 = vmatprep.subr.bf16.mxu0 %v500_v41 }
  0x2e   : > { %503 = vmatpush1.bf16.msra.mxu0 %v502_v46 }
  0x2f   : > { %505 = vmatprep.subr.bf16.mxu0 %v504_v47 }
  0x32   : > { %507 = vmatpush1.bf16.msra.mxu0 %v506_v52 }
  0x33   : > { %509 = vmatprep.subr.bf16.mxu0 %v508_v53 }
  0x36   : > { %511 = vmatpush1.bf16.msra.mxu0 %v510_v56 }
  0x37   : > { %470 = vmatprep.subr.msk.mxu0 %vm276_vm1, %v271_v57 }
  0x3a   : > { %471 = vmatpush1.msk.msra.mxu0 %vm276_vm1, %v270_v58 }
  0x3b   : > { %348 = vmatmul.mubr.f32.vlgmr.msra.gmra.mrb[0].mxu0 %v232_v59 }
  0x87   : > { %v367_v60 = vpop.permute.xlu0 %366 }
 0x10e   : > { %v349_v61 = vpop.f32.mrb[0].mxu0 }
 0x10f   : > { %v369_v62 = vadd.f32 %v367_v60, %v349_v61  ;;  %v351_v63 = vpop.f32.mrb[1].mxu0 }
 0x110   : > { %v370_v0 = vadd.f32 %v367_v60, %v351_v63 }
 0x111   : > { %371 = vst [vmem:[%s223_s29] sm:$0xff] %v369_v62 }
 0x112   : > { %372 = vst [vmem:[%s223_s29 + $0x8] sm:$0xff] %v370_v0 }
 0x113 PF: > { %s13_s14 = sadd.s32 1, %s561_s14   ;;  %s674_s12 = smov %s557_s13 }
 0x114   : > { %p10_p5 = scmp.ge.s32.totalorder %s13_s14, 4   ;;  %s675_s13 = smov %s677_s15 }
 0x116   :  { %12 = sbr.rel (!%p10_p5) target bundleno = 2 (0x2), region = 73 }

// kernel: hourglass_forward.33
= control target key start
LH: loop header
LB: loop body
LE: loop exit
PB: predicated region body
PF: predicated region fallthrough
CT: control target
= control target key end

     0   :  { %s386_s12 = smov 0   ;;  %s417_s0 = inlined_call_operand.vmem [shape: f32[16,256], index: 0, kind: input, shape index: {}]   ;;  %s418_s1 = inlined_call_operand.vmem [shape: f32[16,1], index: 1, kind: input, shape index: {}]   ;;  %s419_s2 = inlined_call_operand.vmem [shape: f32[16,1], index: 2, kind: input, shape index: {}]   ;;  %s420_s3 = inlined_call_operand.vmem [shape: f32[16,256], index: 3, kind: output, shape index: {}]  }
   0x1 LB: > { %s329_s13 = sadd.s32 4294967295, %s363_s12   ;;  %p333_p0 = scmp.ge.s32.totalorder %s363_s12, 1  ;;  %s363_s12 = sphi %s386_s12, %s13_s12  }
   0x2   : > { %p155_p1 = scmp.lt.s32.totalorder %s363_s12, 3 }
   0x4   : > { %p156_p2 = pnand %p333_p0, %p155_p1 }
   0x5   : > { %p187_p3 = scmp.lt.s32.totalorder (!%p156_p2), %s329_s13, 1  ;;  %v365_v0 = vmov (!%p156_p2), 0  }
   0x6   : > { %159 = sbr.rel (%p156_p2) target bundleno = 192 (0xc0), region = 32  ;;  %353 = vset.pattern.permute.xlu1 (!%p156_p2), %v365_v0  ;;  %354 = vset.pattern.permute.xlu0 (!%p156_p2), %v365_v0 }
   0xd   : > { %s422_s13 = smov (!%p187_p3, %s329_s13), 1 }
   0xe   : > { %s342_s14 = sshll.u32 %s422_s13, 4  ;;  %s336_s15 = sshll.u32 %s422_s13, 3 }
   0xf   : > { %s191_s18 = scalar_lea.vmem %s417_s0, %s342_s14  ;;  %s195_s21 = scalar_lea.vmem %s418_s1, %s336_s15 }
  0x10   : > { %v205_v1 = vld [vmem:[%s191_s18] sm:$0xff]  ;;  %v206_v2 = vld [vmem:[%s191_s18 + $0x8] sm:$0xff]  ;;  %s199_s24 = scalar_lea.vmem %s419_s2, %s336_s15  ;;  %s204_s27 = scalar_lea.vmem %s420_s3, %s342_s14 }
  0x11   : > { %v207_v3 = vadd.f32 %v206_v2, %v205_v1  ;;  %v212_v4 = vmul.f32 %v205_v1, %v205_v1  ;;  %v213_v5 = vmul.f32 %v206_v2, %v206_v2  ;;  %v226_v6 = vld [vmem:[%s195_s21] sm:$0xff] }
  0x12   : > { %229 = vperm.xlu1 %353, %v226_v6   ;;  %v234_v8 = vld [vmem:[%s199_s24] sm:$0xff] }
  0x13   : > { %208 = vadd.xlane.f32.xlu0 %v207_v3  ;;  %v214_v7 = vadd.f32 %v213_v5, %v212_v4 }
  0x16   : > { %237 = vperm.xlu1 %353, %v234_v8  }
  0x17   : > { %215 = vadd.xlane.f32.xlu0 %v214_v7 }
  0x91   : > { %v230_v16 = vpop.permute.xlu1 %229 }
  0x95   : > { %v238_v24 = vpop.permute.xlu1 %237 }
  0xa0   : > { %v209_v9 = vpop.xlane.xlu0 %208 }
  0xa1   : > { %v211_v10 = vmul.f32 0.00390625, %v209_v9 }
  0xa3   : > { %v218_v12 = vmul.f32 %v211_v10, %v211_v10  ;;  %v222_v17 = vsub.f32 %v205_v1, %v211_v10  ;;  %v223_v18 = vsub.f32 %v206_v2, %v211_v10 }
  0xa4   : > { %v216_v11 = vpop.xlane.xlu0 %215 }
  0xa5   : > { %v217_v13 = vmul.f32 0.00390625, %v216_v11 }
  0xa7   : > { %v219_v14 = vsub.f32 %v217_v13, %v218_v12 }
  0xa9   : > { %v220_v15 = vadd.f32 1e-05, %v219_v14 }
  0xab   : > { %355 = vrsqrt.f32 %v220_v15 }
  0xb5   : > { %v356_v19 = vpop.eup %355 }
  0xb6   : > { %v224_v20 = vmul.f32 %v356_v19, %v222_v17  ;;  %v225_v21 = vmul.f32 %v356_v19, %v223_v18 }
  0xb8   : > { %v232_v22 = vmul.f32 %v230_v16, %v224_v20  ;;  %v233_v23 = vmul.f32 %v230_v16, %v225_v21 }
  0xba   : > { %v240_v25 = vadd.f32 %v238_v24, %v232_v22  ;;  %v241_v26 = vadd.f32 %v238_v24, %v233_v23 }
  0xbc   : > { %vm242_vm0 = vcmp.ge.f32.partialorder %v240_v25, 0.0  ;;  %vm243_vm1 = vcmp.ge.f32.partialorder %v241_v26, 0.0  ;;  %v244_v27 = vmul.f32 0.01, %v240_v25  ;;  %v245_v28 = vmul.f32 0.01, %v241_v26 }
  0xbe   : > { %v246_v29 = vsel %vm242_vm0, %v240_v25, %v244_v27  ;;  %v247_v30 = vsel %vm243_vm1, %v241_v26, %v245_v28 }
  0xbf   : > { %248 = vst [vmem:[%s204_s27] sm:$0xff] %v246_v29  ;;  %249 = vst [vmem:[%s204_s27 + $0x8] sm:$0xff] %v247_v30 }
  0xc0 PF: > { %s13_s12 = sadd.s32 1, %s363_s12  }
  0xc1   : > { %p10_p4 = scmp.ge.s32.totalorder %s13_s12, 4  }
  0xc3   :  { %12 = sbr.rel (!%p10_p4) target bundleno = 1 (0x1), region = 68 }

// kernel: hourglass_forward.34
= control target key start
LH: loop header
LB: loop body
LE: loop exit
PB: predicated region body
PF: predicated region fallthrough
CT: control target
= control target key end

     0   :  { %s601_s12 = smov 0   ;;  %s603_s13 = smov 0   ;;  %s674_s0 = inlined_call_operand.vmem [shape: f32[2,128,64], index: 0, kind: input, shape index: {}]   ;;  %s675_s1 = inlined_call_operand.vmem [shape: f32[16,128], index: 1, kind: input, shape index: {}]   ;;  %s676_s2 = inlined_call_operand.vmem [shape: f32[16,1], index: 2, kind: input, shape index: {}]   ;;  %s677_s3 = inlined_call_operand.vmem [shape: f32[2,16,64], index: 3, kind: output, shape index: {}]  }
   0x1   :  { %s605_s14 = smov 0  }
   0x2 LB: > { %s25_s15 = sadd.s32 1, %s573_s13  ;;  %p434_p0 = scmp.ge.s32.totalorder %s577_s14, 1  ;;  %s577_s14 = sphi %s605_s14, %s13_s14   ;;  %s573_s13 = sphi %s603_s13, %s679_s13   ;;  %s569_s12 = sphi %s601_s12, %s678_s12  }
   0x3   : > { %p27_p1 = scmp.ge.s32.totalorder %s25_s15, 2  ;;  %p165_p2 = scmp.lt.s32.totalorder %s577_s14, 3 }
   0x5   : > { %s681_s15 = smov (%p27_p1, %s25_s15), 0  ;;  %p166_p3 = pnand %p434_p0, %p165_p2 }
   0x6   : > { %p198_p4 = scmp.lt.s32.totalorder (!%p166_p3), %s569_s12, 1  ;;  %v225_v0 = vld [vmem:[%s675_s1] sm:$0xff] (!%p166_p3)  ;;  %vm220_vm0 = vcmask (!%p166_p3), 523264   ;;  %v579_v2 = vmov (!%p166_p3), 0   ;;  %v580_v3 = vmov (!%p166_p3), 0.0   ;;  %v329_v4 = vld [vmem:[%s676_s2 + $0x8] sm:$0xff] (!%p166_p3) }
   0x7   : > { %169 = sbr.rel (%p166_p3) target bundleno = 278 (0x116), region = 32  ;;  %v328_v1 = vld [vmem:[%s676_s2] sm:$0xff] (!%p166_p3)  ;;  %493 = vmatprep.mubr.f32.mxu0 (!%p166_p3), %v225_v0  ;;  %554 = vset.pattern.permute.xlu0 (!%p166_p3), %v579_v2  ;;  %222 = vst.msk [vmem:[#allocation2 + $0x8] sm:$0xff] (!%p166_p3), %vm220_vm0, %v580_v3  ;;  %221 = vst.msk [vmem:[#allocation2] sm:$0xff] (!%p166_p3), %vm220_vm0, %v580_v3  ;;  %v226_v29 = vld [vmem:[%s675_s1 + $0x8] sm:$0xff] (!%p166_p3) }
   0x8   : > { %332 = vperm.xlu0 (!%p166_p3), %554, %v328_v1  }
   0xc   : > { %337 = vperm.xlu0 (!%p166_p3), %554, %v329_v4  }
   0xe   : > { %s683_s12 = smov (!%p198_p4, %s569_s12), 1  ;;  %v224_v30 = vld [vmem:[#allocation2 + $0x8] sm:$0xff]  ;;  %v223_v31 = vld [vmem:[#allocation2] sm:$0xff] }
   0xf   : > { %s441_s22 = sshll.u32 %s683_s12, 7  ;;  %s442_s28 = sshll.u32 %s683_s12, 4 }
  0x10   : > { %s636_s25 = scalar_lea.vmem %s674_s0, %s441_s22  ;;  %s215_s4 = scalar_lea.vmem %s677_s3, %s442_s28 }
  0x11   : > { %v227_v5 = vld [vmem:[%s636_s25] sm:$0xff]  ;;  %v228_v6 = vld [vmem:[%s636_s25 + $0x8] sm:$0xff]  ;;  %v229_v7 = vld [vmem:[%s636_s25 + $0x10] sm:$0xff] }
  0x12   : > { %v496_v8 = vpack.c.bf16 %v228_v6, %v227_v5  ;;  %v230_v9 = vld [vmem:[%s636_s25 + $0x18] sm:$0xff]  ;;  %v231_v11 = vld [vmem:[%s636_s25 + $0x20] sm:$0xff]  ;;  %v232_v12 = vld [vmem:[%s636_s25 + $0x28] sm:$0xff] }
  0x13   : > { %v500_v10 = vpack.c.bf16 %v230_v9, %v229_v7  ;;  %v504_v13 = vpack.c.bf16 %v232_v12, %v231_v11  ;;  %v233_v14 = vld [vmem:[%s636_s25 + $0x30] sm:$0xff]  ;;  %v234_v15 = vld [vmem:[%s636_s25 + $0x38] sm:$0xff]  ;;  %v235_v17 = vld [vmem:[%s636_s25 + $0x40] sm:$0xff] }
  0x14   : > { %497 = vmatprep.subr.bf16.mxu0 %v496_v8  ;;  %v508_v16 = vpack.c.bf16 %v234_v15, %v233_v14  ;;  %v236_v18 = vld [vmem:[%s636_s25 + $0x48] sm:$0xff]  ;;  %v237_v20 = vld [vmem:[%s636_s25 + $0x50] sm:$0xff]  ;;  %v238_v21 = vld [vmem:[%s636_s25 + $0x58] sm:$0xff] }
  0x15   : > { %499 = vmatpush3.bf16.msra.mxu0 %v496_v8  ;;  %v512_v19 = vpack.c.bf16 %v236_v18, %v235_v17  ;;  %v516_v22 = vpack.c.bf16 %v238_v21, %v237_v20  ;;  %v239_v23 = vld [vmem:[%s636_s25 + $0x60] sm:$0xff]  ;;  %v240_v24 = vld [vmem:[%s636_s25 + $0x68] sm:$0xff]  ;;  %v241_v26 = vld [vmem:[%s636_s25 + $0x70] sm:$0xff] }
  0x16   : > { %501 = vmatprep.subr.bf16.mxu0 %v500_v10  ;;  %v520_v25 = vpack.c.bf16 %v240_v24, %v239_v23  ;;  %v242_v27 = vld [vmem:[%s636_s25 + $0x78] sm:$0xff] }
  0x17   : > { %v524_v28 = vpack.c.bf16 %v242_v27, %v241_v26 }
  0x19   : > { %503 = vmatpush3.bf16.msra.mxu0 %v500_v10 }
  0x1a   : > { %505 = vmatprep.subr.bf16.mxu0 %v504_v13 }
  0x1d   : > { %507 = vmatpush3.bf16.msra.mxu0 %v504_v13 }
  0x1e   : > { %509 = vmatprep.subr.bf16.mxu0 %v508_v16 }
  0x21   : > { %511 = vmatpush3.bf16.msra.mxu0 %v508_v16 }
  0x22   : > { %513 = vmatprep.subr.bf16.mxu0 %v512_v19 }
  0x25   : > { %515 = vmatpush3.bf16.msra.mxu0 %v512_v19 }
  0x26   : > { %517 = vmatprep.subr.bf16.mxu0 %v516_v22 }
  0x29   : > { %519 = vmatpush3.bf16.msra.mxu0 %v516_v22 }
  0x2a   : > { %521 = vmatprep.subr.bf16.mxu0 %v520_v25 }
  0x2d   : > { %523 = vmatpush3.bf16.msra.mxu0 %v520_v25 }
  0x2e   : > { %525 = vmatprep.subr.bf16.mxu0 %v524_v28 }
  0x31   : > { %527 = vmatpush3.bf16.msra.mxu0 %v524_v28 }
  0x34   : > { %494 = vmatmul.mubr.f32.vlgmr.msra.gmra.mrb[0].mxu0 %v226_v29 }
  0x87   : > { %v333_v36 = vpop.permute.xlu0 %332 }
  0x8b   : > { %v338_v37 = vpop.permute.xlu0 %337 }
 0x107   : > { %v495_v32 = vpop.f32.mrb[0].mxu0 }
 0x108   : > { %v319_v33 = vadd.f32 %v495_v32, %v224_v30  ;;  %v309_v34 = vpop.f32.mrb[1].mxu0 }
 0x109   : > { %v318_v35 = vadd.f32 %v309_v34, %v223_v31 }
 0x10a   : > { %322 = vst.msk [vmem:[#allocation2 + $0x8] sm:$0xff] %vm220_vm0, %v319_v33 }
 0x10b   : > { %321 = vst.msk [vmem:[#allocation2] sm:$0xff] %vm220_vm0, %v318_v35 }
 0x111   : > { %v327_v38 = vld [vmem:[#allocation2 + $0x8] sm:$0xff] }
 0x112   : > { %v326_v39 = vld [vmem:[#allocation2] sm:$0xff]  ;;  %v341_v40 = vadd.f32 %v338_v37, %v327_v38 }
 0x113   : > { %v340_v41 = vadd.f32 %v333_v36, %v326_v39 }
 0x114   : > { %343 = vst.msk [vmem:[%s215_s4 + $0x8] sm:$0xff] %vm220_vm0, %v341_v40 }
 0x115   : > { %342 = vst.msk [vmem:[%s215_s4] sm:$0xff] %vm220_vm0, %v340_v41 }
 0x116 PF: > { %s13_s14 = sadd.s32 1, %s577_s14   ;;  %s678_s12 = smov %s573_s13 }
 0x117   : > { %p10_p5 = scmp.ge.s32.totalorder %s13_s14, 4   ;;  %s679_s13 = smov %s681_s15 }
 0x119   :  { %12 = sbr.rel (!%p10_p5) target bundleno = 2 (0x2), region = 73 }

// kernel: hourglass_forward.35
= control target key start
LH: loop header
LB: loop body
LE: loop exit
PB: predicated region body
PF: predicated region fallthrough
CT: control target
= control target key end

     0   :  { %v299_v0 = vmov 0.0|0.0   ;;  %vm300_vm0 = vmmov 0   ;;  %v301_v3 = vmov 0.0   ;;  %vm30_vm1 = vcmask 130048   ;;  %s398_s1 = inlined_call_operand.vmem [shape: f32[16,128], index: 1, kind: input, shape index: {}]   ;;  %s399_s3 = inlined_call_operand.vmem [shape: f32[128,32], index: 3, kind: input, shape index: {}]   ;;  %s400_s0 = inlined_call_operand.vmem [shape: f32[2,16], index: 0, kind: input, shape index: {}]   ;;  %s401_s2 = inlined_call_operand.vmem [shape: f32[1,128], index: 2, kind: input, shape index: {}]   ;;  %s402_s4 = inlined_call_operand.vmem [shape: f32[1,32], index: 4, kind: input, shape index: {}]   ;;  %s403_s5 = inlined_call_operand.vmem [shape: f32[2,32], index: 5, kind: output, shape index: {}]  }
   0x1   :  { %269 = vmatprep.subr.bf16.mxu0 %v299_v0  ;;  %v21_v1 = vld [vmem:[%s398_s1] sm:$0xff]  ;;  %v22_v2 = vld [vmem:[%s398_s1 + $0x8] sm:$0xff]  ;;  %231 = vmatprep.mubr.msk.f32.mxu0 %vm300_vm0, %v301_v3  ;;  %v107_v7 = vld [vmem:[%s399_s3 + $0x10] sm:$0xff]  ;;  %vm198_vm2 = vcmask 254976  }
   0x2   :  { %v270_v4 = vpack.c.bf16 %v22_v2, %v21_v1  ;;  %272 = vmatprep.subr.bf16.mxu1 %v299_v0  ;;  %v105_v5 = vld [vmem:[%s399_s3] sm:$0xff]  ;;  %v106_v6 = vld [vmem:[%s399_s3 + $0x8] sm:$0xff]  ;;  %266 = vmatprep.mubr.msk.f32.mxu1 %vm300_vm0, %v301_v3  ;;  %v108_v9 = vld [vmem:[%s399_s3 + $0x18] sm:$0xff] }
   0x3   :  { %v273_v8 = vpack.c.bf16 %v106_v6, %v105_v5  ;;  %v20_v10 = vld [vmem:[%s400_s0] sm:$0x3]  ;;  %v276_v11 = vpack.c.bf16 %v108_v9, %v107_v7  ;;  %v110_v13 = vld [vmem:[%s399_s3 + $0x28] sm:$0xff]  ;;  %v111_v15 = vld [vmem:[%s399_s3 + $0x30] sm:$0xff] }
   0x4   :  { %271 = vmatpush3.bf16.msra.mxu0 %v270_v4  ;;  %v109_v12 = vld [vmem:[%s399_s3 + $0x20] sm:$0xff]  ;;  %v112_v16 = vld [vmem:[%s399_s3 + $0x38] sm:$0xff]  ;;  %v114_v19 = vld [vmem:[%s399_s3 + $0x48] sm:$0xff] }
   0x5   :  { %274 = vmatpush3.bf16.msra.mxu1 %v273_v8  ;;  %v279_v14 = vpack.c.bf16 %v110_v13, %v109_v12  ;;  %v282_v17 = vpack.c.bf16 %v112_v16, %v111_v15  ;;  %v113_v18 = vld [vmem:[%s399_s3 + $0x40] sm:$0xff]  ;;  %v115_v21 = vld [vmem:[%s399_s3 + $0x50] sm:$0xff]  ;;  %v116_v22 = vld [vmem:[%s399_s3 + $0x58] sm:$0xff] }
   0x6   :  { %275 = vmatprep.subr.bf16.mxu1 %v299_v0  ;;  %v285_v20 = vpack.c.bf16 %v114_v19, %v113_v18  ;;  %v288_v23 = vpack.c.bf16 %v116_v22, %v115_v21  ;;  %v117_v24 = vld [vmem:[%s399_s3 + $0x60] sm:$0xff]  ;;  %v118_v25 = vld [vmem:[%s399_s3 + $0x68] sm:$0xff]  ;;  %v119_v27 = vld [vmem:[%s399_s3 + $0x70] sm:$0xff] }
   0x7   :  { %232 = vmatmul.mubr.msk.f32.vlgmr.msra.gmra.mrb[0].mxu0 %vm30_vm1, %v20_v10  ;;  %v291_v26 = vpack.c.bf16 %v118_v25, %v117_v24  ;;  %v120_v28 = vld [vmem:[%s399_s3 + $0x78] sm:$0xff]  ;;  %v204_v30 = vld [vmem:[%s401_s2] ss:$0 sm:$0xff] }
   0x8   :  { %v294_v29 = vpack.c.bf16 %v120_v28, %v119_v27  ;;  %v206_v35 = vld [vmem:[%s402_s4] ss:$0 sm:$0xff] }
   0x9   :  { %277 = vmatpush3.bf16.msra.mxu1 %v276_v11 }
   0xa   :  { %278 = vmatprep.subr.bf16.mxu1 %v299_v0 }
   0xd   :  { %280 = vmatpush3.bf16.msra.mxu1 %v279_v14 }
   0xe   :  { %281 = vmatprep.subr.bf16.mxu1 %v299_v0 }
  0x11   :  { %283 = vmatpush3.bf16.msra.mxu1 %v282_v17 }
  0x12   :  { %284 = vmatprep.subr.bf16.mxu1 %v299_v0 }
  0x15   :  { %286 = vmatpush3.bf16.msra.mxu1 %v285_v20 }
  0x16   :  { %287 = vmatprep.subr.bf16.mxu1 %v299_v0 }
  0x19   :  { %289 = vmatpush3.bf16.msra.mxu1 %v288_v23 }
  0x1a   :  { %290 = vmatprep.subr.bf16.mxu1 %v299_v0 }
  0x1d   :  { %292 = vmatpush3.bf16.msra.mxu1 %v291_v26 }
  0x1e   :  { %293 = vmatprep.subr.bf16.mxu1 %v299_v0 }
  0x21   :  { %295 = vmatpush3.bf16.msra.mxu1 %v294_v29 }
  0xda   :  { %v100_v31 = vpop.f32.mrb[0].mxu0 }
  0xdb   :  { %v101_v32 = vadd.f32 %v204_v30, %v100_v31  ;;  %v233_v33 = vpop.f32.mrb[1].mxu0 }
  0xdd   :  { %v104_v34 = vmax.f32 %v101_v32, 0.0 }
  0xdf   :  { %267 = vmatmul.mubr.f32.vlgmr.msra.gmra.mrb[0].mxu1 %v104_v34 }
 0x1b2   :  { %v194_v36 = vpop.f32.mrb[0].mxu1 }
 0x1b3   :  { %v195_v37 = vadd.f32 %v206_v35, %v194_v36  ;;  %v268_v38 = vpop.f32.mrb[1].mxu1 }
 0x1b5   :  { %199 = vst.msk [vmem:[%s403_s5] sm:$0x3] %vm198_vm2, %v195_v37 }

// kernel: hourglass_forward.36
= control target key start
LH: loop header
LB: loop body
LE: loop exit
PB: predicated region body
PF: predicated region fallthrough
CT: control target
= control target key end

     0   :  { %s427_s12 = smov 0   ;;  %s462_s0 = inlined_call_operand.vmem [shape: f32[32,64], index: 0, kind: input, shape index: {}]   ;;  %s463_s1 = inlined_call_operand.vmem [shape: f32[32,1], index: 1, kind: input, shape index: {}]   ;;  %s464_s2 = inlined_call_operand.vmem [shape: f32[32,1], index: 2, kind: input, shape index: {}]   ;;  %s465_s3 = inlined_call_operand.vmem [shape: f32[32,64], index: 3, kind: output, shape index: {}]  }
   0x1 LB: > { %s368_s13 = sadd.s32 4294967295, %s404_s12   ;;  %p372_p0 = scmp.ge.s32.totalorder %s404_s12, 1  ;;  %s404_s12 = sphi %s427_s12, %s13_s12  }
   0x2   : > { %p160_p1 = scmp.lt.s32.totalorder %s404_s12, 3 }
   0x4   : > { %p161_p2 = pnand %p372_p0, %p160_p1 }
   0x5   : > { %s373_s14 = sshll.u32 (!%p161_p2), %s368_s13, 1  ;;  %v406_v0 = vmov (!%p161_p2), 0   ;;  %vm220_vm0 = vcmask (!%p161_p2), 523264  }
   0x6   : > { %164 = sbr.rel (%p161_p2) target bundleno = 193 (0xc1), region = 32  ;;  %p195_p3 = scmp.lt.s32.totalorder (!%p161_p2), %s373_s14, 3  ;;  %393 = vset.pattern.permute.xlu1 (!%p161_p2), %v406_v0  ;;  %392 = vset.pattern.permute.xlu0 (!%p161_p2), %v406_v0 }
   0xd   : > { %s467_s14 = smov (!%p195_p3, %s373_s14), 3 }
   0xe   : > { %s435_s15 = sshll.u32 %s467_s14, 3 }
   0xf   : > { %s198_s18 = scalar_lea.vmem %s462_s0, %s435_s15  ;;  %s204_s21 = scalar_lea.vmem %s463_s1, %s435_s15 }
  0x10   : > { %v218_v1 = vld [vmem:[%s198_s18] sm:$0xff]  ;;  %v219_v2 = vld [vmem:[%s198_s18 + $0x8] sm:$0xff]  ;;  %s210_s24 = scalar_lea.vmem %s464_s2, %s435_s15  ;;  %s216_s27 = scalar_lea.vmem %s465_s3, %s435_s15 }
  0x11   : > { %v221_v3 = vsel %vm220_vm0, %v218_v1, 0.0  ;;  %v230_v4 = vmul.f32 %v218_v1, %v218_v1  ;;  %v231_v5 = vmul.f32 %v219_v2, %v219_v2  ;;  %v224_v7 = vsel %vm220_vm0, %v219_v2, 0.0  ;;  %v253_v9 = vld [vmem:[%s204_s21 + $0x8] sm:$0xff]  ;;  %v252_v10 = vld [vmem:[%s204_s21] sm:$0xff] }
  0x12   : > { %222 = vadd.xlane.f32.xlu0 %v221_v3  ;;  %v266_v11 = vld [vmem:[%s210_s24] sm:$0xff]  ;;  %v267_v12 = vld [vmem:[%s210_s24 + $0x8] sm:$0xff] }
  0x13   : > { %v232_v6 = vsel %vm220_vm0, %v230_v4, 0.0  ;;  %v235_v8 = vsel %vm220_vm0, %v231_v5, 0.0 }
  0x14   : > { %233 = vadd.xlane.f32.xlu1 %v232_v6 }
  0x16   : > { %225 = vadd.xlane.f32.xlu0 %v224_v7 }
  0x18   : > { %236 = vadd.xlane.f32.xlu1 %v235_v8 }
  0x29   : > { %261 = vperm.xlu1 %393, %v253_v9  }
  0x2c   : > { %256 = vperm.xlu0 %392, %v252_v10  }
  0x2d   : > { %270 = vperm.xlu1 %393, %v266_v11  }
  0x31   : > { %275 = vperm.xlu1 %393, %v267_v12  }
  0x9f   : > { %v223_v13 = vpop.xlane.xlu0 %222 }
  0xa0   : > { %v228_v14 = vmul.f32 0.015625, %v223_v13 }
  0xa1   : > { %v234_v15 = vpop.xlane.xlu1 %233 }
  0xa2   : > { %v240_v16 = vmul.f32 %v228_v14, %v228_v14  ;;  %v238_v17 = vmul.f32 0.015625, %v234_v15  ;;  %v248_v28 = vsub.f32 %v218_v1, %v228_v14 }
  0xa3   : > { %v226_v18 = vpop.xlane.xlu0 %225 }
  0xa4   : > { %v242_v19 = vsub.f32 %v238_v17, %v240_v16  ;;  %v229_v20 = vmul.f32 0.015625, %v226_v18 }
  0xa5   : > { %v237_v21 = vpop.xlane.xlu1 %236 }
  0xa6   : > { %v244_v22 = vadd.f32 1e-05, %v242_v19  ;;  %v241_v23 = vmul.f32 %v229_v20, %v229_v20  ;;  %v239_v24 = vmul.f32 0.015625, %v237_v21  ;;  %v249_v33 = vsub.f32 %v219_v2, %v229_v20 }
  0xa8   : > { %394 = vrsqrt.f32 %v244_v22  ;;  %v243_v25 = vsub.f32 %v239_v24, %v241_v23 }
  0xa9   : > { %v262_v27 = vpop.permute.xlu1 %261 }
  0xaa   : > { %v245_v26 = vadd.f32 1e-05, %v243_v25 }
  0xab   : > { %v257_v30 = vpop.permute.xlu0 %256 }
  0xac   : > { %396 = vrsqrt.f32 %v245_v26 }
  0xad   : > { %v271_v32 = vpop.permute.xlu1 %270 }
  0xb1   : > { %v276_v40 = vpop.permute.xlu1 %275 }
  0xb2   : > { %v395_v29 = vpop.eup %394 }
  0xb3   : > { %v250_v31 = vmul.f32 %v395_v29, %v248_v28 }
  0xb5   : > { %v264_v34 = vmul.f32 %v257_v30, %v250_v31 }
  0xb6   : > { %v397_v35 = vpop.eup %396 }
  0xb7   : > { %v251_v36 = vmul.f32 %v397_v35, %v249_v33  ;;  %v278_v37 = vadd.f32 %v271_v32, %v264_v34 }
  0xb9   : > { %v265_v38 = vmul.f32 %v262_v27, %v251_v36  ;;  %vm280_vm1 = vcmp.ge.f32.partialorder %v278_v37, 0.0  ;;  %v282_v39 = vmul.f32 0.01, %v278_v37 }
  0xbb   : > { %v279_v41 = vadd.f32 %v276_v40, %v265_v38  ;;  %v284_v42 = vsel %vm280_vm1, %v278_v37, %v282_v39 }
  0xbc   : > { %286 = vst.msk [vmem:[%s216_s27] sm:$0xff] %vm220_vm0, %v284_v42 }
  0xbd   : > { %vm281_vm2 = vcmp.ge.f32.partialorder %v279_v41, 0.0  ;;  %v283_v43 = vmul.f32 0.01, %v279_v41 }
  0xbf   : > { %v285_v44 = vsel %vm281_vm2, %v279_v41, %v283_v43 }
  0xc0   : > { %287 = vst.msk [vmem:[%s216_s27 + $0x8] sm:$0xff] %vm220_vm0, %v285_v44 }
  0xc1 PF: > { %s13_s12 = sadd.s32 1, %s404_s12  }
  0xc2   : > { %p10_p4 = scmp.ge.s32.totalorder %s13_s12, 4  }
  0xc4   :  { %12 = sbr.rel (!%p10_p4) target bundleno = 1 (0x1), region = 68 }

// kernel: hourglass_forward.37
= control target key start
LH: loop header
LB: loop body
LE: loop exit
PB: predicated region body
PF: predicated region fallthrough
CT: control target
= control target key end

     0   :  { %s580_s12 = smov 0   ;;  %s582_s13 = smov 0   ;;  %s679_s0 = inlined_call_operand.vmem [shape: f32[2,144,64], index: 0, kind: input, shape index: {}]   ;;  %s680_s1 = inlined_call_operand.vmem [shape: f32[16,144], index: 1, kind: input, shape index: {}]   ;;  %s681_s2 = inlined_call_operand.vmem [shape: f32[16,1], index: 2, kind: input, shape index: {}]   ;;  %s682_s3 = inlined_call_operand.vmem [shape: f32[2,16,64], index: 3, kind: output, shape index: {}]  }
   0x1   :  { %s584_s14 = smov 0  }
   0x2 LB: > { %s25_s15 = sadd.s32 1, %s551_s13  ;;  %p450_p0 = scmp.ge.s32.totalorder %s555_s14, 1  ;;  %s555_s14 = sphi %s584_s14, %s13_s14   ;;  %s551_s13 = sphi %s582_s13, %s684_s13   ;;  %s547_s12 = sphi %s580_s12, %s683_s12  }
   0x3   : > { %p27_p1 = scmp.ge.s32.totalorder %s25_s15, 2  ;;  %p167_p2 = scmp.lt.s32.totalorder %s555_s14, 3 }
   0x5   : > { %s686_s15 = smov (%p27_p1, %s25_s15), 0  ;;  %p168_p3 = pnand %p450_p0, %p167_p2 }
   0x6   : > { %p201_p4 = scmp.lt.s32.totalorder (!%p168_p3), %s547_s12, 1  ;;  %v231_v0 = vld [vmem:[%s680_s1 + $0x8] sm:$0xff] (!%p168_p3)  ;;  %vm252_vm0 = vcmask (!%p168_p3), 130048   ;;  %v233_v1 = vld [vmem:[%s680_s1 + $0x18] sm:$0xff] (!%p168_p3)  ;;  %v557_v2 = vmov (!%p168_p3), 0.0|0.0   ;;  %v344_v3 = vld [vmem:[%s681_s2] sm:$0xff] (!%p168_p3) }
   0x7   : > { %171 = sbr.rel (%p168_p3) target bundleno = 281 (0x119), region = 32  ;;  %459 = vmatprep.subr.bf16.mxu0 (!%p168_p3), %v557_v2  ;;  %486 = vmatprep.subr.bf16.mxu1 (!%p168_p3), %v557_v2  ;;  %vm225_vm1 = vcmask (!%p168_p3), 523264   ;;  %v558_v4 = vmov (!%p168_p3), 0.0   ;;  %v559_v5 = vmov (!%p168_p3), 0   ;;  %v345_v6 = vld [vmem:[%s681_s2 + $0x8] sm:$0xff] (!%p168_p3)  ;;  %v230_v34 = vld [vmem:[%s680_s1] sm:$0xff] (!%p168_p3) }
   0x8   : > { %454 = vmatprep.mubr.msk.f32.mxu0 (!%p168_p3), %vm252_vm0, %v231_v0  ;;  %455 = vmatprep.mubr.msk.f32.mxu1 (!%p168_p3), %vm252_vm0, %v233_v1  ;;  %226 = vst.msk [vmem:[#allocation2] sm:$0xff] (!%p168_p3), %vm225_vm1, %v558_v4  ;;  %227 = vst.msk [vmem:[#allocation2 + $0x8] sm:$0xff] (!%p168_p3), %vm225_vm1, %v558_v4  ;;  %v232_v35 = vld [vmem:[%s680_s1 + $0x10] sm:$0xff] (!%p168_p3) }
   0x9   : > { %532 = vset.pattern.permute.xlu0 (!%p168_p3), %v559_v5 }
   0xa   : > { %348 = vperm.xlu0 (!%p168_p3), %532, %v344_v3  }
   0xe   : > { %s688_s12 = smov (!%p201_p4, %s547_s12), 1  ;;  %353 = vperm.xlu0 %532, %v345_v6  }
   0xf   : > { %s504_s22 = smul.u32 144, %s688_s12  ;;  %v228_v36 = vld [vmem:[#allocation2] sm:$0xff]  ;;  %v229_v37 = vld [vmem:[#allocation2 + $0x8] sm:$0xff]  ;;  %s458_s5 = sshll.u32 %s688_s12, 4 }
  0x10   : > { %s220_s8 = scalar_lea.vmem %s682_s3, %s458_s5 }
  0x11   : > { %s620_s27 = scalar_lea.vmem %s679_s0, %s504_s22 }
  0x12   : > { %v234_v7 = vld [vmem:[%s620_s27] sm:$0xff]  ;;  %v235_v8 = vld [vmem:[%s620_s27 + $0x8] sm:$0xff]  ;;  %v236_v9 = vld [vmem:[%s620_s27 + $0x10] sm:$0xff] }
  0x13   : > { %v460_v10 = vpack.c.bf16 %v235_v8, %v234_v7  ;;  %v237_v11 = vld [vmem:[%s620_s27 + $0x18] sm:$0xff]  ;;  %v238_v13 = vld [vmem:[%s620_s27 + $0x20] sm:$0xff]  ;;  %v239_v14 = vld [vmem:[%s620_s27 + $0x28] sm:$0xff] }
  0x14   : > { %v463_v12 = vpack.c.bf16 %v237_v11, %v236_v9  ;;  %v466_v15 = vpack.c.bf16 %v239_v14, %v238_v13  ;;  %v240_v16 = vld [vmem:[%s620_s27 + $0x30] sm:$0xff]  ;;  %v241_v17 = vld [vmem:[%s620_s27 + $0x38] sm:$0xff]  ;;  %v242_v19 = vld [vmem:[%s620_s27 + $0x40] sm:$0xff] }
  0x15   : > { %461 = vmatpush1.bf16.msra.mxu0 %v460_v10  ;;  %495 = vmatpush1.bf16.msra.mxu1 %v460_v10  ;;  %v469_v18 = vpack.c.bf16 %v241_v17, %v240_v16  ;;  %v243_v20 = vld [vmem:[%s620_s27 + $0x48] sm:$0xff]  ;;  %v244_v22 = vld [vmem:[%s620_s27 + $0x50] sm:$0xff]  ;;  %v245_v23 = vld [vmem:[%s620_s27 + $0x58] sm:$0xff] }
  0x16   : > { %462 = vmatprep.subr.bf16.mxu0 %v557_v2  ;;  %487 = vmatprep.subr.bf16.mxu1 %v557_v2  ;;  %v472_v21 = vpack.c.bf16 %v243_v20, %v242_v19  ;;  %v475_v24 = vpack.c.bf16 %v245_v23, %v244_v22  ;;  %v246_v25 = vld [vmem:[%s620_s27 + $0x60] sm:$0xff]  ;;  %v247_v26 = vld [vmem:[%s620_s27 + $0x68] sm:$0xff]  ;;  %v248_v28 = vld [vmem:[%s620_s27 + $0x70] sm:$0xff] }
  0x17   : > { %v478_v27 = vpack.c.bf16 %v247_v26, %v246_v25  ;;  %v249_v29 = vld [vmem:[%s620_s27 + $0x78] sm:$0xff]  ;;  %v250_v31 = vld [vmem:[%s620_s27 + $0x80] sm:$0xff]  ;;  %v251_v32 = vld [vmem:[%s620_s27 + $0x88] sm:$0xff] }
  0x18   : > { %v481_v30 = vpack.c.bf16 %v249_v29, %v248_v28  ;;  %v484_v33 = vpack.c.bf16 %v251_v32, %v250_v31 }
  0x19   : > { %464 = vmatpush1.bf16.msra.mxu0 %v463_v12  ;;  %496 = vmatpush1.bf16.msra.mxu1 %v463_v12 }
  0x1a   : > { %465 = vmatprep.subr.bf16.mxu0 %v557_v2  ;;  %488 = vmatprep.subr.bf16.mxu1 %v557_v2 }
  0x1d   : > { %467 = vmatpush1.bf16.msra.mxu0 %v466_v15  ;;  %497 = vmatpush1.bf16.msra.mxu1 %v466_v15 }
  0x1e   : > { %468 = vmatprep.subr.bf16.mxu0 %v557_v2  ;;  %489 = vmatprep.subr.bf16.mxu1 %v557_v2 }
  0x21   : > { %470 = vmatpush1.bf16.msra.mxu0 %v469_v18  ;;  %498 = vmatpush1.bf16.msra.mxu1 %v469_v18 }
  0x22   : > { %471 = vmatprep.subr.bf16.mxu0 %v557_v2  ;;  %490 = vmatprep.subr.bf16.mxu1 %v557_v2 }
  0x25   : > { %473 = vmatpush1.bf16.msra.mxu0 %v472_v21  ;;  %499 = vmatpush1.bf16.msra.mxu1 %v472_v21 }
  0x26   : > { %474 = vmatprep.subr.bf16.mxu0 %v557_v2  ;;  %491 = vmatprep.subr.bf16.mxu1 %v557_v2 }
  0x29   : > { %476 = vmatpush1.bf16.msra.mxu0 %v475_v24  ;;  %500 = vmatpush1.bf16.msra.mxu1 %v475_v24 }
  0x2a   : > { %477 = vmatprep.subr.bf16.mxu0 %v557_v2  ;;  %492 = vmatprep.subr.bf16.mxu1 %v557_v2 }
  0x2d   : > { %479 = vmatpush1.bf16.msra.mxu0 %v478_v27  ;;  %501 = vmatpush1.bf16.msra.mxu1 %v478_v27 }
  0x2e   : > { %480 = vmatprep.subr.bf16.mxu0 %v557_v2  ;;  %493 = vmatprep.subr.bf16.mxu1 %v557_v2 }
  0x31   : > { %482 = vmatpush1.bf16.msra.mxu0 %v481_v30  ;;  %502 = vmatpush1.bf16.msra.mxu1 %v481_v30 }
  0x32   : > { %483 = vmatprep.subr.bf16.mxu0 %v557_v2  ;;  %494 = vmatprep.subr.bf16.mxu1 %v557_v2 }
  0x35   : > { %485 = vmatpush1.bf16.msra.mxu0 %v484_v33  ;;  %503 = vmatpush1.bf16.msra.mxu1 %v484_v33 }
  0x38   : > { %324 = vmatmul.mubr.f32.vlgmr.msra.gmra.mrb[0].mxu0 %v230_v34  ;;  %329 = vmatmul.mubr.f32.vlgmr.msra.gmra.mrb[0].mxu1 %v232_v35 }
  0x89   : > { %v349_v44 = vpop.permute.xlu0 %348 }
  0x8d   : > { %v354_v46 = vpop.permute.xlu0 %353 }
 0x10b   : > { %v325_v38 = vpop.f32.mrb[0].mxu0  ;;  %v330_v39 = vpop.f32.mrb[0].mxu1 }
 0x10c   : > { %v334_v40 = vadd.f32 %v325_v38, %v228_v36  ;;  %v335_v41 = vadd.f32 %v330_v39, %v229_v37  ;;  %v327_v42 = vpop.f32.mrb[1].mxu0  ;;  %v332_v43 = vpop.f32.mrb[1].mxu1 }
 0x10e   : > { %337 = vst.msk [vmem:[#allocation2] sm:$0xff] %vm225_vm1, %v334_v40  ;;  %338 = vst.msk [vmem:[#allocation2 + $0x8] sm:$0xff] %vm225_vm1, %v335_v41 }
 0x115   : > { %v342_v45 = vld [vmem:[#allocation2] sm:$0xff]  ;;  %v343_v47 = vld [vmem:[#allocation2 + $0x8] sm:$0xff] }
 0x116   : > { %v356_v48 = vadd.f32 %v349_v44, %v342_v45  ;;  %v357_v49 = vadd.f32 %v354_v46, %v343_v47 }
 0x118   : > { %358 = vst.msk [vmem:[%s220_s8] sm:$0xff] %vm225_vm1, %v356_v48  ;;  %359 = vst.msk [vmem:[%s220_s8 + $0x8] sm:$0xff] %vm225_vm1, %v357_v49 }
 0x119 PF: > { %s13_s14 = sadd.s32 1, %s555_s14   ;;  %s683_s12 = smov %s551_s13 }
 0x11a   : > { %p10_p5 = scmp.ge.s32.totalorder %s13_s14, 4   ;;  %s684_s13 = smov %s686_s15 }
 0x11c   :  { %12 = sbr.rel (!%p10_p5) target bundleno = 2 (0x2), region = 73 }

// kernel: hourglass_forward.40
= control target key start
LH: loop header
LB: loop body
LE: loop exit
PB: predicated region body
PF: predicated region fallthrough
CT: control target
= control target key end

     0   :  { %s672_s12 = smov 0   ;;  %s674_s13 = smov 0   ;;  %s791_s0 = inlined_call_operand.vmem [shape: f32[2,256,16], index: 0, kind: input, shape index: {}]   ;;  %s792_s1 = inlined_call_operand.vmem [shape: f32[32,256], index: 1, kind: input, shape index: {}]   ;;  %s793_s2 = inlined_call_operand.vmem [shape: f32[32,1], index: 2, kind: input, shape index: {}]   ;;  %s794_s3 = inlined_call_operand.vmem [shape: f32[2,32,16], index: 3, kind: output, shape index: {}]  }
   0x1   :  { %s676_s14 = smov 0  }
   0x2 LB: > { %s25_s15 = sadd.s32 1, %s644_s13  ;;  %p497_p0 = scmp.ge.s32.totalorder %s648_s14, 1  ;;  %s648_s14 = sphi %s676_s14, %s13_s14   ;;  %s644_s13 = sphi %s674_s13, %s796_s13   ;;  %s640_s12 = sphi %s672_s12, %s795_s12  }
   0x3   : > { %p27_p1 = scmp.ge.s32.totalorder %s25_s15, 2  ;;  %p167_p2 = scmp.lt.s32.totalorder %s648_s14, 3 }
   0x5   : > { %s798_s15 = smov (%p27_p1, %s25_s15), 0  ;;  %p168_p3 = pnand %p497_p0, %p167_p2 }
   0x6   : > { %p201_p4 = scmp.lt.s32.totalorder (!%p168_p3), %s640_s12, 1  ;;  %v235_v0 = vld [vmem:[%s792_s1 + $0x8] sm:$0xff] (!%p168_p3)  ;;  %v650_v2 = vmov (!%p168_p3), 0   ;;  %v377_v3 = vld [vmem:[%s793_s2 + $0x10] sm:$0xff] (!%p168_p3)  ;;  %v375_v4 = vld [vmem:[%s793_s2] sm:$0xff] (!%p168_p3)  ;;  %vm225_vm0 = vcmask (!%p168_p3), 130048  }
   0x7   : > { %171 = sbr.rel (%p168_p3) target bundleno = 284 (0x11c), region = 32  ;;  %v239_v1 = vld [vmem:[%s792_s1 + $0x28] sm:$0xff] (!%p168_p3)  ;;  %338 = vmatprep.mubr.f32.mxu0 (!%p168_p3), %v235_v0  ;;  %625 = vset.pattern.permute.xlu1 (!%p168_p3), %v650_v2  ;;  %v378_v5 = vld [vmem:[%s793_s2 + $0x18] sm:$0xff] (!%p168_p3)  ;;  %v234_v55 = vld [vmem:[%s792_s1] sm:$0xff] (!%p168_p3)  ;;  %v651_v61 = vmov (!%p168_p3), 0.0  }
   0x8   : > { %348 = vmatprep.mubr.f32.mxu1 (!%p168_p3), %v239_v1  ;;  %624 = vset.pattern.permute.xlu0 (!%p168_p3), %v650_v2  ;;  %v376_v6 = vld [vmem:[%s793_s2 + $0x8] sm:$0xff] (!%p168_p3)  ;;  %v238_v56 = vld [vmem:[%s792_s1 + $0x20] sm:$0xff] (!%p168_p3)  ;;  %v237_v57 = vld [vmem:[%s792_s1 + $0x18] sm:$0xff] (!%p168_p3)  ;;  %226 = vst.msk [vmem:[#allocation2] sm:$0xff] (!%p168_p3), %vm225_vm0, %v651_v61 }
   0x9   : > { %391 = vperm.xlu1 (!%p168_p3), %625, %v377_v3   ;;  %381 = vperm.xlu0 (!%p168_p3), %624, %v375_v4   ;;  %v241_v58 = vld [vmem:[%s792_s1 + $0x38] sm:$0xff] (!%p168_p3)  ;;  %v236_v59 = vld [vmem:[%s792_s1 + $0x10] sm:$0xff] (!%p168_p3)  ;;  %227 = vst.msk [vmem:[#allocation2 + $0x8] sm:$0xff] (!%p168_p3), %vm225_vm0, %v651_v61  ;;  %228 = vst.msk [vmem:[#allocation2 + $0x10] sm:$0xff] (!%p168_p3), %vm225_vm0, %v651_v61 }
   0xa   : > { %v240_v60 = vld [vmem:[%s792_s1 + $0x30] sm:$0xff] (!%p168_p3)  ;;  %229 = vst.msk [vmem:[#allocation2 + $0x18] sm:$0xff] (!%p168_p3), %vm225_vm0, %v651_v61 }
   0xd   : > { %396 = vperm.xlu1 (!%p168_p3), %625, %v378_v5   ;;  %386 = vperm.xlu0 (!%p168_p3), %624, %v376_v6  }
   0xe   : > { %s800_s12 = smov (!%p201_p4, %s640_s12), 1 }
   0xf   : > { %s504_s24 = sshll.u32 %s800_s12, 8  ;;  %v230_v0 = vld [vmem:[#allocation2] sm:$0xff]  ;;  %s505_s21 = sshll.u32 %s800_s12, 5 }
  0x10   : > { %s711_s29 = scalar_lea.vmem %s791_s0, %s504_s24  ;;  %v232_v2 = vld [vmem:[#allocation2 + $0x10] sm:$0xff]  ;;  %s220_s24 = scalar_lea.vmem %s794_s3, %s505_s21 }
  0x11   : > { %v258_v7 = vld [vmem:[%s711_s29 + $0x80] sm:$0xff]  ;;  %v259_v8 = vld [vmem:[%s711_s29 + $0x88] sm:$0xff]  ;;  %v260_v12 = vld [vmem:[%s711_s29 + $0x90] sm:$0xff] }
  0x12   : > { %v242_v9 = vld [vmem:[%s711_s29] sm:$0xff]  ;;  %v550_v10 = vpack.c.bf16 %v259_v8, %v258_v7  ;;  %v243_v11 = vld [vmem:[%s711_s29 + $0x8] sm:$0xff]  ;;  %v261_v13 = vld [vmem:[%s711_s29 + $0x98] sm:$0xff] }
  0x13   : > { %v552_v14 = vpack.c.bf16 %v243_v11, %v242_v9  ;;  %v554_v15 = vpack.c.bf16 %v261_v13, %v260_v12  ;;  %v244_v16 = vld [vmem:[%s711_s29 + $0x10] sm:$0xff]  ;;  %v245_v17 = vld [vmem:[%s711_s29 + $0x18] sm:$0xff]  ;;  %v262_v18 = vld [vmem:[%s711_s29 + $0xa0] sm:$0xff] }
  0x14   : > { %551 = vmatprep.subr.bf16.mxu0 %v550_v10  ;;  %582 = vmatprep.subr.bf16.mxu1 %v550_v10  ;;  %v263_v19 = vld [vmem:[%s711_s29 + $0xa8] sm:$0xff]  ;;  %v556_v20 = vpack.c.bf16 %v245_v17, %v244_v16  ;;  %v246_v22 = vld [vmem:[%s711_s29 + $0x20] sm:$0xff]  ;;  %v264_v24 = vld [vmem:[%s711_s29 + $0xb0] sm:$0xff] }
  0x15   : > { %553 = vmatpush3.bf16.msra.mxu0 %v552_v14  ;;  %590 = vmatpush3.bf16.msra.mxu1 %v552_v14  ;;  %v558_v21 = vpack.c.bf16 %v263_v19, %v262_v18  ;;  %v247_v23 = vld [vmem:[%s711_s29 + $0x28] sm:$0xff]  ;;  %v265_v25 = vld [vmem:[%s711_s29 + $0xb8] sm:$0xff]  ;;  %v248_v28 = vld [vmem:[%s711_s29 + $0x30] sm:$0xff] }
  0x16   : > { %555 = vmatprep.subr.bf16.mxu0 %v554_v15  ;;  %583 = vmatprep.subr.bf16.mxu1 %v554_v15  ;;  %v560_v26 = vpack.c.bf16 %v247_v23, %v246_v22  ;;  %v562_v27 = vpack.c.bf16 %v265_v25, %v264_v24  ;;  %v249_v29 = vld [vmem:[%s711_s29 + $0x38] sm:$0xff]  ;;  %v266_v30 = vld [vmem:[%s711_s29 + $0xc0] sm:$0xff]  ;;  %v267_v31 = vld [vmem:[%s711_s29 + $0xc8] sm:$0xff] }
  0x17   : > { %v564_v32 = vpack.c.bf16 %v249_v29, %v248_v28  ;;  %v566_v33 = vpack.c.bf16 %v267_v31, %v266_v30  ;;  %v250_v34 = vld [vmem:[%s711_s29 + $0x40] sm:$0xff]  ;;  %v251_v35 = vld [vmem:[%s711_s29 + $0x48] sm:$0xff]  ;;  %v268_v36 = vld [vmem:[%s711_s29 + $0xd0] sm:$0xff] }
  0x18   : > { %v269_v37 = vld [vmem:[%s711_s29 + $0xd8] sm:$0xff]  ;;  %v568_v38 = vpack.c.bf16 %v251_v35, %v250_v34  ;;  %v252_v40 = vld [vmem:[%s711_s29 + $0x50] sm:$0xff]  ;;  %v270_v42 = vld [vmem:[%s711_s29 + $0xe0] sm:$0xff] }
  0x19   : > { %557 = vmatpush3.bf16.msra.mxu0 %v556_v20  ;;  %591 = vmatpush3.bf16.msra.mxu1 %v556_v20  ;;  %v570_v39 = vpack.c.bf16 %v269_v37, %v268_v36  ;;  %v253_v41 = vld [vmem:[%s711_s29 + $0x58] sm:$0xff]  ;;  %v271_v43 = vld [vmem:[%s711_s29 + $0xe8] sm:$0xff]  ;;  %v254_v46 = vld [vmem:[%s711_s29 + $0x60] sm:$0xff] }
  0x1a   : > { %559 = vmatprep.subr.bf16.mxu0 %v558_v21  ;;  %584 = vmatprep.subr.bf16.mxu1 %v558_v21  ;;  %v572_v44 = vpack.c.bf16 %v253_v41, %v252_v40  ;;  %v574_v45 = vpack.c.bf16 %v271_v43, %v270_v42  ;;  %v255_v47 = vld [vmem:[%s711_s29 + $0x68] sm:$0xff]  ;;  %v272_v48 = vld [vmem:[%s711_s29 + $0xf0] sm:$0xff]  ;;  %v273_v49 = vld [vmem:[%s711_s29 + $0xf8] sm:$0xff] }
  0x1b   : > { %v576_v50 = vpack.c.bf16 %v255_v47, %v254_v46  ;;  %v578_v51 = vpack.c.bf16 %v273_v49, %v272_v48  ;;  %v256_v52 = vld [vmem:[%s711_s29 + $0x70] sm:$0xff]  ;;  %v257_v53 = vld [vmem:[%s711_s29 + $0x78] sm:$0xff]  ;;  %v231_v10 = vld [vmem:[#allocation2 + $0x8] sm:$0xff] }
  0x1c   : > { %v580_v54 = vpack.c.bf16 %v257_v53, %v256_v52  ;;  %v233_v12 = vld [vmem:[#allocation2 + $0x18] sm:$0xff] }
  0x1d   : > { %561 = vmatpush3.bf16.msra.mxu0 %v560_v26  ;;  %592 = vmatpush3.bf16.msra.mxu1 %v560_v26 }
  0x1e   : > { %563 = vmatprep.subr.bf16.mxu0 %v562_v27  ;;  %585 = vmatprep.subr.bf16.mxu1 %v562_v27 }
  0x21   : > { %565 = vmatpush3.bf16.msra.mxu0 %v564_v32  ;;  %593 = vmatpush3.bf16.msra.mxu1 %v564_v32 }
  0x22   : > { %567 = vmatprep.subr.bf16.mxu0 %v566_v33  ;;  %586 = vmatprep.subr.bf16.mxu1 %v566_v33 }
  0x25   : > { %569 = vmatpush3.bf16.msra.mxu0 %v568_v38  ;;  %594 = vmatpush3.bf16.msra.mxu1 %v568_v38 }
  0x26   : > { %571 = vmatprep.subr.bf16.mxu0 %v570_v39  ;;  %587 = vmatprep.subr.bf16.mxu1 %v570_v39 }
  0x29   : > { %573 = vmatpush3.bf16.msra.mxu0 %v572_v44  ;;  %595 = vmatpush3.bf16.msra.mxu1 %v572_v44 }
  0x2a   : > { %575 = vmatprep.subr.bf16.mxu0 %v574_v45  ;;  %588 = vmatprep.subr.bf16.mxu1 %v574_v45 }
  0x2d   : > { %577 = vmatpush3.bf16.msra.mxu0 %v576_v50  ;;  %596 = vmatpush3.bf16.msra.mxu1 %v576_v50 }
  0x2e   : > { %579 = vmatprep.subr.bf16.mxu0 %v578_v51  ;;  %589 = vmatprep.subr.bf16.mxu1 %v578_v51 }
  0x31   : > { %581 = vmatpush3.bf16.msra.mxu0 %v580_v54  ;;  %597 = vmatpush3.bf16.msra.mxu1 %v580_v54 }
  0x34   : > { %339 = vmatmul.mubr.f32.vlgmr.msra.gmra.mrb[0].mxu0 %v234_v55  ;;  %349 = vmatmul.mubr.f32.vlgmr.msra.gmra.mrb[0].mxu1 %v238_v56 }
  0x35   : > { %343 = vmatprep.mubr.f32.mxu0 %v237_v57  ;;  %353 = vmatprep.mubr.f32.mxu1 %v241_v58 }
  0x38   : > { %344 = vmatmul.mubr.f32.gmra.mrb[2].mxu0 %v236_v59  ;;  %354 = vmatmul.mubr.f32.gmra.mrb[2].mxu1 %v240_v60 }
  0x88   : > { %v392_v18 = vpop.permute.xlu1 %391  ;;  %v382_v19 = vpop.permute.xlu0 %381 }
  0x8c   : > { %v397_v24 = vpop.permute.xlu1 %396  ;;  %v387_v26 = vpop.permute.xlu0 %386 }
 0x107   : > { %v538_v62 = vpop.f32.mrb[0].mxu0  ;;  %v544_v63 = vpop.f32.mrb[0].mxu1 }
 0x108   : > { %v539_v1 = vpop.f32.mrb[1].mxu0  ;;  %v545_v3 = vpop.f32.mrb[1].mxu1 }
 0x109   : > { %v540_v4 = vadd.f32 %v539_v1, %v538_v62  ;;  %v546_v5 = vadd.f32 %v545_v3, %v544_v63 }
 0x10b   : > { %v359_v6 = vadd.f32 %v540_v4, %v230_v0  ;;  %v361_v7 = vadd.f32 %v546_v5, %v232_v2  ;;  %v541_v8 = vpop.f32.mrb[2].mxu0  ;;  %v547_v9 = vpop.f32.mrb[2].mxu1 }
 0x10c   : > { %v542_v11 = vpop.f32.mrb[3].mxu0  ;;  %v548_v13 = vpop.f32.mrb[3].mxu1 }
 0x10d   : > { %364 = vst.msk [vmem:[#allocation2] sm:$0xff] %vm225_vm0, %v359_v6  ;;  %366 = vst.msk [vmem:[#allocation2 + $0x10] sm:$0xff] %vm225_vm0, %v361_v7  ;;  %v543_v14 = vadd.f32 %v542_v11, %v541_v8  ;;  %v549_v15 = vadd.f32 %v548_v13, %v547_v9 }
 0x10f   : > { %v360_v16 = vadd.f32 %v543_v14, %v231_v10  ;;  %v362_v17 = vadd.f32 %v549_v15, %v233_v12 }
 0x111   : > { %365 = vst.msk [vmem:[#allocation2 + $0x8] sm:$0xff] %vm225_vm0, %v360_v16  ;;  %367 = vst.msk [vmem:[#allocation2 + $0x18] sm:$0xff] %vm225_vm0, %v362_v17 }
 0x114   : > { %v373_v20 = vld [vmem:[#allocation2 + $0x10] sm:$0xff]  ;;  %v371_v21 = vld [vmem:[#allocation2] sm:$0xff] }
 0x115   : > { %v401_v22 = vadd.f32 %v392_v18, %v373_v20  ;;  %v399_v23 = vadd.f32 %v382_v19, %v371_v21 }
 0x117   : > { %405 = vst.msk [vmem:[%s220_s24 + $0x10] sm:$0xff] %vm225_vm0, %v401_v22  ;;  %403 = vst.msk [vmem:[%s220_s24] sm:$0xff] %vm225_vm0, %v399_v23 }
 0x118   : > { %v374_v25 = vld [vmem:[#allocation2 + $0x18] sm:$0xff]  ;;  %v372_v27 = vld [vmem:[#allocation2 + $0x8] sm:$0xff] }
 0x119   : > { %v402_v28 = vadd.f32 %v397_v24, %v374_v25  ;;  %v400_v29 = vadd.f32 %v387_v26, %v372_v27 }
 0x11b   : > { %406 = vst.msk [vmem:[%s220_s24 + $0x18] sm:$0xff] %vm225_vm0, %v402_v28  ;;  %404 = vst.msk [vmem:[%s220_s24 + $0x8] sm:$0xff] %vm225_vm0, %v400_v29 }
 0x11c PF: > { %s13_s14 = sadd.s32 1, %s648_s14   ;;  %s795_s12 = smov %s644_s13 }
 0x11d   : > { %p10_p5 = scmp.ge.s32.totalorder %s13_s14, 4   ;;  %s796_s13 = smov %s798_s15 }
 0x11f   :  { %12 = sbr.rel (!%p10_p5) target bundleno = 2 (0x2), region = 73 }

// kernel: hourglass_forward.41
= control target key start
LH: loop header
LB: loop body
LE: loop exit
PB: predicated region body
PF: predicated region fallthrough
CT: control target
= control target key end

     0   :  { %v299_v0 = vmov 0.0|0.0   ;;  %vm300_vm0 = vmmov 0   ;;  %v301_v3 = vmov 0.0   ;;  %vm30_vm1 = vcmask 130048   ;;  %s398_s1 = inlined_call_operand.vmem [shape: f32[16,128], index: 1, kind: input, shape index: {}]   ;;  %s399_s3 = inlined_call_operand.vmem [shape: f32[128,64], index: 3, kind: input, shape index: {}]   ;;  %s400_s0 = inlined_call_operand.vmem [shape: f32[2,16], index: 0, kind: input, shape index: {}]   ;;  %s401_s2 = inlined_call_operand.vmem [shape: f32[1,128], index: 2, kind: input, shape index: {}]   ;;  %s402_s4 = inlined_call_operand.vmem [shape: f32[1,64], index: 4, kind: input, shape index: {}]   ;;  %s403_s5 = inlined_call_operand.vmem [shape: f32[2,64], index: 5, kind: output, shape index: {}]  }
   0x1   :  { %269 = vmatprep.subr.bf16.mxu0 %v299_v0  ;;  %v21_v1 = vld [vmem:[%s398_s1] sm:$0xff]  ;;  %v22_v2 = vld [vmem:[%s398_s1 + $0x8] sm:$0xff]  ;;  %231 = vmatprep.mubr.msk.f32.mxu0 %vm300_vm0, %v301_v3  ;;  %v107_v7 = vld [vmem:[%s399_s3 + $0x10] sm:$0xff]  ;;  %vm198_vm2 = vcmask 517120  }
   0x2   :  { %v270_v4 = vpack.c.bf16 %v22_v2, %v21_v1  ;;  %272 = vmatprep.subr.bf16.mxu1 %v299_v0  ;;  %v105_v5 = vld [vmem:[%s399_s3] sm:$0xff]  ;;  %v106_v6 = vld [vmem:[%s399_s3 + $0x8] sm:$0xff]  ;;  %266 = vmatprep.mubr.msk.f32.mxu1 %vm300_vm0, %v301_v3  ;;  %v108_v9 = vld [vmem:[%s399_s3 + $0x18] sm:$0xff] }
   0x3   :  { %v273_v8 = vpack.c.bf16 %v106_v6, %v105_v5  ;;  %v20_v10 = vld [vmem:[%s400_s0] sm:$0x3]  ;;  %v276_v11 = vpack.c.bf16 %v108_v9, %v107_v7  ;;  %v110_v13 = vld [vmem:[%s399_s3 + $0x28] sm:$0xff]  ;;  %v111_v15 = vld [vmem:[%s399_s3 + $0x30] sm:$0xff] }
   0x4   :  { %271 = vmatpush3.bf16.msra.mxu0 %v270_v4  ;;  %v109_v12 = vld [vmem:[%s399_s3 + $0x20] sm:$0xff]  ;;  %v112_v16 = vld [vmem:[%s399_s3 + $0x38] sm:$0xff]  ;;  %v114_v19 = vld [vmem:[%s399_s3 + $0x48] sm:$0xff] }
   0x5   :  { %274 = vmatpush3.bf16.msra.mxu1 %v273_v8  ;;  %v279_v14 = vpack.c.bf16 %v110_v13, %v109_v12  ;;  %v282_v17 = vpack.c.bf16 %v112_v16, %v111_v15  ;;  %v113_v18 = vld [vmem:[%s399_s3 + $0x40] sm:$0xff]  ;;  %v115_v21 = vld [vmem:[%s399_s3 + $0x50] sm:$0xff]  ;;  %v116_v22 = vld [vmem:[%s399_s3 + $0x58] sm:$0xff] }
   0x6   :  { %275 = vmatprep.subr.bf16.mxu1 %v299_v0  ;;  %v285_v20 = vpack.c.bf16 %v114_v19, %v113_v18  ;;  %v288_v23 = vpack.c.bf16 %v116_v22, %v115_v21  ;;  %v117_v24 = vld [vmem:[%s399_s3 + $0x60] sm:$0xff]  ;;  %v118_v25 = vld [vmem:[%s399_s3 + $0x68] sm:$0xff]  ;;  %v119_v27 = vld [vmem:[%s399_s3 + $0x70] sm:$0xff] }
   0x7   :  { %232 = vmatmul.mubr.msk.f32.vlgmr.msra.gmra.mrb[0].mxu0 %vm30_vm1, %v20_v10  ;;  %v291_v26 = vpack.c.bf16 %v118_v25, %v117_v24  ;;  %v120_v28 = vld [vmem:[%s399_s3 + $0x78] sm:$0xff]  ;;  %v204_v30 = vld [vmem:[%s401_s2] ss:$0 sm:$0xff] }
   0x8   :  { %v294_v29 = vpack.c.bf16 %v120_v28, %v119_v27  ;;  %v206_v35 = vld [vmem:[%s402_s4] ss:$0 sm:$0xff] }
   0x9   :  { %277 = vmatpush3.bf16.msra.mxu1 %v276_v11 }
   0xa   :  { %278 = vmatprep.subr.bf16.mxu1 %v299_v0 }
   0xd   :  { %280 = vmatpush3.bf16.msra.mxu1 %v279_v14 }
   0xe   :  { %281 = vmatprep.subr.bf16.mxu1 %v299_v0 }
  0x11   :  { %283 = vmatpush3.bf16.msra.mxu1 %v282_v17 }
  0x12   :  { %284 = vmatprep.subr.bf16.mxu1 %v299_v0 }
  0x15   :  { %286 = vmatpush3.bf16.msra.mxu1 %v285_v20 }
  0x16   :  { %287 = vmatprep.subr.bf16.mxu1 %v299_v0 }
  0x19   :  { %289 = vmatpush3.bf16.msra.mxu1 %v288_v23 }
  0x1a   :  { %290 = vmatprep.subr.bf16.mxu1 %v299_v0 }
  0x1d   :  { %292 = vmatpush3.bf16.msra.mxu1 %v291_v26 }
  0x1e   :  { %293 = vmatprep.subr.bf16.mxu1 %v299_v0 }
  0x21   :  { %295 = vmatpush3.bf16.msra.mxu1 %v294_v29 }
  0xda   :  { %v100_v31 = vpop.f32.mrb[0].mxu0 }
  0xdb   :  { %v101_v32 = vadd.f32 %v204_v30, %v100_v31  ;;  %v233_v33 = vpop.f32.mrb[1].mxu0 }
  0xdd   :  { %v104_v34 = vmax.f32 %v101_v32, 0.0 }
  0xdf   :  { %267 = vmatmul.mubr.f32.vlgmr.msra.gmra.mrb[0].mxu1 %v104_v34 }
 0x1b2   :  { %v194_v36 = vpop.f32.mrb[0].mxu1 }
 0x1b3   :  { %v195_v37 = vadd.f32 %v206_v35, %v194_v36  ;;  %v268_v38 = vpop.f32.mrb[1].mxu1 }
 0x1b5   :  { %199 = vst.msk [vmem:[%s403_s5] sm:$0x3] %vm198_vm2, %v195_v37 }

// kernel: hourglass_forward.42
= control target key start
LH: loop header
LB: loop body
LE: loop exit
PB: predicated region body
PF: predicated region fallthrough
CT: control target
= control target key end

     0   :  { %s499_s12 = smov 0   ;;  %s570_s0 = inlined_call_operand.vmem [shape: f32[64,16], index: 0, kind: input, shape index: {}]   ;;  %s571_s1 = inlined_call_operand.vmem [shape: f32[64,1], index: 1, kind: input, shape index: {}]   ;;  %s572_s2 = inlined_call_operand.vmem [shape: f32[64,1], index: 2, kind: input, shape index: {}]   ;;  %s573_s3 = inlined_call_operand.vmem [shape: f32[64,16], index: 3, kind: output, shape index: {}]  }
   0x1 LB: > { %s436_s13 = sadd.s32 4294967295, %s476_s12   ;;  %p440_p0 = scmp.ge.s32.totalorder %s476_s12, 1  ;;  %s476_s12 = sphi %s499_s12, %s13_s12  }
   0x2   : > { %p160_p1 = scmp.lt.s32.totalorder %s476_s12, 3 }
   0x4   : > { %p161_p2 = pnand %p440_p0, %p160_p1 }
   0x5   : > { %s441_s14 = sshll.u32 (!%p161_p2), %s436_s13, 2  ;;  %v478_v0 = vmov (!%p161_p2), 0   ;;  %vm222_vm0 = vcmask (!%p161_p2), 130048  }
   0x6   : > { %164 = sbr.rel (%p161_p2) target bundleno = 206 (0xce), region = 32  ;;  %p195_p3 = scmp.lt.s32.totalorder (!%p161_p2), %s441_s14, 7  ;;  %461 = vset.pattern.permute.xlu1 (!%p161_p2), %v478_v0  ;;  %460 = vset.pattern.permute.xlu0 (!%p161_p2), %v478_v0 }
   0xd   : > { %s575_s14 = smov (!%p195_p3, %s441_s14), 7 }
   0xe   : > { %s507_s15 = sshll.u32 %s575_s14, 3 }
   0xf   : > { %s198_s18 = scalar_lea.vmem %s570_s0, %s507_s15  ;;  %s204_s21 = scalar_lea.vmem %s571_s1, %s507_s15 }
  0x10   : > { %v513_v1 = vld [vmem:[%s198_s18 + $0x10] sm:$0xff]  ;;  %v515_v2 = vld [vmem:[%s198_s18] sm:$0xff]  ;;  %v517_v3 = vld [vmem:[%s198_s18 + $0x8] sm:$0xff]  ;;  %s210_s24 = scalar_lea.vmem %s572_s2, %s507_s15  ;;  %s555_s27 = scalar_lea.vmem %s573_s3, %s507_s15 }
  0x11   : > { %v229_v4 = vsel %vm222_vm0, %v513_v1, 0.0  ;;  %v223_v5 = vsel %vm222_vm0, %v515_v2, 0.0  ;;  %v240_v6 = vmul.f32 %v515_v2, %v515_v2  ;;  %v226_v8 = vsel %vm222_vm0, %v517_v3, 0.0  ;;  %v530_v10 = vld [vmem:[%s198_s18 + $0x18] sm:$0xff]  ;;  %v285_v17 = vld [vmem:[%s204_s21 + $0x8] sm:$0xff]  ;;  %v286_v18 = vld [vmem:[%s204_s21 + $0x10] sm:$0xff] }
  0x12   : > { %230 = vadd.xlane.f32.xlu1 %v229_v4  ;;  %224 = vadd.xlane.f32.xlu0 %v223_v5  ;;  %v241_v9 = vmul.f32 %v517_v3, %v517_v3  ;;  %v232_v12 = vsel %vm222_vm0, %v530_v10, 0.0  ;;  %v243_v13 = vmul.f32 %v530_v10, %v530_v10  ;;  %v242_v14 = vmul.f32 %v513_v1, %v513_v1  ;;  %v284_v19 = vld [vmem:[%s204_s21] sm:$0xff]  ;;  %v287_v21 = vld [vmem:[%s204_s21 + $0x18] sm:$0xff]  ;;  %v313_v22 = vld [vmem:[%s210_s24 + $0x8] sm:$0xff] }
  0x13   : > { %v244_v7 = vsel %vm222_vm0, %v240_v6, 0.0  ;;  %v312_v20 = vld [vmem:[%s210_s24] sm:$0xff]  ;;  %v314_v23 = vld [vmem:[%s210_s24 + $0x10] sm:$0xff]  ;;  %v315_v24 = vld [vmem:[%s210_s24 + $0x18] sm:$0xff] }
  0x14   : > { %v247_v11 = vsel %vm222_vm0, %v241_v9, 0.0  ;;  %v253_v15 = vsel %vm222_vm0, %v243_v13, 0.0  ;;  %v250_v16 = vsel %vm222_vm0, %v242_v14, 0.0 }
  0x16   : > { %245 = vadd.xlane.f32.xlu1 %v244_v7  ;;  %227 = vadd.xlane.f32.xlu0 %v226_v8 }
  0x1a   : > { %248 = vadd.xlane.f32.xlu1 %v247_v11  ;;  %233 = vadd.xlane.f32.xlu0 %v232_v12 }
  0x1e   : > { %254 = vadd.xlane.f32.xlu1 %v253_v15  ;;  %251 = vadd.xlane.f32.xlu0 %v250_v16 }
  0x2f   : > { %295 = vperm.xlu1 %461, %v285_v17  }
  0x33   : > { %300 = vperm.xlu1 %461, %v286_v18  }
  0x34   : > { %290 = vperm.xlu0 %460, %v284_v19  }
  0x37   : > { %318 = vperm.xlu1 %461, %v312_v20  }
  0x3b   : > { %305 = vperm.xlu1 %461, %v287_v21  }
  0x3f   : > { %323 = vperm.xlu1 %461, %v313_v22  }
  0x43   : > { %328 = vperm.xlu1 %461, %v314_v23  }
  0x47   : > { %333 = vperm.xlu1 %461, %v315_v24  }
  0x9f   : > { %v231_v25 = vpop.xlane.xlu1 %230  ;;  %v225_v26 = vpop.xlane.xlu0 %224 }
  0xa0   : > { %v236_v27 = vmul.f32 0.0625, %v225_v26  ;;  %v238_v37 = vmul.f32 0.0625, %v231_v25 }
  0xa2   : > { %v260_v28 = vmul.f32 %v236_v27, %v236_v27  ;;  %v262_v45 = vmul.f32 %v238_v37, %v238_v37  ;;  %v276_v54 = vsub.f32 %v515_v2, %v236_v27  ;;  %v278_v5 = vsub.f32 %v513_v1, %v238_v37 }
  0xa3   : > { %v246_v29 = vpop.xlane.xlu1 %245  ;;  %v228_v30 = vpop.xlane.xlu0 %227 }
  0xa4   : > { %v256_v31 = vmul.f32 0.0625, %v246_v29  ;;  %v237_v32 = vmul.f32 0.0625, %v228_v30 }
  0xa6   : > { %v264_v33 = vsub.f32 %v256_v31, %v260_v28  ;;  %v261_v34 = vmul.f32 %v237_v32, %v237_v32  ;;  %v277_v62 = vsub.f32 %v517_v3, %v237_v32 }
  0xa7   : > { %v249_v35 = vpop.xlane.xlu1 %248  ;;  %v234_v36 = vpop.xlane.xlu0 %233 }
  0xa8   : > { %v268_v38 = vadd.f32 1e-05, %v264_v33  ;;  %v257_v39 = vmul.f32 0.0625, %v249_v35  ;;  %v239_v40 = vmul.f32 0.0625, %v234_v36 }
  0xaa   : > { %462 = vrsqrt.f32 %v268_v38  ;;  %v265_v41 = vsub.f32 %v257_v39, %v261_v34  ;;  %v263_v42 = vmul.f32 %v239_v40, %v239_v40  ;;  %v279_v12 = vsub.f32 %v530_v10, %v239_v40 }
  0xab   : > { %v255_v43 = vpop.xlane.xlu1 %254  ;;  %v252_v44 = vpop.xlane.xlu0 %251 }
  0xac   : > { %v269_v46 = vadd.f32 1e-05, %v265_v41  ;;  %v259_v47 = vmul.f32 0.0625, %v255_v43  ;;  %v258_v48 = vmul.f32 0.0625, %v252_v44 }
  0xae   : > { %464 = vrsqrt.f32 %v269_v46  ;;  %v267_v49 = vsub.f32 %v259_v47, %v263_v42  ;;  %v266_v50 = vsub.f32 %v258_v48, %v262_v45 }
  0xaf   : > { %v296_v51 = vpop.permute.xlu1 %295 }
  0xb0   : > { %v270_v52 = vadd.f32 1e-05, %v266_v50  ;;  %v271_v53 = vadd.f32 1e-05, %v267_v49 }
  0xb2   : > { %466 = vrsqrt.f32 %v270_v52 }
  0xb3   : > { %v301_v55 = vpop.permute.xlu1 %300  ;;  %v291_v57 = vpop.permute.xlu0 %290  ;;  %468 = vrsqrt.f32 %v271_v53 }
  0xb4   : > { %v463_v56 = vpop.eup %462 }
  0xb5   : > { %v280_v58 = vmul.f32 %v463_v56, %v276_v54 }
  0xb7   : > { %v308_v59 = vmul.f32 %v291_v57, %v280_v58  ;;  %v319_v60 = vpop.permute.xlu1 %318 }
  0xb8   : > { %v465_v61 = vpop.eup %464 }
  0xb9   : > { %v336_v63 = vadd.f32 %v319_v60, %v308_v59  ;;  %v281_v0 = vmul.f32 %v465_v61, %v277_v62 }
  0xbb   : > { %vm340_vm1 = vcmp.ge.f32.partialorder %v336_v63, 0.0  ;;  %v344_v2 = vmul.f32 0.01, %v336_v63  ;;  %v306_v4 = vpop.permute.xlu1 %305  ;;  %v309_v8 = vmul.f32 %v296_v51, %v281_v0 }
  0xbc   : > { %v467_v6 = vpop.eup %466 }
  0xbd   : > { %v348_v7 = vsel %vm340_vm1, %v336_v63, %v344_v2  ;;  %v282_v9 = vmul.f32 %v467_v6, %v278_v5  ;;  %v469_v3 = vpop.eup %468 }
  0xbe   : > { %352 = vst.msk [vmem:[%s555_s27] sm:$0xff] %vm222_vm0, %v348_v7  ;;  %v283_v15 = vmul.f32 %v469_v3, %v279_v12 }
  0xbf   : > { %v324_v11 = vpop.permute.xlu1 %323  ;;  %v310_v14 = vmul.f32 %v301_v55, %v282_v9 }
  0xc0   : > { %v337_v13 = vadd.f32 %v324_v11, %v309_v8  ;;  %v311_v19 = vmul.f32 %v306_v4, %v283_v15 }
  0xc2   : > { %vm341_vm2 = vcmp.ge.f32.partialorder %v337_v13, 0.0  ;;  %v345_v16 = vmul.f32 0.01, %v337_v13 }
  0xc3   : > { %v329_v17 = vpop.permute.xlu1 %328 }
  0xc4   : > { %v349_v1 = vsel %vm341_vm2, %v337_v13, %v345_v16  ;;  %v338_v18 = vadd.f32 %v329_v17, %v310_v14 }
  0xc5   : > { %353 = vst.msk [vmem:[%s555_s27 + $0x8] sm:$0xff] %vm222_vm0, %v349_v1 }
  0xc6   : > { %vm342_vm3 = vcmp.ge.f32.partialorder %v338_v18, 0.0  ;;  %v346_v20 = vmul.f32 0.01, %v338_v18 }
  0xc7   : > { %v334_v21 = vpop.permute.xlu1 %333 }
  0xc8   : > { %v350_v22 = vsel %vm342_vm3, %v338_v18, %v346_v20  ;;  %v339_v23 = vadd.f32 %v334_v21, %v311_v19 }
  0xc9   : > { %354 = vst.msk [vmem:[%s555_s27 + $0x10] sm:$0xff] %vm222_vm0, %v350_v22 }
  0xca   : > { %vm343_vm4 = vcmp.ge.f32.partialorder %v339_v23, 0.0  ;;  %v347_v10 = vmul.f32 0.01, %v339_v23 }
  0xcc   : > { %v351_v24 = vsel %vm343_vm4, %v339_v23, %v347_v10 }
  0xcd   : > { %355 = vst.msk [vmem:[%s555_s27 + $0x18] sm:$0xff] %vm222_vm0, %v351_v24 }
  0xce PF: > { %s13_s12 = sadd.s32 1, %s476_s12  }
  0xcf   : > { %p10_p4 = scmp.ge.s32.totalorder %s13_s12, 4  }
  0xd1   :  { %12 = sbr.rel (!%p10_p4) target bundleno = 1 (0x1), region = 68 }

// kernel: hourglass_forward.43
= control target key start
LH: loop header
LB: loop body
LE: loop exit
PB: predicated region body
PF: predicated region fallthrough
CT: control target
= control target key end

     0   :  { %s795_s12 = smov 0   ;;  %s797_s13 = smov 0   ;;  %s934_s0 = inlined_call_operand.vmem [shape: f32[2,288,16], index: 0, kind: input, shape index: {}]   ;;  %s935_s1 = inlined_call_operand.vmem [shape: f32[32,288], index: 1, kind: input, shape index: {}]   ;;  %s936_s2 = inlined_call_operand.vmem [shape: f32[32,1], index: 2, kind: input, shape index: {}]   ;;  %s937_s3 = inlined_call_operand.vmem [shape: f32[2,32,16], index: 3, kind: output, shape index: {}]  }
   0x1   :  { %s799_s14 = smov 0  }
   0x2 LB: > { %s25_s15 = sadd.s32 1, %s767_s13  ;;  %p603_p0 = scmp.ge.s32.totalorder %s771_s14, 1  ;;  %s771_s14 = sphi %s799_s14, %s13_s14   ;;  %s767_s13 = sphi %s797_s13, %s939_s13   ;;  %s763_s12 = sphi %s795_s12, %s938_s12  }
   0x3   : > { %p27_p1 = scmp.ge.s32.totalorder %s25_s15, 2  ;;  %p167_p2 = scmp.lt.s32.totalorder %s771_s14, 3 }
   0x5   : > { %s941_s15 = smov (%p27_p1, %s25_s15), 0  ;;  %p168_p3 = pnand %p603_p0, %p167_p2 }
   0x6   : > { %p201_p4 = scmp.lt.s32.totalorder (!%p168_p3), %s763_s12, 1  ;;  %v235_v0 = vld [vmem:[%s935_s1 + $0x8] sm:$0xff] (!%p168_p3)  ;;  %v236_v1 = vld [vmem:[%s935_s1 + $0x10] sm:$0xff] (!%p168_p3)  ;;  %vm282_vm0 = vcmask (!%p168_p3), 261120   ;;  %v773_v2 = vmov (!%p168_p3), 0   ;;  %v481_v3 = vld [vmem:[%s936_s2] sm:$0xff] (!%p168_p3) }
   0x7   : > { %171 = sbr.rel (%p168_p3) target bundleno = 295 (0x127), region = 32  ;;  %359 = vmatprep.mubr.f32.mxu0 (!%p168_p3), %v235_v0  ;;  %674 = vmatprep.mubr.msk.f32.mxu1 (!%p168_p3), %vm282_vm0, %v236_v1  ;;  %v483_v4 = vld [vmem:[%s936_s2 + $0x10] sm:$0xff] (!%p168_p3)  ;;  %v482_v5 = vld [vmem:[%s936_s2 + $0x8] sm:$0xff] (!%p168_p3)  ;;  %v484_v6 = vld [vmem:[%s936_s2 + $0x18] sm:$0xff] (!%p168_p3)  ;;  %vm225_vm1 = vcmask (!%p168_p3), 130048  }
   0x8   : > { %747 = vset.pattern.permute.xlu0 (!%p168_p3), %v773_v2  ;;  %748 = vset.pattern.permute.xlu1 (!%p168_p3), %v773_v2  ;;  %v239_v48 = vld [vmem:[%s935_s1 + $0x28] sm:$0xff] (!%p168_p3)  ;;  %v242_v51 = vld [vmem:[%s935_s1 + $0x40] sm:$0xff] (!%p168_p3)  ;;  %v245_v56 = vld [vmem:[%s935_s1 + $0x58] sm:$0xff] (!%p168_p3) }
   0x9   : > { %487 = vperm.xlu0 (!%p168_p3), %747, %v481_v3   ;;  %497 = vperm.xlu1 (!%p168_p3), %748, %v483_v4   ;;  %v234_v0 = vld [vmem:[%s935_s1] sm:$0xff] (!%p168_p3)  ;;  %v237_v2 = vld [vmem:[%s935_s1 + $0x18] sm:$0xff] (!%p168_p3)  ;;  %v240_v4 = vld [vmem:[%s935_s1 + $0x30] sm:$0xff] (!%p168_p3) }
   0xa   : > { %v238_v1 = vld [vmem:[%s935_s1 + $0x20] sm:$0xff] (!%p168_p3)  ;;  %v241_v3 = vld [vmem:[%s935_s1 + $0x38] sm:$0xff] (!%p168_p3) }
   0xd   : > { %492 = vperm.xlu0 (!%p168_p3), %747, %v482_v5   ;;  %502 = vperm.xlu1 (!%p168_p3), %748, %v484_v6   ;;  %v244_v5 = vld [vmem:[%s935_s1 + $0x50] sm:$0xff] (!%p168_p3)  ;;  %v243_v6 = vld [vmem:[%s935_s1 + $0x48] sm:$0xff] (!%p168_p3) }
   0xe   : > { %s943_s12 = smov (!%p201_p4, %s763_s12), 1 }
   0xf   : > { %s720_s20 = smul.u32 288, %s943_s12  ;;  %s613_s29 = sshll.u32 %s943_s12, 5 }
  0x10   : > { %s220_s5 = scalar_lea.vmem %s937_s3, %s613_s29 }
  0x11   : > { %s832_s27 = scalar_lea.vmem %s934_s0, %s720_s20 }
  0x12   : > { %v262_v7 = vld [vmem:[%s832_s27 + $0x80] sm:$0xff]  ;;  %v263_v8 = vld [vmem:[%s832_s27 + $0x88] sm:$0xff]  ;;  %v264_v12 = vld [vmem:[%s832_s27 + $0x90] sm:$0xff] }
  0x13   : > { %v246_v9 = vld [vmem:[%s832_s27] sm:$0xff]  ;;  %v680_v10 = vpack.c.bf16 %v263_v8, %v262_v7  ;;  %v247_v11 = vld [vmem:[%s832_s27 + $0x8] sm:$0xff]  ;;  %v265_v13 = vld [vmem:[%s832_s27 + $0x98] sm:$0xff]  ;;  %v774_v7 = vmov 0.0  }
  0x14   : > { %v682_v14 = vpack.c.bf16 %v247_v11, %v246_v9  ;;  %v684_v15 = vpack.c.bf16 %v265_v13, %v264_v12  ;;  %v248_v16 = vld [vmem:[%s832_s27 + $0x10] sm:$0xff]  ;;  %v249_v17 = vld [vmem:[%s832_s27 + $0x18] sm:$0xff]  ;;  %v266_v18 = vld [vmem:[%s832_s27 + $0xa0] sm:$0xff]  ;;  %226 = vst.msk [vmem:[#allocation2] sm:$0xff] %vm225_vm1, %v774_v7 }
  0x15   : > { %681 = vmatprep.subr.bf16.mxu0 %v680_v10  ;;  %v267_v19 = vld [vmem:[%s832_s27 + $0xa8] sm:$0xff]  ;;  %v686_v20 = vpack.c.bf16 %v249_v17, %v248_v16  ;;  %v250_v22 = vld [vmem:[%s832_s27 + $0x20] sm:$0xff]  ;;  %v268_v24 = vld [vmem:[%s832_s27 + $0xb0] sm:$0xff]  ;;  %227 = vst.msk [vmem:[#allocation2 + $0x8] sm:$0xff] %vm225_vm1, %v774_v7 }
  0x16   : > { %683 = vmatpush3.bf16.msra.mxu0 %v682_v14  ;;  %v688_v21 = vpack.c.bf16 %v267_v19, %v266_v18  ;;  %v251_v23 = vld [vmem:[%s832_s27 + $0x28] sm:$0xff]  ;;  %v269_v25 = vld [vmem:[%s832_s27 + $0xb8] sm:$0xff]  ;;  %v252_v27 = vld [vmem:[%s832_s27 + $0x30] sm:$0xff]  ;;  %228 = vst.msk [vmem:[#allocation2 + $0x10] sm:$0xff] %vm225_vm1, %v774_v7 }
  0x17   : > { %685 = vmatprep.subr.bf16.mxu0 %v684_v15  ;;  %v690_v26 = vpack.c.bf16 %v251_v23, %v250_v22  ;;  %v692_v28 = vpack.c.bf16 %v269_v25, %v268_v24  ;;  %v253_v29 = vld [vmem:[%s832_s27 + $0x38] sm:$0xff]  ;;  %v278_v30 = vld [vmem:[%s832_s27 + $0x100] sm:$0xff]  ;;  %v279_v31 = vld [vmem:[%s832_s27 + $0x108] sm:$0xff]  ;;  %229 = vst.msk [vmem:[#allocation2 + $0x18] sm:$0xff] %vm225_vm1, %v774_v7 }
  0x18   : > { %v270_v32 = vld [vmem:[%s832_s27 + $0xc0] sm:$0xff]  ;;  %v271_v33 = vld [vmem:[%s832_s27 + $0xc8] sm:$0xff]  ;;  %v712_v34 = vpack.c.bf16 %v279_v31, %v278_v30  ;;  %v280_v35 = vld [vmem:[%s832_s27 + $0x110] sm:$0xff]  ;;  %v694_v37 = vpack.c.bf16 %v253_v29, %v252_v27 }
  0x19   : > { %v281_v36 = vld [vmem:[%s832_s27 + $0x118] sm:$0xff]  ;;  %v696_v39 = vpack.c.bf16 %v271_v33, %v270_v32  ;;  %v254_v40 = vld [vmem:[%s832_s27 + $0x40] sm:$0xff]  ;;  %v255_v41 = vld [vmem:[%s832_s27 + $0x48] sm:$0xff] }
  0x1a   : > { %687 = vmatpush3.bf16.msra.mxu0 %v686_v20  ;;  %713 = vmatprep.subr.bf16.mxu1 %v712_v34  ;;  %v716_v38 = vpack.c.bf16 %v281_v36, %v280_v35  ;;  %v272_v42 = vld [vmem:[%s832_s27 + $0xd0] sm:$0xff]  ;;  %v273_v43 = vld [vmem:[%s832_s27 + $0xd8] sm:$0xff]  ;;  %v698_v44 = vpack.c.bf16 %v255_v41, %v254_v40  ;;  %v274_v49 = vld [vmem:[%s832_s27 + $0xe0] sm:$0xff] }
  0x1b   : > { %689 = vmatprep.subr.bf16.mxu0 %v688_v21  ;;  %715 = vmatpush3.bf16.msra.mxu1 %v712_v34  ;;  %v700_v45 = vpack.c.bf16 %v273_v43, %v272_v42  ;;  %v256_v46 = vld [vmem:[%s832_s27 + $0x50] sm:$0xff]  ;;  %v257_v47 = vld [vmem:[%s832_s27 + $0x58] sm:$0xff]  ;;  %v275_v50 = vld [vmem:[%s832_s27 + $0xe8] sm:$0xff] }
  0x1c   : > { %717 = vmatprep.subr.bf16.mxu1 %v716_v38  ;;  %v702_v52 = vpack.c.bf16 %v257_v47, %v256_v46  ;;  %v704_v53 = vpack.c.bf16 %v275_v50, %v274_v49  ;;  %v258_v54 = vld [vmem:[%s832_s27 + $0x60] sm:$0xff]  ;;  %v259_v55 = vld [vmem:[%s832_s27 + $0x68] sm:$0xff]  ;;  %v276_v57 = vld [vmem:[%s832_s27 + $0xf0] sm:$0xff] }
  0x1d   : > { %v277_v58 = vld [vmem:[%s832_s27 + $0xf8] sm:$0xff]  ;;  %v706_v59 = vpack.c.bf16 %v259_v55, %v258_v54  ;;  %v260_v61 = vld [vmem:[%s832_s27 + $0x70] sm:$0xff]  ;;  %v230_v15 = vld [vmem:[#allocation2] sm:$0xff] }
  0x1e   : > { %691 = vmatpush3.bf16.msra.mxu0 %v690_v26  ;;  %v708_v60 = vpack.c.bf16 %v277_v58, %v276_v57  ;;  %v261_v62 = vld [vmem:[%s832_s27 + $0x78] sm:$0xff]  ;;  %v231_v21 = vld [vmem:[#allocation2 + $0x8] sm:$0xff]  ;;  %v232_v27 = vld [vmem:[#allocation2 + $0x10] sm:$0xff] }
  0x1f   : > { %693 = vmatprep.subr.bf16.mxu0 %v692_v28  ;;  %719 = vmatpush3.bf16.msra.mxu1 %v716_v38  ;;  %v710_v63 = vpack.c.bf16 %v261_v62, %v260_v61  ;;  %v233_v34 = vld [vmem:[#allocation2 + $0x18] sm:$0xff] }
  0x22   : > { %695 = vmatpush3.bf16.msra.mxu0 %v694_v37  ;;  %675 = vmatmul.mubr.msk.f32.vlgmr.msra.gmra.mrb[0].mxu1 %vm282_vm0, %v239_v48 }
  0x23   : > { %697 = vmatprep.subr.bf16.mxu0 %v696_v39  ;;  %677 = vmatprep.mubr.msk.f32.mxu1 %vm282_vm0, %v242_v51 }
  0x26   : > { %699 = vmatpush3.bf16.msra.mxu0 %v698_v44  ;;  %678 = vmatmul.mubr.msk.f32.gmra.mrb[2].mxu1 %vm282_vm0, %v245_v56 }
  0x27   : > { %701 = vmatprep.subr.bf16.mxu0 %v700_v45 }
  0x2a   : > { %703 = vmatpush3.bf16.msra.mxu0 %v702_v52 }
  0x2b   : > { %705 = vmatprep.subr.bf16.mxu0 %v704_v53 }
  0x2e   : > { %707 = vmatpush3.bf16.msra.mxu0 %v706_v59 }
  0x2f   : > { %709 = vmatprep.subr.bf16.mxu0 %v708_v60 }
  0x32   : > { %711 = vmatpush3.bf16.msra.mxu0 %v710_v63 }
  0x35   : > { %360 = vmatmul.mubr.f32.vlgmr.msra.gmra.mrb[0].mxu0 %v234_v0 }
  0x36   : > { %364 = vmatprep.mubr.f32.mxu0 %v238_v1 }
  0x39   : > { %365 = vmatmul.mubr.f32.gmra.mrb[2].mxu0 %v237_v2 }
  0x3a   : > { %369 = vmatprep.mubr.f32.mxu0 %v241_v3 }
  0x3d   : > { %370 = vmatmul.mubr.f32.gmra.mrb[4].mxu0 %v240_v4 }
  0x3e   : > { %374 = vmatprep.mubr.f32.mxu0 %v244_v5 }
  0x41   : > { %375 = vmatmul.mubr.f32.gmra.mrb[6].mxu0 %v243_v6 }
  0x88   : > { %v488_v28 = vpop.permute.xlu0 %487  ;;  %v498_v42 = vpop.permute.xlu1 %497 }
  0x8c   : > { %v493_v38 = vpop.permute.xlu0 %492  ;;  %v503_v45 = vpop.permute.xlu1 %502 }
  0xf5   : > { %v676_v8 = vpop.f32.mrb[0].mxu1 }
  0xf6   : > { %v446_v9 = vpop.f32.mrb[1].mxu1 }
  0xf9   : > { %v679_v10 = vpop.f32.mrb[2].mxu1 }
  0xfa   : > { %v456_v11 = vpop.f32.mrb[3].mxu1 }
 0x108   : > { %v646_v12 = vpop.f32.mrb[0].mxu0 }
 0x109   : > { %v647_v13 = vpop.f32.mrb[1].mxu0 }
 0x10a   : > { %v648_v14 = vadd.f32 %v647_v13, %v646_v12 }
 0x10c   : > { %v447_v16 = vadd.f32 %v648_v14, %v446_v9  ;;  %v649_v17 = vpop.f32.mrb[2].mxu0 }
 0x10d   : > { %v650_v18 = vpop.f32.mrb[3].mxu0 }
 0x10e   : > { %v465_v19 = vadd.f32 %v447_v16, %v230_v15  ;;  %v651_v20 = vadd.f32 %v650_v18, %v649_v17 }
 0x110   : > { %470 = vst.msk [vmem:[#allocation2] sm:$0xff] %vm225_vm1, %v465_v19  ;;  %v452_v22 = vadd.f32 %v676_v8, %v651_v20  ;;  %v652_v23 = vpop.f32.mrb[4].mxu0 }
 0x111   : > { %v653_v24 = vpop.f32.mrb[5].mxu0 }
 0x112   : > { %v466_v25 = vadd.f32 %v452_v22, %v231_v21  ;;  %v654_v26 = vadd.f32 %v653_v24, %v652_v23 }
 0x114   : > { %471 = vst.msk [vmem:[#allocation2 + $0x8] sm:$0xff] %vm225_vm1, %v466_v25  ;;  %v457_v29 = vadd.f32 %v654_v26, %v456_v11  ;;  %v655_v30 = vpop.f32.mrb[6].mxu0 }
 0x115   : > { %v656_v31 = vpop.f32.mrb[7].mxu0 }
 0x116   : > { %v467_v32 = vadd.f32 %v457_v29, %v232_v27  ;;  %v657_v33 = vadd.f32 %v656_v31, %v655_v30 }
 0x117   : > { %v477_v35 = vld [vmem:[#allocation2] sm:$0xff] }
 0x118   : > { %472 = vst.msk [vmem:[#allocation2 + $0x10] sm:$0xff] %vm225_vm1, %v467_v32  ;;  %v462_v36 = vadd.f32 %v679_v10, %v657_v33  ;;  %v505_v37 = vadd.f32 %v488_v28, %v477_v35 }
 0x11a   : > { %v468_v39 = vadd.f32 %v462_v36, %v233_v34  ;;  %509 = vst.msk [vmem:[%s220_s5] sm:$0xff] %vm225_vm1, %v505_v37 }
 0x11b   : > { %v478_v40 = vld [vmem:[#allocation2 + $0x8] sm:$0xff] }
 0x11c   : > { %473 = vst.msk [vmem:[#allocation2 + $0x18] sm:$0xff] %vm225_vm1, %v468_v39  ;;  %v506_v41 = vadd.f32 %v493_v38, %v478_v40 }
 0x11e   : > { %510 = vst.msk [vmem:[%s220_s5 + $0x8] sm:$0xff] %vm225_vm1, %v506_v41 }
 0x11f   : > { %v479_v43 = vld [vmem:[#allocation2 + $0x10] sm:$0xff] }
 0x120   : > { %v507_v44 = vadd.f32 %v498_v42, %v479_v43 }
 0x122   : > { %511 = vst.msk [vmem:[%s220_s5 + $0x10] sm:$0xff] %vm225_vm1, %v507_v44 }
 0x123   : > { %v480_v46 = vld [vmem:[#allocation2 + $0x18] sm:$0xff] }
 0x124   : > { %v508_v47 = vadd.f32 %v503_v45, %v480_v46 }
 0x126   : > { %512 = vst.msk [vmem:[%s220_s5 + $0x18] sm:$0xff] %vm225_vm1, %v508_v47 }
 0x127 PF: > { %s13_s14 = sadd.s32 1, %s771_s14   ;;  %s938_s12 = smov %s767_s13 }
 0x128   : > { %p10_p5 = scmp.ge.s32.totalorder %s13_s14, 4   ;;  %s939_s13 = smov %s941_s15 }
 0x12a   :  { %12 = sbr.rel (!%p10_p5) target bundleno = 2 (0x2), region = 73 }

// kernel: hourglass_forward.46
= control target key start
LH: loop header
LB: loop body
LE: loop exit
PB: predicated region body
PF: predicated region fallthrough
CT: control target
= control target key end

     0   :  { %s723_s12 = smov 0   ;;  %s725_s13 = smov 0   ;;  %s830_s0 = inlined_call_operand.vmem [shape: f32[2,288,64], index: 0, kind: input, shape index: {}]   ;;  %s831_s1 = inlined_call_operand.vmem [shape: f32[16,288], index: 1, kind: input, shape index: {}]   ;;  %s832_s2 = inlined_call_operand.vmem [shape: f32[16,1], index: 2, kind: input, shape index: {}]   ;;  %s833_s3 = inlined_call_operand.vmem [shape: f32[2,16,64], index: 3, kind: output, shape index: {}]  }
   0x1   :  { %s727_s14 = smov 0  }
   0x2 LB: > { %s25_s15 = sadd.s32 1, %s695_s13  ;;  %p545_p0 = scmp.ge.s32.totalorder %s699_s14, 1  ;;  %s699_s14 = sphi %s727_s14, %s13_s14   ;;  %s695_s13 = sphi %s725_s13, %s835_s13   ;;  %s691_s12 = sphi %s723_s12, %s834_s12  }
   0x3   : > { %p27_p1 = scmp.ge.s32.totalorder %s25_s15, 2  ;;  %p167_p2 = scmp.lt.s32.totalorder %s699_s14, 3 }
   0x5   : > { %s837_s15 = smov (%p27_p1, %s25_s15), 0  ;;  %p168_p3 = pnand %p545_p0, %p167_p2 }
   0x6   : > { %p201_p4 = scmp.lt.s32.totalorder (!%p168_p3), %s691_s12, 1  ;;  %v231_v0 = vld [vmem:[%s831_s1 + $0x8] sm:$0xff] (!%p168_p3)  ;;  %v232_v1 = vld [vmem:[%s831_s1 + $0x10] sm:$0xff] (!%p168_p3)  ;;  %vm272_vm0 = vcmask (!%p168_p3), 261120   ;;  %v701_v2 = vmov (!%p168_p3), 0   ;;  %v439_v3 = vld [vmem:[%s832_s2] sm:$0xff] (!%p168_p3) }
   0x7   : > { %171 = sbr.rel (%p168_p3) target bundleno = 287 (0x11f), region = 32  ;;  %343 = vmatprep.mubr.f32.mxu0 (!%p168_p3), %v231_v0  ;;  %606 = vmatprep.mubr.msk.f32.mxu1 (!%p168_p3), %vm272_vm0, %v232_v1  ;;  %v440_v4 = vld [vmem:[%s832_s2 + $0x8] sm:$0xff] (!%p168_p3)  ;;  %v230_v60 = vld [vmem:[%s831_s1] sm:$0xff] (!%p168_p3)  ;;  %v233_v62 = vld [vmem:[%s831_s1 + $0x18] sm:$0xff] (!%p168_p3)  ;;  %vm225_vm1 = vcmask (!%p168_p3), 523264   ;;  %v702_v63 = vmov (!%p168_p3), 0.0  }
   0x8   : > { %676 = vset.pattern.permute.xlu0 (!%p168_p3), %v701_v2  ;;  %v235_v46 = vld [vmem:[%s831_s1 + $0x28] sm:$0xff] (!%p168_p3)  ;;  %v234_v61 = vld [vmem:[%s831_s1 + $0x20] sm:$0xff] (!%p168_p3)  ;;  %226 = vst.msk [vmem:[#allocation2] sm:$0xff] (!%p168_p3), %vm225_vm1, %v702_v63  ;;  %227 = vst.msk [vmem:[#allocation2 + $0x8] sm:$0xff] (!%p168_p3), %vm225_vm1, %v702_v63 }
   0x9   : > { %443 = vperm.xlu0 (!%p168_p3), %676, %v439_v3  }
   0xd   : > { %448 = vperm.xlu0 (!%p168_p3), %676, %v440_v4  }
   0xe   : > { %s839_s12 = smov (!%p201_p4, %s691_s12), 1 }
   0xf   : > { %s649_s22 = smul.u32 288, %s839_s12  ;;  %s553_s9 = sshll.u32 %s839_s12, 4 }
  0x10   : > { %s220_s16 = scalar_lea.vmem %s833_s3, %s553_s9 }
  0x11   : > { %s760_s27 = scalar_lea.vmem %s830_s0, %s649_s22 }
  0x12   : > { %v252_v5 = vld [vmem:[%s760_s27 + $0x80] sm:$0xff]  ;;  %v253_v6 = vld [vmem:[%s760_s27 + $0x88] sm:$0xff]  ;;  %v254_v10 = vld [vmem:[%s760_s27 + $0x90] sm:$0xff] }
  0x13   : > { %v236_v7 = vld [vmem:[%s760_s27] sm:$0xff]  ;;  %v609_v8 = vpack.c.bf16 %v253_v6, %v252_v5  ;;  %v237_v9 = vld [vmem:[%s760_s27 + $0x8] sm:$0xff]  ;;  %v255_v11 = vld [vmem:[%s760_s27 + $0x98] sm:$0xff] }
  0x14   : > { %v611_v12 = vpack.c.bf16 %v237_v9, %v236_v7  ;;  %v613_v13 = vpack.c.bf16 %v255_v11, %v254_v10  ;;  %v238_v14 = vld [vmem:[%s760_s27 + $0x10] sm:$0xff]  ;;  %v239_v15 = vld [vmem:[%s760_s27 + $0x18] sm:$0xff]  ;;  %v256_v16 = vld [vmem:[%s760_s27 + $0xa0] sm:$0xff] }
  0x15   : > { %610 = vmatprep.subr.bf16.mxu0 %v609_v8  ;;  %v257_v17 = vld [vmem:[%s760_s27 + $0xa8] sm:$0xff]  ;;  %v615_v18 = vpack.c.bf16 %v239_v15, %v238_v14  ;;  %v240_v20 = vld [vmem:[%s760_s27 + $0x20] sm:$0xff]  ;;  %v258_v22 = vld [vmem:[%s760_s27 + $0xb0] sm:$0xff] }
  0x16   : > { %612 = vmatpush3.bf16.msra.mxu0 %v611_v12  ;;  %v617_v19 = vpack.c.bf16 %v257_v17, %v256_v16  ;;  %v241_v21 = vld [vmem:[%s760_s27 + $0x28] sm:$0xff]  ;;  %v259_v23 = vld [vmem:[%s760_s27 + $0xb8] sm:$0xff]  ;;  %v242_v25 = vld [vmem:[%s760_s27 + $0x30] sm:$0xff] }
  0x17   : > { %614 = vmatprep.subr.bf16.mxu0 %v613_v13  ;;  %v619_v24 = vpack.c.bf16 %v241_v21, %v240_v20  ;;  %v621_v26 = vpack.c.bf16 %v259_v23, %v258_v22  ;;  %v243_v27 = vld [vmem:[%s760_s27 + $0x38] sm:$0xff]  ;;  %v268_v28 = vld [vmem:[%s760_s27 + $0x100] sm:$0xff]  ;;  %v269_v29 = vld [vmem:[%s760_s27 + $0x108] sm:$0xff] }
  0x18   : > { %v260_v30 = vld [vmem:[%s760_s27 + $0xc0] sm:$0xff]  ;;  %v261_v31 = vld [vmem:[%s760_s27 + $0xc8] sm:$0xff]  ;;  %v641_v32 = vpack.c.bf16 %v269_v29, %v268_v28  ;;  %v270_v33 = vld [vmem:[%s760_s27 + $0x110] sm:$0xff]  ;;  %v623_v35 = vpack.c.bf16 %v243_v27, %v242_v25 }
  0x19   : > { %v271_v34 = vld [vmem:[%s760_s27 + $0x118] sm:$0xff]  ;;  %v625_v37 = vpack.c.bf16 %v261_v31, %v260_v30  ;;  %v244_v38 = vld [vmem:[%s760_s27 + $0x40] sm:$0xff]  ;;  %v245_v39 = vld [vmem:[%s760_s27 + $0x48] sm:$0xff] }
  0x1a   : > { %616 = vmatpush3.bf16.msra.mxu0 %v615_v18  ;;  %642 = vmatprep.subr.bf16.mxu1 %v641_v32  ;;  %v645_v36 = vpack.c.bf16 %v271_v34, %v270_v33  ;;  %v262_v40 = vld [vmem:[%s760_s27 + $0xd0] sm:$0xff]  ;;  %v263_v41 = vld [vmem:[%s760_s27 + $0xd8] sm:$0xff]  ;;  %v627_v42 = vpack.c.bf16 %v245_v39, %v244_v38  ;;  %v264_v47 = vld [vmem:[%s760_s27 + $0xe0] sm:$0xff] }
  0x1b   : > { %618 = vmatprep.subr.bf16.mxu0 %v617_v19  ;;  %644 = vmatpush3.bf16.msra.mxu1 %v641_v32  ;;  %v629_v43 = vpack.c.bf16 %v263_v41, %v262_v40  ;;  %v246_v44 = vld [vmem:[%s760_s27 + $0x50] sm:$0xff]  ;;  %v247_v45 = vld [vmem:[%s760_s27 + $0x58] sm:$0xff]  ;;  %v265_v48 = vld [vmem:[%s760_s27 + $0xe8] sm:$0xff] }
  0x1c   : > { %646 = vmatprep.subr.bf16.mxu1 %v645_v36  ;;  %v631_v49 = vpack.c.bf16 %v247_v45, %v246_v44  ;;  %v633_v50 = vpack.c.bf16 %v265_v48, %v264_v47  ;;  %v248_v51 = vld [vmem:[%s760_s27 + $0x60] sm:$0xff]  ;;  %v249_v52 = vld [vmem:[%s760_s27 + $0x68] sm:$0xff]  ;;  %v266_v53 = vld [vmem:[%s760_s27 + $0xf0] sm:$0xff] }
  0x1d   : > { %v267_v54 = vld [vmem:[%s760_s27 + $0xf8] sm:$0xff]  ;;  %v635_v55 = vpack.c.bf16 %v249_v52, %v248_v51  ;;  %v250_v57 = vld [vmem:[%s760_s27 + $0x70] sm:$0xff]  ;;  %v228_v5 = vld [vmem:[#allocation2] sm:$0xff] }
  0x1e   : > { %620 = vmatpush3.bf16.msra.mxu0 %v619_v24  ;;  %v637_v56 = vpack.c.bf16 %v267_v54, %v266_v53  ;;  %v251_v58 = vld [vmem:[%s760_s27 + $0x78] sm:$0xff]  ;;  %v229_v11 = vld [vmem:[#allocation2 + $0x8] sm:$0xff] }
  0x1f   : > { %622 = vmatprep.subr.bf16.mxu0 %v621_v26  ;;  %648 = vmatpush3.bf16.msra.mxu1 %v645_v36  ;;  %v639_v59 = vpack.c.bf16 %v251_v58, %v250_v57 }
  0x22   : > { %624 = vmatpush3.bf16.msra.mxu0 %v623_v35  ;;  %607 = vmatmul.mubr.msk.f32.vlgmr.msra.gmra.mrb[0].mxu1 %vm272_vm0, %v235_v46 }
  0x23   : > { %626 = vmatprep.subr.bf16.mxu0 %v625_v37 }
  0x26   : > { %628 = vmatpush3.bf16.msra.mxu0 %v627_v42 }
  0x27   : > { %630 = vmatprep.subr.bf16.mxu0 %v629_v43 }
  0x2a   : > { %632 = vmatpush3.bf16.msra.mxu0 %v631_v49 }
  0x2b   : > { %634 = vmatprep.subr.bf16.mxu0 %v633_v50 }
  0x2e   : > { %636 = vmatpush3.bf16.msra.mxu0 %v635_v55 }
  0x2f   : > { %638 = vmatprep.subr.bf16.mxu0 %v637_v56 }
  0x32   : > { %640 = vmatpush3.bf16.msra.mxu0 %v639_v59 }
  0x35   : > { %344 = vmatmul.mubr.f32.vlgmr.msra.gmra.mrb[0].mxu0 %v230_v60 }
  0x36   : > { %348 = vmatprep.mubr.f32.mxu0 %v234_v61 }
  0x39   : > { %349 = vmatmul.mubr.f32.gmra.mrb[2].mxu0 %v233_v62 }
  0x88   : > { %v444_v14 = vpop.permute.xlu0 %443 }
  0x8c   : > { %v449_v17 = vpop.permute.xlu0 %448 }
  0xf5   : > { %v608_v0 = vpop.f32.mrb[0].mxu1 }
  0xf6   : > { %v420_v1 = vpop.f32.mrb[1].mxu1 }
 0x108   : > { %v586_v2 = vpop.f32.mrb[0].mxu0 }
 0x109   : > { %v587_v3 = vpop.f32.mrb[1].mxu0 }
 0x10a   : > { %v588_v4 = vadd.f32 %v587_v3, %v586_v2 }
 0x10c   : > { %v421_v6 = vadd.f32 %v588_v4, %v420_v1  ;;  %v589_v7 = vpop.f32.mrb[2].mxu0 }
 0x10d   : > { %v590_v8 = vpop.f32.mrb[3].mxu0 }
 0x10e   : > { %v429_v9 = vadd.f32 %v421_v6, %v228_v5  ;;  %v591_v10 = vadd.f32 %v590_v8, %v589_v7 }
 0x110   : > { %432 = vst.msk [vmem:[#allocation2] sm:$0xff] %vm225_vm1, %v429_v9  ;;  %v426_v12 = vadd.f32 %v608_v0, %v591_v10 }
 0x112   : > { %v430_v13 = vadd.f32 %v426_v12, %v229_v11 }
 0x114   : > { %433 = vst.msk [vmem:[#allocation2 + $0x8] sm:$0xff] %vm225_vm1, %v430_v13 }
 0x117   : > { %v437_v15 = vld [vmem:[#allocation2] sm:$0xff] }
 0x118   : > { %v451_v16 = vadd.f32 %v444_v14, %v437_v15 }
 0x11a   : > { %453 = vst.msk [vmem:[%s220_s16] sm:$0xff] %vm225_vm1, %v451_v16 }
 0x11b   : > { %v438_v18 = vld [vmem:[#allocation2 + $0x8] sm:$0xff] }
 0x11c   : > { %v452_v19 = vadd.f32 %v449_v17, %v438_v18 }
 0x11e   : > { %454 = vst.msk [vmem:[%s220_s16 + $0x8] sm:$0xff] %vm225_vm1, %v452_v19 }
 0x11f PF: > { %s13_s14 = sadd.s32 1, %s699_s14   ;;  %s834_s12 = smov %s695_s13 }
 0x120   : > { %p10_p5 = scmp.ge.s32.totalorder %s13_s14, 4   ;;  %s835_s13 = smov %s837_s15 }
 0x122   :  { %12 = sbr.rel (!%p10_p5) target bundleno = 2 (0x2), region = 73 }

// kernel: hourglass_forward.49
= control target key start
LH: loop header
LB: loop body
LE: loop exit
PB: predicated region body
PF: predicated region fallthrough
CT: control target
= control target key end

     0   :  { %s723_s12 = smov 0   ;;  %s725_s13 = smov 0   ;;  %s830_s0 = inlined_call_operand.vmem [shape: f32[2,288,16], index: 0, kind: input, shape index: {}]   ;;  %s831_s1 = inlined_call_operand.vmem [shape: f32[16,288], index: 1, kind: input, shape index: {}]   ;;  %s832_s2 = inlined_call_operand.vmem [shape: f32[16,1], index: 2, kind: input, shape index: {}]   ;;  %s833_s3 = inlined_call_operand.vmem [shape: f32[2,16,16], index: 3, kind: output, shape index: {}]  }
   0x1   :  { %s727_s14 = smov 0  }
   0x2 LB: > { %s25_s15 = sadd.s32 1, %s695_s13  ;;  %p545_p0 = scmp.ge.s32.totalorder %s699_s14, 1  ;;  %s699_s14 = sphi %s727_s14, %s13_s14   ;;  %s695_s13 = sphi %s725_s13, %s835_s13   ;;  %s691_s12 = sphi %s723_s12, %s834_s12  }
   0x3   : > { %p27_p1 = scmp.ge.s32.totalorder %s25_s15, 2  ;;  %p167_p2 = scmp.lt.s32.totalorder %s699_s14, 3 }
   0x5   : > { %s837_s15 = smov (%p27_p1, %s25_s15), 0  ;;  %p168_p3 = pnand %p545_p0, %p167_p2 }
   0x6   : > { %p201_p4 = scmp.lt.s32.totalorder (!%p168_p3), %s691_s12, 1  ;;  %v231_v0 = vld [vmem:[%s831_s1 + $0x8] sm:$0xff] (!%p168_p3)  ;;  %v232_v1 = vld [vmem:[%s831_s1 + $0x10] sm:$0xff] (!%p168_p3)  ;;  %vm272_vm0 = vcmask (!%p168_p3), 261120   ;;  %v701_v2 = vmov (!%p168_p3), 0   ;;  %v439_v3 = vld [vmem:[%s832_s2] sm:$0xff] (!%p168_p3) }
   0x7   : > { %171 = sbr.rel (%p168_p3) target bundleno = 287 (0x11f), region = 32  ;;  %343 = vmatprep.mubr.f32.mxu0 (!%p168_p3), %v231_v0  ;;  %606 = vmatprep.mubr.msk.f32.mxu1 (!%p168_p3), %vm272_vm0, %v232_v1  ;;  %v440_v4 = vld [vmem:[%s832_s2 + $0x8] sm:$0xff] (!%p168_p3)  ;;  %v230_v60 = vld [vmem:[%s831_s1] sm:$0xff] (!%p168_p3)  ;;  %v233_v62 = vld [vmem:[%s831_s1 + $0x18] sm:$0xff] (!%p168_p3)  ;;  %vm225_vm1 = vcmask (!%p168_p3), 130048   ;;  %v702_v63 = vmov (!%p168_p3), 0.0  }
   0x8   : > { %676 = vset.pattern.permute.xlu0 (!%p168_p3), %v701_v2  ;;  %v235_v46 = vld [vmem:[%s831_s1 + $0x28] sm:$0xff] (!%p168_p3)  ;;  %v234_v61 = vld [vmem:[%s831_s1 + $0x20] sm:$0xff] (!%p168_p3)  ;;  %226 = vst.msk [vmem:[#allocation2] sm:$0xff] (!%p168_p3), %vm225_vm1, %v702_v63  ;;  %227 = vst.msk [vmem:[#allocation2 + $0x8] sm:$0xff] (!%p168_p3), %vm225_vm1, %v702_v63 }
   0x9   : > { %443 = vperm.xlu0 (!%p168_p3), %676, %v439_v3  }
   0xd   : > { %448 = vperm.xlu0 (!%p168_p3), %676, %v440_v4  }
   0xe   : > { %s839_s12 = smov (!%p201_p4, %s691_s12), 1 }
   0xf   : > { %s649_s22 = smul.u32 288, %s839_s12  ;;  %s553_s9 = sshll.u32 %s839_s12, 4 }
  0x10   : > { %s220_s16 = scalar_lea.vmem %s833_s3, %s553_s9 }
  0x11   : > { %s760_s27 = scalar_lea.vmem %s830_s0, %s649_s22 }
  0x12   : > { %v252_v5 = vld [vmem:[%s760_s27 + $0x80] sm:$0xff]  ;;  %v253_v6 = vld [vmem:[%s760_s27 + $0x88] sm:$0xff]  ;;  %v254_v10 = vld [vmem:[%s760_s27 + $0x90] sm:$0xff] }
  0x13   : > { %v236_v7 = vld [vmem:[%s760_s27] sm:$0xff]  ;;  %v609_v8 = vpack.c.bf16 %v253_v6, %v252_v5  ;;  %v237_v9 = vld [vmem:[%s760_s27 + $0x8] sm:$0xff]  ;;  %v255_v11 = vld [vmem:[%s760_s27 + $0x98] sm:$0xff] }
  0x14   : > { %v611_v12 = vpack.c.bf16 %v237_v9, %v236_v7  ;;  %v613_v13 = vpack.c.bf16 %v255_v11, %v254_v10  ;;  %v238_v14 = vld [vmem:[%s760_s27 + $0x10] sm:$0xff]  ;;  %v239_v15 = vld [vmem:[%s760_s27 + $0x18] sm:$0xff]  ;;  %v256_v16 = vld [vmem:[%s760_s27 + $0xa0] sm:$0xff] }
  0x15   : > { %610 = vmatprep.subr.bf16.mxu0 %v609_v8  ;;  %v257_v17 = vld [vmem:[%s760_s27 + $0xa8] sm:$0xff]  ;;  %v615_v18 = vpack.c.bf16 %v239_v15, %v238_v14  ;;  %v240_v20 = vld [vmem:[%s760_s27 + $0x20] sm:$0xff]  ;;  %v258_v22 = vld [vmem:[%s760_s27 + $0xb0] sm:$0xff] }
  0x16   : > { %612 = vmatpush3.bf16.msra.mxu0 %v611_v12  ;;  %v617_v19 = vpack.c.bf16 %v257_v17, %v256_v16  ;;  %v241_v21 = vld [vmem:[%s760_s27 + $0x28] sm:$0xff]  ;;  %v259_v23 = vld [vmem:[%s760_s27 + $0xb8] sm:$0xff]  ;;  %v242_v25 = vld [vmem:[%s760_s27 + $0x30] sm:$0xff] }
  0x17   : > { %614 = vmatprep.subr.bf16.mxu0 %v613_v13  ;;  %v619_v24 = vpack.c.bf16 %v241_v21, %v240_v20  ;;  %v621_v26 = vpack.c.bf16 %v259_v23, %v258_v22  ;;  %v243_v27 = vld [vmem:[%s760_s27 + $0x38] sm:$0xff]  ;;  %v268_v28 = vld [vmem:[%s760_s27 + $0x100] sm:$0xff]  ;;  %v269_v29 = vld [vmem:[%s760_s27 + $0x108] sm:$0xff] }
  0x18   : > { %v260_v30 = vld [vmem:[%s760_s27 + $0xc0] sm:$0xff]  ;;  %v261_v31 = vld [vmem:[%s760_s27 + $0xc8] sm:$0xff]  ;;  %v641_v32 = vpack.c.bf16 %v269_v29, %v268_v28  ;;  %v270_v33 = vld [vmem:[%s760_s27 + $0x110] sm:$0xff]  ;;  %v623_v35 = vpack.c.bf16 %v243_v27, %v242_v25 }
  0x19   : > { %v271_v34 = vld [vmem:[%s760_s27 + $0x118] sm:$0xff]  ;;  %v625_v37 = vpack.c.bf16 %v261_v31, %v260_v30  ;;  %v244_v38 = vld [vmem:[%s760_s27 + $0x40] sm:$0xff]  ;;  %v245_v39 = vld [vmem:[%s760_s27 + $0x48] sm:$0xff] }
  0x1a   : > { %616 = vmatpush3.bf16.msra.mxu0 %v615_v18  ;;  %642 = vmatprep.subr.bf16.mxu1 %v641_v32  ;;  %v645_v36 = vpack.c.bf16 %v271_v34, %v270_v33  ;;  %v262_v40 = vld [vmem:[%s760_s27 + $0xd0] sm:$0xff]  ;;  %v263_v41 = vld [vmem:[%s760_s27 + $0xd8] sm:$0xff]  ;;  %v627_v42 = vpack.c.bf16 %v245_v39, %v244_v38  ;;  %v264_v47 = vld [vmem:[%s760_s27 + $0xe0] sm:$0xff] }
  0x1b   : > { %618 = vmatprep.subr.bf16.mxu0 %v617_v19  ;;  %644 = vmatpush3.bf16.msra.mxu1 %v641_v32  ;;  %v629_v43 = vpack.c.bf16 %v263_v41, %v262_v40  ;;  %v246_v44 = vld [vmem:[%s760_s27 + $0x50] sm:$0xff]  ;;  %v247_v45 = vld [vmem:[%s760_s27 + $0x58] sm:$0xff]  ;;  %v265_v48 = vld [vmem:[%s760_s27 + $0xe8] sm:$0xff] }
  0x1c   : > { %646 = vmatprep.subr.bf16.mxu1 %v645_v36  ;;  %v631_v49 = vpack.c.bf16 %v247_v45, %v246_v44  ;;  %v633_v50 = vpack.c.bf16 %v265_v48, %v264_v47  ;;  %v248_v51 = vld [vmem:[%s760_s27 + $0x60] sm:$0xff]  ;;  %v249_v52 = vld [vmem:[%s760_s27 + $0x68] sm:$0xff]  ;;  %v266_v53 = vld [vmem:[%s760_s27 + $0xf0] sm:$0xff] }
  0x1d   : > { %v267_v54 = vld [vmem:[%s760_s27 + $0xf8] sm:$0xff]  ;;  %v635_v55 = vpack.c.bf16 %v249_v52, %v248_v51  ;;  %v250_v57 = vld [vmem:[%s760_s27 + $0x70] sm:$0xff]  ;;  %v228_v5 = vld [vmem:[#allocation2] sm:$0xff] }
  0x1e   : > { %620 = vmatpush3.bf16.msra.mxu0 %v619_v24  ;;  %v637_v56 = vpack.c.bf16 %v267_v54, %v266_v53  ;;  %v251_v58 = vld [vmem:[%s760_s27 + $0x78] sm:$0xff]  ;;  %v229_v11 = vld [vmem:[#allocation2 + $0x8] sm:$0xff] }
  0x1f   : > { %622 = vmatprep.subr.bf16.mxu0 %v621_v26  ;;  %648 = vmatpush3.bf16.msra.mxu1 %v645_v36  ;;  %v639_v59 = vpack.c.bf16 %v251_v58, %v250_v57 }
  0x22   : > { %624 = vmatpush3.bf16.msra.mxu0 %v623_v35  ;;  %607 = vmatmul.mubr.msk.f32.vlgmr.msra.gmra.mrb[0].mxu1 %vm272_vm0, %v235_v46 }
  0x23   : > { %626 = vmatprep.subr.bf16.mxu0 %v625_v37 }
  0x26   : > { %628 = vmatpush3.bf16.msra.mxu0 %v627_v42 }
  0x27   : > { %630 = vmatprep.subr.bf16.mxu0 %v629_v43 }
  0x2a   : > { %632 = vmatpush3.bf16.msra.mxu0 %v631_v49 }
  0x2b   : > { %634 = vmatprep.subr.bf16.mxu0 %v633_v50 }
  0x2e   : > { %636 = vmatpush3.bf16.msra.mxu0 %v635_v55 }
  0x2f   : > { %638 = vmatprep.subr.bf16.mxu0 %v637_v56 }
  0x32   : > { %640 = vmatpush3.bf16.msra.mxu0 %v639_v59 }
  0x35   : > { %344 = vmatmul.mubr.f32.vlgmr.msra.gmra.mrb[0].mxu0 %v230_v60 }
  0x36   : > { %348 = vmatprep.mubr.f32.mxu0 %v234_v61 }
  0x39   : > { %349 = vmatmul.mubr.f32.gmra.mrb[2].mxu0 %v233_v62 }
  0x88   : > { %v444_v14 = vpop.permute.xlu0 %443 }
  0x8c   : > { %v449_v17 = vpop.permute.xlu0 %448 }
  0xf5   : > { %v608_v0 = vpop.f32.mrb[0].mxu1 }
  0xf6   : > { %v420_v1 = vpop.f32.mrb[1].mxu1 }
 0x108   : > { %v586_v2 = vpop.f32.mrb[0].mxu0 }
 0x109   : > { %v587_v3 = vpop.f32.mrb[1].mxu0 }
 0x10a   : > { %v588_v4 = vadd.f32 %v587_v3, %v586_v2 }
 0x10c   : > { %v421_v6 = vadd.f32 %v588_v4, %v420_v1  ;;  %v589_v7 = vpop.f32.mrb[2].mxu0 }
 0x10d   : > { %v590_v8 = vpop.f32.mrb[3].mxu0 }
 0x10e   : > { %v429_v9 = vadd.f32 %v421_v6, %v228_v5  ;;  %v591_v10 = vadd.f32 %v590_v8, %v589_v7 }
 0x110   : > { %432 = vst.msk [vmem:[#allocation2] sm:$0xff] %vm225_vm1, %v429_v9  ;;  %v426_v12 = vadd.f32 %v608_v0, %v591_v10 }
 0x112   : > { %v430_v13 = vadd.f32 %v426_v12, %v229_v11 }
 0x114   : > { %433 = vst.msk [vmem:[#allocation2 + $0x8] sm:$0xff] %vm225_vm1, %v430_v13 }
 0x117   : > { %v437_v15 = vld [vmem:[#allocation2] sm:$0xff] }
 0x118   : > { %v451_v16 = vadd.f32 %v444_v14, %v437_v15 }
 0x11a   : > { %453 = vst.msk [vmem:[%s220_s16] sm:$0xff] %vm225_vm1, %v451_v16 }
 0x11b   : > { %v438_v18 = vld [vmem:[#allocation2 + $0x8] sm:$0xff] }
 0x11c   : > { %v452_v19 = vadd.f32 %v449_v17, %v438_v18 }
 0x11e   : > { %454 = vst.msk [vmem:[%s220_s16 + $0x8] sm:$0xff] %vm225_vm1, %v452_v19 }
 0x11f PF: > { %s13_s14 = sadd.s32 1, %s699_s14   ;;  %s834_s12 = smov %s695_s13 }
 0x120   : > { %p10_p5 = scmp.ge.s32.totalorder %s13_s14, 4   ;;  %s835_s13 = smov %s837_s15 }
 0x122   :  { %12 = sbr.rel (!%p10_p5) target bundleno = 2 (0x2), region = 73 }

// kernel: hourglass_forward.51
= control target key start
LH: loop header
LB: loop body
LE: loop exit
PB: predicated region body
PF: predicated region fallthrough
CT: control target
= control target key end

     0   :  { %s427_s12 = smov 0   ;;  %s462_s0 = inlined_call_operand.vmem [shape: f32[32,16], index: 0, kind: input, shape index: {}]   ;;  %s463_s1 = inlined_call_operand.vmem [shape: f32[32,1], index: 1, kind: input, shape index: {}]   ;;  %s464_s2 = inlined_call_operand.vmem [shape: f32[32,1], index: 2, kind: input, shape index: {}]   ;;  %s465_s3 = inlined_call_operand.vmem [shape: f32[32,16], index: 3, kind: output, shape index: {}]  }
   0x1 LB: > { %s368_s13 = sadd.s32 4294967295, %s404_s12   ;;  %p372_p0 = scmp.ge.s32.totalorder %s404_s12, 1  ;;  %s404_s12 = sphi %s427_s12, %s13_s12  }
   0x2   : > { %p160_p1 = scmp.lt.s32.totalorder %s404_s12, 3 }
   0x4   : > { %p161_p2 = pnand %p372_p0, %p160_p1 }
   0x5   : > { %s373_s14 = sshll.u32 (!%p161_p2), %s368_s13, 1  ;;  %v406_v0 = vmov (!%p161_p2), 0   ;;  %vm220_vm0 = vcmask (!%p161_p2), 130048  }
   0x6   : > { %164 = sbr.rel (%p161_p2) target bundleno = 193 (0xc1), region = 32  ;;  %p195_p3 = scmp.lt.s32.totalorder (!%p161_p2), %s373_s14, 3  ;;  %393 = vset.pattern.permute.xlu1 (!%p161_p2), %v406_v0  ;;  %392 = vset.pattern.permute.xlu0 (!%p161_p2), %v406_v0 }
   0xd   : > { %s467_s14 = smov (!%p195_p3, %s373_s14), 3 }
   0xe   : > { %s435_s15 = sshll.u32 %s467_s14, 3 }
   0xf   : > { %s198_s18 = scalar_lea.vmem %s462_s0, %s435_s15  ;;  %s204_s21 = scalar_lea.vmem %s463_s1, %s435_s15 }
  0x10   : > { %v218_v1 = vld [vmem:[%s198_s18] sm:$0xff]  ;;  %v219_v2 = vld [vmem:[%s198_s18 + $0x8] sm:$0xff]  ;;  %s210_s24 = scalar_lea.vmem %s464_s2, %s435_s15  ;;  %s216_s27 = scalar_lea.vmem %s465_s3, %s435_s15 }
  0x11   : > { %v221_v3 = vsel %vm220_vm0, %v218_v1, 0.0  ;;  %v230_v4 = vmul.f32 %v218_v1, %v218_v1  ;;  %v231_v5 = vmul.f32 %v219_v2, %v219_v2  ;;  %v224_v7 = vsel %vm220_vm0, %v219_v2, 0.0  ;;  %v253_v9 = vld [vmem:[%s204_s21 + $0x8] sm:$0xff]  ;;  %v252_v10 = vld [vmem:[%s204_s21] sm:$0xff] }
  0x12   : > { %222 = vadd.xlane.f32.xlu0 %v221_v3  ;;  %v266_v11 = vld [vmem:[%s210_s24] sm:$0xff]  ;;  %v267_v12 = vld [vmem:[%s210_s24 + $0x8] sm:$0xff] }
  0x13   : > { %v232_v6 = vsel %vm220_vm0, %v230_v4, 0.0  ;;  %v235_v8 = vsel %vm220_vm0, %v231_v5, 0.0 }
  0x14   : > { %233 = vadd.xlane.f32.xlu1 %v232_v6 }
  0x16   : > { %225 = vadd.xlane.f32.xlu0 %v224_v7 }
  0x18   : > { %236 = vadd.xlane.f32.xlu1 %v235_v8 }
  0x29   : > { %261 = vperm.xlu1 %393, %v253_v9  }
  0x2c   : > { %256 = vperm.xlu0 %392, %v252_v10  }
  0x2d   : > { %270 = vperm.xlu1 %393, %v266_v11  }
  0x31   : > { %275 = vperm.xlu1 %393, %v267_v12  }
  0x9f   : > { %v223_v13 = vpop.xlane.xlu0 %222 }
  0xa0   : > { %v228_v14 = vmul.f32 0.0625, %v223_v13 }
  0xa1   : > { %v234_v15 = vpop.xlane.xlu1 %233 }
  0xa2   : > { %v240_v16 = vmul.f32 %v228_v14, %v228_v14  ;;  %v238_v17 = vmul.f32 0.0625, %v234_v15  ;;  %v248_v28 = vsub.f32 %v218_v1, %v228_v14 }
  0xa3   : > { %v226_v18 = vpop.xlane.xlu0 %225 }
  0xa4   : > { %v242_v19 = vsub.f32 %v238_v17, %v240_v16  ;;  %v229_v20 = vmul.f32 0.0625, %v226_v18 }
  0xa5   : > { %v237_v21 = vpop.xlane.xlu1 %236 }
  0xa6   : > { %v244_v22 = vadd.f32 1e-05, %v242_v19  ;;  %v241_v23 = vmul.f32 %v229_v20, %v229_v20  ;;  %v239_v24 = vmul.f32 0.0625, %v237_v21  ;;  %v249_v33 = vsub.f32 %v219_v2, %v229_v20 }
  0xa8   : > { %394 = vrsqrt.f32 %v244_v22  ;;  %v243_v25 = vsub.f32 %v239_v24, %v241_v23 }
  0xa9   : > { %v262_v27 = vpop.permute.xlu1 %261 }
  0xaa   : > { %v245_v26 = vadd.f32 1e-05, %v243_v25 }
  0xab   : > { %v257_v30 = vpop.permute.xlu0 %256 }
  0xac   : > { %396 = vrsqrt.f32 %v245_v26 }
  0xad   : > { %v271_v32 = vpop.permute.xlu1 %270 }
  0xb1   : > { %v276_v40 = vpop.permute.xlu1 %275 }
  0xb2   : > { %v395_v29 = vpop.eup %394 }
  0xb3   : > { %v250_v31 = vmul.f32 %v395_v29, %v248_v28 }
  0xb5   : > { %v264_v34 = vmul.f32 %v257_v30, %v250_v31 }
  0xb6   : > { %v397_v35 = vpop.eup %396 }
  0xb7   : > { %v251_v36 = vmul.f32 %v397_v35, %v249_v33  ;;  %v278_v37 = vadd.f32 %v271_v32, %v264_v34 }
  0xb9   : > { %v265_v38 = vmul.f32 %v262_v27, %v251_v36  ;;  %vm280_vm1 = vcmp.ge.f32.partialorder %v278_v37, 0.0  ;;  %v282_v39 = vmul.f32 0.01, %v278_v37 }
  0xbb   : > { %v279_v41 = vadd.f32 %v276_v40, %v265_v38  ;;  %v284_v42 = vsel %vm280_vm1, %v278_v37, %v282_v39 }
  0xbc   : > { %286 = vst.msk [vmem:[%s216_s27] sm:$0xff] %vm220_vm0, %v284_v42 }
  0xbd   : > { %vm281_vm2 = vcmp.ge.f32.partialorder %v279_v41, 0.0  ;;  %v283_v43 = vmul.f32 0.01, %v279_v41 }
  0xbf   : > { %v285_v44 = vsel %vm281_vm2, %v279_v41, %v283_v43 }
  0xc0   : > { %287 = vst.msk [vmem:[%s216_s27 + $0x8] sm:$0xff] %vm220_vm0, %v285_v44 }
  0xc1 PF: > { %s13_s12 = sadd.s32 1, %s404_s12  }
  0xc2   : > { %p10_p4 = scmp.ge.s32.totalorder %s13_s12, 4  }
  0xc4   :  { %12 = sbr.rel (!%p10_p4) target bundleno = 1 (0x1), region = 68 }

// kernel: hourglass_forward.52
= control target key start
LH: loop header
LB: loop body
LE: loop exit
PB: predicated region body
PF: predicated region fallthrough
CT: control target
= control target key end

     0   :  { %s651_s15 = smov 0   ;;  %s653_s16 = smov 0   ;;  %s753_s0 = inlined_call_operand.vmem [shape: f32[2,144,64], index: 0, kind: input, shape index: {}]   ;;  %s754_s1 = inlined_call_operand.vmem [shape: f32[16,144], index: 1, kind: input, shape index: {}]   ;;  %s755_s2 = inlined_call_operand.vmem [shape: f32[16,1], index: 2, kind: input, shape index: {}]   ;;  %s756_s3 = inlined_call_operand.vmem [shape: f32[2,16,64], index: 3, kind: input, shape index: {}]   ;;  %s757_s4 = inlined_call_operand.vmem [shape: f32[2,16,64], index: 4, kind: output, shape index: {}]  }
   0x1   :  { %s655_s17 = smov 0  }
   0x2 LB: > { %s26_s18 = sadd.s32 1, %s617_s16  ;;  %p513_p0 = scmp.ge.s32.totalorder %s621_s17, 1  ;;  %s621_s17 = sphi %s655_s17, %s14_s17   ;;  %s617_s16 = sphi %s653_s16, %s759_s16   ;;  %s613_s15 = sphi %s651_s15, %s758_s15  }
   0x3   : > { %p28_p1 = scmp.ge.s32.totalorder %s26_s18, 2  ;;  %p202_p2 = scmp.lt.s32.totalorder %s621_s17, 3 }
   0x5   : > { %s761_s18 = smov (%p28_p1, %s26_s18), 0  ;;  %p203_p3 = pnand %p513_p0, %p202_p2 }
   0x6   : > { %p243_p4 = scmp.lt.s32.totalorder (!%p203_p3), %s613_s15, 1  ;;  %v278_v0 = vld [vmem:[%s754_s1 + $0x8] sm:$0xff] (!%p203_p3)  ;;  %vm299_vm0 = vcmask (!%p203_p3), 130048   ;;  %v280_v1 = vld [vmem:[%s754_s1 + $0x18] sm:$0xff] (!%p203_p3)  ;;  %v623_v2 = vmov (!%p203_p3), 0.0|0.0   ;;  %v391_v3 = vld [vmem:[%s755_s2] sm:$0xff] (!%p203_p3) }
   0x7   : > { %206 = sbr.rel (%p203_p3) target bundleno = 283 (0x11b), region = 36  ;;  %525 = vmatprep.subr.bf16.mxu0 (!%p203_p3), %v623_v2  ;;  %552 = vmatprep.subr.bf16.mxu1 (!%p203_p3), %v623_v2  ;;  %vm272_vm1 = vcmask (!%p203_p3), 523264   ;;  %v624_v4 = vmov (!%p203_p3), 0.0   ;;  %v625_v5 = vmov (!%p203_p3), 0   ;;  %v392_v6 = vld [vmem:[%s755_s2 + $0x8] sm:$0xff] (!%p203_p3)  ;;  %v277_v34 = vld [vmem:[%s754_s1] sm:$0xff] (!%p203_p3) }
   0x8   : > { %519 = vmatprep.mubr.msk.f32.mxu0 (!%p203_p3), %vm299_vm0, %v278_v0  ;;  %520 = vmatprep.mubr.msk.f32.mxu1 (!%p203_p3), %vm299_vm0, %v280_v1  ;;  %273 = vst.msk [vmem:[#allocation2] sm:$0xff] (!%p203_p3), %vm272_vm1, %v624_v4  ;;  %274 = vst.msk [vmem:[#allocation2 + $0x8] sm:$0xff] (!%p203_p3), %vm272_vm1, %v624_v4  ;;  %v279_v35 = vld [vmem:[%s754_s1 + $0x10] sm:$0xff] (!%p203_p3) }
   0x9   : > { %598 = vset.pattern.permute.xlu0 (!%p203_p3), %v625_v5 }
   0xa   : > { %395 = vperm.xlu0 (!%p203_p3), %598, %v391_v3  }
   0xe   : > { %s763_s15 = smov (!%p243_p4, %s613_s15), 1  ;;  %400 = vperm.xlu0 %598, %v392_v6  }
   0xf   : > { %s570_s25 = smul.u32 144, %s763_s15  ;;  %v275_v36 = vld [vmem:[#allocation2] sm:$0xff]  ;;  %v276_v37 = vld [vmem:[#allocation2 + $0x8] sm:$0xff]  ;;  %s523_s9 = sshll.u32 %s763_s15, 4 }
  0x10   : > { %s262_s12 = scalar_lea.vmem %s756_s3, %s523_s9  ;;  %s267_s19 = scalar_lea.vmem %s757_s4, %s523_s9 }
  0x11   : > { %s691_s30 = scalar_lea.vmem %s753_s0, %s570_s25  ;;  %v405_v45 = vld [vmem:[%s262_s12] sm:$0xff]  ;;  %v406_v49 = vld [vmem:[%s262_s12 + $0x8] sm:$0xff] }
  0x12   : > { %v281_v7 = vld [vmem:[%s691_s30] sm:$0xff]  ;;  %v282_v8 = vld [vmem:[%s691_s30 + $0x8] sm:$0xff]  ;;  %v283_v9 = vld [vmem:[%s691_s30 + $0x10] sm:$0xff] }
  0x13   : > { %v526_v10 = vpack.c.bf16 %v282_v8, %v281_v7  ;;  %v284_v11 = vld [vmem:[%s691_s30 + $0x18] sm:$0xff]  ;;  %v285_v13 = vld [vmem:[%s691_s30 + $0x20] sm:$0xff]  ;;  %v286_v14 = vld [vmem:[%s691_s30 + $0x28] sm:$0xff] }
  0x14   : > { %v529_v12 = vpack.c.bf16 %v284_v11, %v283_v9  ;;  %v532_v15 = vpack.c.bf16 %v286_v14, %v285_v13  ;;  %v287_v16 = vld [vmem:[%s691_s30 + $0x30] sm:$0xff]  ;;  %v288_v17 = vld [vmem:[%s691_s30 + $0x38] sm:$0xff]  ;;  %v289_v19 = vld [vmem:[%s691_s30 + $0x40] sm:$0xff] }
  0x15   : > { %527 = vmatpush1.bf16.msra.mxu0 %v526_v10  ;;  %561 = vmatpush1.bf16.msra.mxu1 %v526_v10  ;;  %v535_v18 = vpack.c.bf16 %v288_v17, %v287_v16  ;;  %v290_v20 = vld [vmem:[%s691_s30 + $0x48] sm:$0xff]  ;;  %v291_v22 = vld [vmem:[%s691_s30 + $0x50] sm:$0xff]  ;;  %v292_v23 = vld [vmem:[%s691_s30 + $0x58] sm:$0xff] }
  0x16   : > { %528 = vmatprep.subr.bf16.mxu0 %v623_v2  ;;  %553 = vmatprep.subr.bf16.mxu1 %v623_v2  ;;  %v538_v21 = vpack.c.bf16 %v290_v20, %v289_v19  ;;  %v541_v24 = vpack.c.bf16 %v292_v23, %v291_v22  ;;  %v293_v25 = vld [vmem:[%s691_s30 + $0x60] sm:$0xff]  ;;  %v294_v26 = vld [vmem:[%s691_s30 + $0x68] sm:$0xff]  ;;  %v295_v28 = vld [vmem:[%s691_s30 + $0x70] sm:$0xff] }
  0x17   : > { %v544_v27 = vpack.c.bf16 %v294_v26, %v293_v25  ;;  %v296_v29 = vld [vmem:[%s691_s30 + $0x78] sm:$0xff]  ;;  %v297_v31 = vld [vmem:[%s691_s30 + $0x80] sm:$0xff]  ;;  %v298_v32 = vld [vmem:[%s691_s30 + $0x88] sm:$0xff] }
  0x18   : > { %v547_v30 = vpack.c.bf16 %v296_v29, %v295_v28  ;;  %v550_v33 = vpack.c.bf16 %v298_v32, %v297_v31 }
  0x19   : > { %530 = vmatpush1.bf16.msra.mxu0 %v529_v12  ;;  %562 = vmatpush1.bf16.msra.mxu1 %v529_v12 }
  0x1a   : > { %531 = vmatprep.subr.bf16.mxu0 %v623_v2  ;;  %554 = vmatprep.subr.bf16.mxu1 %v623_v2 }
  0x1d   : > { %533 = vmatpush1.bf16.msra.mxu0 %v532_v15  ;;  %563 = vmatpush1.bf16.msra.mxu1 %v532_v15 }
  0x1e   : > { %534 = vmatprep.subr.bf16.mxu0 %v623_v2  ;;  %555 = vmatprep.subr.bf16.mxu1 %v623_v2 }
  0x21   : > { %536 = vmatpush1.bf16.msra.mxu0 %v535_v18  ;;  %564 = vmatpush1.bf16.msra.mxu1 %v535_v18 }
  0x22   : > { %537 = vmatprep.subr.bf16.mxu0 %v623_v2  ;;  %556 = vmatprep.subr.bf16.mxu1 %v623_v2 }
  0x25   : > { %539 = vmatpush1.bf16.msra.mxu0 %v538_v21  ;;  %565 = vmatpush1.bf16.msra.mxu1 %v538_v21 }
  0x26   : > { %540 = vmatprep.subr.bf16.mxu0 %v623_v2  ;;  %557 = vmatprep.subr.bf16.mxu1 %v623_v2 }
  0x29   : > { %542 = vmatpush1.bf16.msra.mxu0 %v541_v24  ;;  %566 = vmatpush1.bf16.msra.mxu1 %v541_v24 }
  0x2a   : > { %543 = vmatprep.subr.bf16.mxu0 %v623_v2  ;;  %558 = vmatprep.subr.bf16.mxu1 %v623_v2 }
  0x2d   : > { %545 = vmatpush1.bf16.msra.mxu0 %v544_v27  ;;  %567 = vmatpush1.bf16.msra.mxu1 %v544_v27 }
  0x2e   : > { %546 = vmatprep.subr.bf16.mxu0 %v623_v2  ;;  %559 = vmatprep.subr.bf16.mxu1 %v623_v2 }
  0x31   : > { %548 = vmatpush1.bf16.msra.mxu0 %v547_v30  ;;  %568 = vmatpush1.bf16.msra.mxu1 %v547_v30 }
  0x32   : > { %549 = vmatprep.subr.bf16.mxu0 %v623_v2  ;;  %560 = vmatprep.subr.bf16.mxu1 %v623_v2 }
  0x35   : > { %551 = vmatpush1.bf16.msra.mxu0 %v550_v33  ;;  %569 = vmatpush1.bf16.msra.mxu1 %v550_v33 }
  0x38   : > { %371 = vmatmul.mubr.f32.vlgmr.msra.gmra.mrb[0].mxu0 %v277_v34  ;;  %376 = vmatmul.mubr.f32.vlgmr.msra.gmra.mrb[0].mxu1 %v279_v35 }
  0x89   : > { %v396_v44 = vpop.permute.xlu0 %395 }
  0x8d   : > { %v401_v47 = vpop.permute.xlu0 %400 }
 0x10b   : > { %v372_v38 = vpop.f32.mrb[0].mxu0  ;;  %v377_v39 = vpop.f32.mrb[0].mxu1 }
 0x10c   : > { %v381_v40 = vadd.f32 %v372_v38, %v275_v36  ;;  %v382_v41 = vadd.f32 %v377_v39, %v276_v37  ;;  %v374_v42 = vpop.f32.mrb[1].mxu0  ;;  %v379_v43 = vpop.f32.mrb[1].mxu1 }
 0x10e   : > { %384 = vst.msk [vmem:[#allocation2] sm:$0xff] %vm272_vm1, %v381_v40  ;;  %385 = vst.msk [vmem:[#allocation2 + $0x8] sm:$0xff] %vm272_vm1, %v382_v41 }
 0x115   : > { %v389_v46 = vld [vmem:[#allocation2] sm:$0xff]  ;;  %v390_v48 = vld [vmem:[#allocation2 + $0x8] sm:$0xff] }
 0x116   : > { %v403_v50 = vadd.f32 %v396_v44, %v389_v46  ;;  %v404_v51 = vadd.f32 %v401_v47, %v390_v48 }
 0x118   : > { %v407_v52 = vadd.f32 %v405_v45, %v403_v50  ;;  %v408_v53 = vadd.f32 %v406_v49, %v404_v51 }
 0x11a   : > { %409 = vst.msk [vmem:[%s267_s19] sm:$0xff] %vm272_vm1, %v407_v52  ;;  %410 = vst.msk [vmem:[%s267_s19 + $0x8] sm:$0xff] %vm272_vm1, %v408_v53 }
 0x11b PF: > { %s14_s17 = sadd.s32 1, %s621_s17   ;;  %s758_s15 = smov %s617_s16 }
 0x11c   : > { %p11_p5 = scmp.ge.s32.totalorder %s14_s17, 4   ;;  %s759_s16 = smov %s761_s18 }
 0x11e   :  { %13 = sbr.rel (!%p11_p5) target bundleno = 2 (0x2), region = 80 }

// kernel: hourglass_forward.54
= control target key start
LH: loop header
LB: loop body
LE: loop exit
PB: predicated region body
PF: predicated region fallthrough
CT: control target
= control target key end

     0   :  { %s499_s12 = smov 0   ;;  %s570_s0 = inlined_call_operand.vmem [shape: f32[64,64], index: 0, kind: input, shape index: {}]   ;;  %s571_s1 = inlined_call_operand.vmem [shape: f32[64,1], index: 1, kind: input, shape index: {}]   ;;  %s572_s2 = inlined_call_operand.vmem [shape: f32[64,1], index: 2, kind: input, shape index: {}]   ;;  %s573_s3 = inlined_call_operand.vmem [shape: f32[64,64], index: 3, kind: output, shape index: {}]  }
   0x1 LB: > { %s436_s13 = sadd.s32 4294967295, %s476_s12   ;;  %p440_p0 = scmp.ge.s32.totalorder %s476_s12, 1  ;;  %s476_s12 = sphi %s499_s12, %s13_s12  }
   0x2   : > { %p160_p1 = scmp.lt.s32.totalorder %s476_s12, 3 }
   0x4   : > { %p161_p2 = pnand %p440_p0, %p160_p1 }
   0x5   : > { %s441_s14 = sshll.u32 (!%p161_p2), %s436_s13, 2  ;;  %v478_v0 = vmov (!%p161_p2), 0   ;;  %vm222_vm0 = vcmask (!%p161_p2), 523264  }
   0x6   : > { %164 = sbr.rel (%p161_p2) target bundleno = 206 (0xce), region = 32  ;;  %p195_p3 = scmp.lt.s32.totalorder (!%p161_p2), %s441_s14, 7  ;;  %461 = vset.pattern.permute.xlu1 (!%p161_p2), %v478_v0  ;;  %460 = vset.pattern.permute.xlu0 (!%p161_p2), %v478_v0 }
   0xd   : > { %s575_s14 = smov (!%p195_p3, %s441_s14), 7 }
   0xe   : > { %s507_s15 = sshll.u32 %s575_s14, 3 }
   0xf   : > { %s198_s18 = scalar_lea.vmem %s570_s0, %s507_s15  ;;  %s204_s21 = scalar_lea.vmem %s571_s1, %s507_s15 }
  0x10   : > { %v513_v1 = vld [vmem:[%s198_s18 + $0x10] sm:$0xff]  ;;  %v515_v2 = vld [vmem:[%s198_s18] sm:$0xff]  ;;  %v517_v3 = vld [vmem:[%s198_s18 + $0x8] sm:$0xff]  ;;  %s210_s24 = scalar_lea.vmem %s572_s2, %s507_s15  ;;  %s555_s27 = scalar_lea.vmem %s573_s3, %s507_s15 }
  0x11   : > { %v229_v4 = vsel %vm222_vm0, %v513_v1, 0.0  ;;  %v223_v5 = vsel %vm222_vm0, %v515_v2, 0.0  ;;  %v240_v6 = vmul.f32 %v515_v2, %v515_v2  ;;  %v226_v8 = vsel %vm222_vm0, %v517_v3, 0.0  ;;  %v530_v10 = vld [vmem:[%s198_s18 + $0x18] sm:$0xff]  ;;  %v285_v17 = vld [vmem:[%s204_s21 + $0x8] sm:$0xff]  ;;  %v286_v18 = vld [vmem:[%s204_s21 + $0x10] sm:$0xff] }
  0x12   : > { %230 = vadd.xlane.f32.xlu1 %v229_v4  ;;  %224 = vadd.xlane.f32.xlu0 %v223_v5  ;;  %v241_v9 = vmul.f32 %v517_v3, %v517_v3  ;;  %v232_v12 = vsel %vm222_vm0, %v530_v10, 0.0  ;;  %v243_v13 = vmul.f32 %v530_v10, %v530_v10  ;;  %v242_v14 = vmul.f32 %v513_v1, %v513_v1  ;;  %v284_v19 = vld [vmem:[%s204_s21] sm:$0xff]  ;;  %v287_v21 = vld [vmem:[%s204_s21 + $0x18] sm:$0xff]  ;;  %v313_v22 = vld [vmem:[%s210_s24 + $0x8] sm:$0xff] }
  0x13   : > { %v244_v7 = vsel %vm222_vm0, %v240_v6, 0.0  ;;  %v312_v20 = vld [vmem:[%s210_s24] sm:$0xff]  ;;  %v314_v23 = vld [vmem:[%s210_s24 + $0x10] sm:$0xff]  ;;  %v315_v24 = vld [vmem:[%s210_s24 + $0x18] sm:$0xff] }
  0x14   : > { %v247_v11 = vsel %vm222_vm0, %v241_v9, 0.0  ;;  %v253_v15 = vsel %vm222_vm0, %v243_v13, 0.0  ;;  %v250_v16 = vsel %vm222_vm0, %v242_v14, 0.0 }
  0x16   : > { %245 = vadd.xlane.f32.xlu1 %v244_v7  ;;  %227 = vadd.xlane.f32.xlu0 %v226_v8 }
  0x1a   : > { %248 = vadd.xlane.f32.xlu1 %v247_v11  ;;  %233 = vadd.xlane.f32.xlu0 %v232_v12 }
  0x1e   : > { %254 = vadd.xlane.f32.xlu1 %v253_v15  ;;  %251 = vadd.xlane.f32.xlu0 %v250_v16 }
  0x2f   : > { %295 = vperm.xlu1 %461, %v285_v17  }
  0x33   : > { %300 = vperm.xlu1 %461, %v286_v18  }
  0x34   : > { %290 = vperm.xlu0 %460, %v284_v19  }
  0x37   : > { %318 = vperm.xlu1 %461, %v312_v20  }
  0x3b   : > { %305 = vperm.xlu1 %461, %v287_v21  }
  0x3f   : > { %323 = vperm.xlu1 %461, %v313_v22  }
  0x43   : > { %328 = vperm.xlu1 %461, %v314_v23  }
  0x47   : > { %333 = vperm.xlu1 %461, %v315_v24  }
  0x9f   : > { %v231_v25 = vpop.xlane.xlu1 %230  ;;  %v225_v26 = vpop.xlane.xlu0 %224 }
  0xa0   : > { %v236_v27 = vmul.f32 0.015625, %v225_v26  ;;  %v238_v37 = vmul.f32 0.015625, %v231_v25 }
  0xa2   : > { %v260_v28 = vmul.f32 %v236_v27, %v236_v27  ;;  %v262_v45 = vmul.f32 %v238_v37, %v238_v37  ;;  %v276_v54 = vsub.f32 %v515_v2, %v236_v27  ;;  %v278_v5 = vsub.f32 %v513_v1, %v238_v37 }
  0xa3   : > { %v246_v29 = vpop.xlane.xlu1 %245  ;;  %v228_v30 = vpop.xlane.xlu0 %227 }
  0xa4   : > { %v256_v31 = vmul.f32 0.015625, %v246_v29  ;;  %v237_v32 = vmul.f32 0.015625, %v228_v30 }
  0xa6   : > { %v264_v33 = vsub.f32 %v256_v31, %v260_v28  ;;  %v261_v34 = vmul.f32 %v237_v32, %v237_v32  ;;  %v277_v62 = vsub.f32 %v517_v3, %v237_v32 }
  0xa7   : > { %v249_v35 = vpop.xlane.xlu1 %248  ;;  %v234_v36 = vpop.xlane.xlu0 %233 }
  0xa8   : > { %v268_v38 = vadd.f32 1e-05, %v264_v33  ;;  %v257_v39 = vmul.f32 0.015625, %v249_v35  ;;  %v239_v40 = vmul.f32 0.015625, %v234_v36 }
  0xaa   : > { %462 = vrsqrt.f32 %v268_v38  ;;  %v265_v41 = vsub.f32 %v257_v39, %v261_v34  ;;  %v263_v42 = vmul.f32 %v239_v40, %v239_v40  ;;  %v279_v12 = vsub.f32 %v530_v10, %v239_v40 }
  0xab   : > { %v255_v43 = vpop.xlane.xlu1 %254  ;;  %v252_v44 = vpop.xlane.xlu0 %251 }
  0xac   : > { %v269_v46 = vadd.f32 1e-05, %v265_v41  ;;  %v259_v47 = vmul.f32 0.015625, %v255_v43  ;;  %v258_v48 = vmul.f32 0.015625, %v252_v44 }
  0xae   : > { %464 = vrsqrt.f32 %v269_v46  ;;  %v267_v49 = vsub.f32 %v259_v47, %v263_v42  ;;  %v266_v50 = vsub.f32 %v258_v48, %v262_v45 }
  0xaf   : > { %v296_v51 = vpop.permute.xlu1 %295 }
  0xb0   : > { %v270_v52 = vadd.f32 1e-05, %v266_v50  ;;  %v271_v53 = vadd.f32 1e-05, %v267_v49 }
  0xb2   : > { %466 = vrsqrt.f32 %v270_v52 }
  0xb3   : > { %v301_v55 = vpop.permute.xlu1 %300  ;;  %v291_v57 = vpop.permute.xlu0 %290  ;;  %468 = vrsqrt.f32 %v271_v53 }
  0xb4   : > { %v463_v56 = vpop.eup %462 }
  0xb5   : > { %v280_v58 = vmul.f32 %v463_v56, %v276_v54 }
  0xb7   : > { %v308_v59 = vmul.f32 %v291_v57, %v280_v58  ;;  %v319_v60 = vpop.permute.xlu1 %318 }
  0xb8   : > { %v465_v61 = vpop.eup %464 }
  0xb9   : > { %v336_v63 = vadd.f32 %v319_v60, %v308_v59  ;;  %v281_v0 = vmul.f32 %v465_v61, %v277_v62 }
  0xbb   : > { %vm340_vm1 = vcmp.ge.f32.partialorder %v336_v63, 0.0  ;;  %v344_v2 = vmul.f32 0.01, %v336_v63  ;;  %v306_v4 = vpop.permute.xlu1 %305  ;;  %v309_v8 = vmul.f32 %v296_v51, %v281_v0 }
  0xbc   : > { %v467_v6 = vpop.eup %466 }
  0xbd   : > { %v348_v7 = vsel %vm340_vm1, %v336_v63, %v344_v2  ;;  %v282_v9 = vmul.f32 %v467_v6, %v278_v5  ;;  %v469_v3 = vpop.eup %468 }
  0xbe   : > { %352 = vst.msk [vmem:[%s555_s27] sm:$0xff] %vm222_vm0, %v348_v7  ;;  %v283_v15 = vmul.f32 %v469_v3, %v279_v12 }
  0xbf   : > { %v324_v11 = vpop.permute.xlu1 %323  ;;  %v310_v14 = vmul.f32 %v301_v55, %v282_v9 }
  0xc0   : > { %v337_v13 = vadd.f32 %v324_v11, %v309_v8  ;;  %v311_v19 = vmul.f32 %v306_v4, %v283_v15 }
  0xc2   : > { %vm341_vm2 = vcmp.ge.f32.partialorder %v337_v13, 0.0  ;;  %v345_v16 = vmul.f32 0.01, %v337_v13 }
  0xc3   : > { %v329_v17 = vpop.permute.xlu1 %328 }
  0xc4   : > { %v349_v1 = vsel %vm341_vm2, %v337_v13, %v345_v16  ;;  %v338_v18 = vadd.f32 %v329_v17, %v310_v14 }
  0xc5   : > { %353 = vst.msk [vmem:[%s555_s27 + $0x8] sm:$0xff] %vm222_vm0, %v349_v1 }
  0xc6   : > { %vm342_vm3 = vcmp.ge.f32.partialorder %v338_v18, 0.0  ;;  %v346_v20 = vmul.f32 0.01, %v338_v18 }
  0xc7   : > { %v334_v21 = vpop.permute.xlu1 %333 }
  0xc8   : > { %v350_v22 = vsel %vm342_vm3, %v338_v18, %v346_v20  ;;  %v339_v23 = vadd.f32 %v334_v21, %v311_v19 }
  0xc9   : > { %354 = vst.msk [vmem:[%s555_s27 + $0x10] sm:$0xff] %vm222_vm0, %v350_v22 }
  0xca   : > { %vm343_vm4 = vcmp.ge.f32.partialorder %v339_v23, 0.0  ;;  %v347_v10 = vmul.f32 0.01, %v339_v23 }
  0xcc   : > { %v351_v24 = vsel %vm343_vm4, %v339_v23, %v347_v10 }
  0xcd   : > { %355 = vst.msk [vmem:[%s555_s27 + $0x18] sm:$0xff] %vm222_vm0, %v351_v24 }
  0xce PF: > { %s13_s12 = sadd.s32 1, %s476_s12  }
  0xcf   : > { %p10_p4 = scmp.ge.s32.totalorder %s13_s12, 4  }
  0xd1   :  { %12 = sbr.rel (!%p10_p4) target bundleno = 1 (0x1), region = 68 }

// kernel: hourglass_forward.55
= control target key start
LH: loop header
LB: loop body
LE: loop exit
PB: predicated region body
PF: predicated region fallthrough
CT: control target
= control target key end

     0   :  { %s721_s12 = smov 0   ;;  %s723_s13 = smov 0   ;;  %s844_s0 = inlined_call_operand.vmem [shape: f32[2,288,256], index: 0, kind: input, shape index: {}]   ;;  %s845_s1 = inlined_call_operand.vmem [shape: f32[8,288], index: 1, kind: input, shape index: {}]   ;;  %s846_s2 = inlined_call_operand.vmem [shape: f32[8,1], index: 2, kind: input, shape index: {}]   ;;  %s847_s3 = inlined_call_operand.vmem [shape: f32[2,8,256], index: 3, kind: output, shape index: {}]  }
   0x1   :  { %s725_s14 = smov 0  }
   0x2 LB: > { %s25_s15 = sadd.s32 1, %s693_s13  ;;  %p565_p0 = scmp.ge.s32.totalorder %s697_s14, 1  ;;  %s697_s14 = sphi %s725_s14, %s13_s14   ;;  %s693_s13 = sphi %s723_s13, %s849_s13   ;;  %s689_s12 = sphi %s721_s12, %s848_s12  }
   0x3   : > { %p27_p1 = scmp.ge.s32.totalorder %s25_s15, 2  ;;  %p168_p2 = scmp.lt.s32.totalorder %s697_s14, 3 }
   0x5   : > { %s851_s15 = smov (%p27_p1, %s25_s15), 0  ;;  %p169_p3 = pnand %p565_p0, %p168_p2 }
   0x6   : > { %p203_p4 = scmp.lt.s32.totalorder (!%p169_p3), %s689_s12, 1  ;;  %v233_v0 = vld [vmem:[%s845_s1 + $0x8] sm:$0xff] (!%p169_p3)  ;;  %v699_v1 = vmov (!%p169_p3), 0.0   ;;  %v462_v2 = vld [vmem:[%s846_s2] sm:$0xff] (!%p169_p3)  ;;  %v700_v3 = vmov (!%p169_p3), 0   ;;  %vm307_vm0 = vcmask (!%p169_p3), 261120  }
   0x7   : > { %172 = sbr.rel (%p169_p3) target bundleno = 303 (0x12f), region = 32  ;;  %446 = vmatprep.mubr.f32.mxu0 (!%p169_p3), %v699_v1  ;;  %375 = vmatprep.mubr.f32.mxu1 (!%p169_p3), %v233_v0  ;;  %v234_v1 = vld [vmem:[%s845_s1 + $0x10] sm:$0xff] (!%p169_p3) }
   0x8   : > { %674 = vset.pattern.permute.xlu0 (!%p169_p3), %v700_v3 }
   0x9   : > { %465 = vperm.xlu0 (!%p169_p3), %674, %v462_v2  }
   0xe   : > { %s853_s12 = smov (!%p203_p4, %s689_s12), 1 }
   0xf   : > { %s647_s20 = smul.u32 576, %s853_s12  ;;  %s572_s28 = sshll.u32 %s853_s12, 4 }
  0x10   : > { %s223_s4 = scalar_lea.vmem %s847_s3, %s572_s28 }
  0x11   : > { %s751_s23 = scalar_lea.vmem %s844_s0, %s647_s20 }
  0x12   : > { %v236_v4 = vld [vmem:[%s751_s23 + $0x8] sm:$0xff]  ;;  %v238_v5 = vld [vmem:[%s751_s23 + $0x18] sm:$0xff]  ;;  %v235_v6 = vld [vmem:[%s751_s23] sm:$0xff] }
  0x13   : > { %v573_v7 = vpack.c.bf16 %v238_v5, %v236_v4  ;;  %v237_v8 = vld [vmem:[%s751_s23 + $0x10] sm:$0xff]  ;;  %v240_v9 = vld [vmem:[%s751_s23 + $0x28] sm:$0xff]  ;;  %v242_v10 = vld [vmem:[%s751_s23 + $0x38] sm:$0xff] }
  0x14   : > { %v575_v11 = vpack.c.bf16 %v237_v8, %v235_v6  ;;  %v577_v12 = vpack.c.bf16 %v242_v10, %v240_v9  ;;  %v239_v13 = vld [vmem:[%s751_s23 + $0x20] sm:$0xff]  ;;  %v241_v14 = vld [vmem:[%s751_s23 + $0x30] sm:$0xff]  ;;  %v244_v15 = vld [vmem:[%s751_s23 + $0x48] sm:$0xff] }
  0x15   : > { %574 = vmatprep.subr.bf16.mxu1 %v573_v7  ;;  %v246_v16 = vld [vmem:[%s751_s23 + $0x58] sm:$0xff]  ;;  %v579_v17 = vpack.c.bf16 %v241_v14, %v239_v13  ;;  %v243_v19 = vld [vmem:[%s751_s23 + $0x40] sm:$0xff]  ;;  %v245_v20 = vld [vmem:[%s751_s23 + $0x50] sm:$0xff] }
  0x16   : > { %576 = vmatpush1.bf16.msra.mxu1 %v575_v11  ;;  %v581_v18 = vpack.c.bf16 %v246_v16, %v244_v15  ;;  %v248_v21 = vld [vmem:[%s751_s23 + $0x68] sm:$0xff]  ;;  %v250_v22 = vld [vmem:[%s751_s23 + $0x78] sm:$0xff]  ;;  %v583_v23 = vpack.c.bf16 %v245_v20, %v243_v19  ;;  %v247_v25 = vld [vmem:[%s751_s23 + $0x60] sm:$0xff] }
  0x17   : > { %578 = vmatprep.subr.bf16.mxu1 %v577_v12  ;;  %v585_v24 = vpack.c.bf16 %v250_v22, %v248_v21  ;;  %v249_v26 = vld [vmem:[%s751_s23 + $0x70] sm:$0xff]  ;;  %v252_v27 = vld [vmem:[%s751_s23 + $0x88] sm:$0xff]  ;;  %v254_v28 = vld [vmem:[%s751_s23 + $0x98] sm:$0xff] }
  0x18   : > { %v587_v29 = vpack.c.bf16 %v249_v26, %v247_v25  ;;  %v589_v30 = vpack.c.bf16 %v254_v28, %v252_v27  ;;  %v251_v31 = vld [vmem:[%s751_s23 + $0x80] sm:$0xff]  ;;  %v253_v32 = vld [vmem:[%s751_s23 + $0x90] sm:$0xff]  ;;  %v256_v33 = vld [vmem:[%s751_s23 + $0xa8] sm:$0xff] }
  0x19   : > { %v258_v34 = vld [vmem:[%s751_s23 + $0xb8] sm:$0xff]  ;;  %v591_v35 = vpack.c.bf16 %v253_v32, %v251_v31  ;;  %v255_v37 = vld [vmem:[%s751_s23 + $0xa0] sm:$0xff]  ;;  %v257_v38 = vld [vmem:[%s751_s23 + $0xb0] sm:$0xff] }
  0x1a   : > { %580 = vmatpush1.bf16.msra.mxu1 %v579_v17  ;;  %v593_v36 = vpack.c.bf16 %v258_v34, %v256_v33  ;;  %v260_v39 = vld [vmem:[%s751_s23 + $0xc8] sm:$0xff]  ;;  %v262_v40 = vld [vmem:[%s751_s23 + $0xd8] sm:$0xff]  ;;  %v595_v43 = vpack.c.bf16 %v257_v38, %v255_v37  ;;  %v259_v44 = vld [vmem:[%s751_s23 + $0xc0] sm:$0xff] }
  0x1b   : > { %582 = vmatprep.subr.bf16.mxu1 %v581_v18  ;;  %v300_v41 = vld [vmem:[%s751_s23 + $0x208] sm:$0xff]  ;;  %v302_v42 = vld [vmem:[%s751_s23 + $0x218] sm:$0xff]  ;;  %v299_v46 = vld [vmem:[%s751_s23 + $0x200] sm:$0xff]  ;;  %v597_v48 = vpack.c.bf16 %v262_v40, %v260_v39 }
  0x1c   : > { %v637_v45 = vpack.c.bf16 %v302_v42, %v300_v41  ;;  %v301_v47 = vld [vmem:[%s751_s23 + $0x210] sm:$0xff]  ;;  %v304_v51 = vld [vmem:[%s751_s23 + $0x228] sm:$0xff]  ;;  %v306_v52 = vld [vmem:[%s751_s23 + $0x238] sm:$0xff] }
  0x1d   : > { %v261_v49 = vld [vmem:[%s751_s23 + $0xd0] sm:$0xff]  ;;  %v639_v50 = vpack.c.bf16 %v301_v47, %v299_v46  ;;  %v264_v53 = vld [vmem:[%s751_s23 + $0xe8] sm:$0xff]  ;;  %v266_v54 = vld [vmem:[%s751_s23 + $0xf8] sm:$0xff]  ;;  %v641_v55 = vpack.c.bf16 %v306_v52, %v304_v51 }
  0x1e   : > { %584 = vmatpush1.bf16.msra.mxu1 %v583_v23  ;;  %638 = vmatprep.subr.bf16.mxu0 %v637_v45  ;;  %v303_v56 = vld [vmem:[%s751_s23 + $0x220] sm:$0xff]  ;;  %v305_v57 = vld [vmem:[%s751_s23 + $0x230] sm:$0xff]  ;;  %v599_v58 = vpack.c.bf16 %v261_v49, %v259_v44  ;;  %v601_v60 = vpack.c.bf16 %v266_v54, %v264_v53  ;;  %v268_v63 = vld [vmem:[%s751_s23 + $0x108] sm:$0xff] }
  0x1f   : > { %586 = vmatprep.subr.bf16.mxu1 %v585_v24  ;;  %640 = vmatpush1.bf16.msra.mxu0 %v639_v50  ;;  %v643_v59 = vpack.c.bf16 %v305_v57, %v303_v56  ;;  %v263_v61 = vld [vmem:[%s751_s23 + $0xe0] sm:$0xff]  ;;  %v265_v62 = vld [vmem:[%s751_s23 + $0xf0] sm:$0xff]  ;;  %v270_v0 = vld [vmem:[%s751_s23 + $0x118] sm:$0xff] }
  0x20   : > { %642 = vmatprep.subr.bf16.mxu0 %v641_v55  ;;  %v603_v2 = vpack.c.bf16 %v265_v62, %v263_v61  ;;  %v605_v3 = vpack.c.bf16 %v270_v0, %v268_v63  ;;  %v267_v4 = vld [vmem:[%s751_s23 + $0x100] sm:$0xff]  ;;  %v269_v5 = vld [vmem:[%s751_s23 + $0x110] sm:$0xff]  ;;  %v272_v6 = vld [vmem:[%s751_s23 + $0x128] sm:$0xff] }
  0x21   : > { %v274_v7 = vld [vmem:[%s751_s23 + $0x138] sm:$0xff]  ;;  %v607_v8 = vpack.c.bf16 %v269_v5, %v267_v4  ;;  %v271_v10 = vld [vmem:[%s751_s23 + $0x120] sm:$0xff]  ;;  %v273_v11 = vld [vmem:[%s751_s23 + $0x130] sm:$0xff] }
  0x22   : > { %588 = vmatpush1.bf16.msra.mxu1 %v587_v29  ;;  %v609_v9 = vpack.c.bf16 %v274_v7, %v272_v6  ;;  %v276_v12 = vld [vmem:[%s751_s23 + $0x148] sm:$0xff]  ;;  %v278_v13 = vld [vmem:[%s751_s23 + $0x158] sm:$0xff]  ;;  %v611_v14 = vpack.c.bf16 %v273_v11, %v271_v10  ;;  %v275_v16 = vld [vmem:[%s751_s23 + $0x140] sm:$0xff] }
  0x23   : > { %590 = vmatprep.subr.bf16.mxu1 %v589_v30  ;;  %644 = vmatpush1.bf16.msra.mxu0 %v643_v59  ;;  %v613_v15 = vpack.c.bf16 %v278_v13, %v276_v12  ;;  %v277_v17 = vld [vmem:[%s751_s23 + $0x150] sm:$0xff]  ;;  %v280_v18 = vld [vmem:[%s751_s23 + $0x168] sm:$0xff]  ;;  %v282_v19 = vld [vmem:[%s751_s23 + $0x178] sm:$0xff] }
  0x24   : > { %v615_v20 = vpack.c.bf16 %v277_v17, %v275_v16  ;;  %v617_v21 = vpack.c.bf16 %v282_v19, %v280_v18  ;;  %v279_v22 = vld [vmem:[%s751_s23 + $0x160] sm:$0xff]  ;;  %v281_v23 = vld [vmem:[%s751_s23 + $0x170] sm:$0xff]  ;;  %v284_v24 = vld [vmem:[%s751_s23 + $0x188] sm:$0xff] }
  0x25   : > { %v286_v25 = vld [vmem:[%s751_s23 + $0x198] sm:$0xff]  ;;  %v619_v26 = vpack.c.bf16 %v281_v23, %v279_v22  ;;  %v283_v28 = vld [vmem:[%s751_s23 + $0x180] sm:$0xff]  ;;  %v285_v29 = vld [vmem:[%s751_s23 + $0x190] sm:$0xff] }
  0x26   : > { %592 = vmatpush1.bf16.msra.mxu1 %v591_v35  ;;  %569 = vmatmul.mubr.msk.f32.vlgmr.msra.gmra.mrb[0].mxu0 %vm307_vm0, %v234_v1  ;;  %v621_v27 = vpack.c.bf16 %v286_v25, %v284_v24  ;;  %v288_v30 = vld [vmem:[%s751_s23 + $0x1a8] sm:$0xff]  ;;  %v290_v31 = vld [vmem:[%s751_s23 + $0x1b8] sm:$0xff]  ;;  %v623_v32 = vpack.c.bf16 %v285_v29, %v283_v28  ;;  %v287_v34 = vld [vmem:[%s751_s23 + $0x1a0] sm:$0xff] }
  0x27   : > { %594 = vmatprep.subr.bf16.mxu1 %v593_v36  ;;  %v625_v33 = vpack.c.bf16 %v290_v31, %v288_v30  ;;  %v289_v35 = vld [vmem:[%s751_s23 + $0x1b0] sm:$0xff]  ;;  %v292_v36 = vld [vmem:[%s751_s23 + $0x1c8] sm:$0xff]  ;;  %v294_v37 = vld [vmem:[%s751_s23 + $0x1d8] sm:$0xff] }
  0x28   : > { %v627_v38 = vpack.c.bf16 %v289_v35, %v287_v34  ;;  %v629_v39 = vpack.c.bf16 %v294_v37, %v292_v36  ;;  %v291_v40 = vld [vmem:[%s751_s23 + $0x1c0] sm:$0xff]  ;;  %v293_v41 = vld [vmem:[%s751_s23 + $0x1d0] sm:$0xff]  ;;  %v296_v42 = vld [vmem:[%s751_s23 + $0x1e8] sm:$0xff] }
  0x29   : > { %v631_v44 = vpack.c.bf16 %v293_v41, %v291_v40  ;;  %v295_v46 = vld [vmem:[%s751_s23 + $0x1e0] sm:$0xff]  ;;  %v297_v47 = vld [vmem:[%s751_s23 + $0x1f0] sm:$0xff] }
  0x2a   : > { %596 = vmatpush1.bf16.msra.mxu1 %v595_v43  ;;  %v298_v43 = vld [vmem:[%s751_s23 + $0x1f8] sm:$0xff]  ;;  %v232_v49 = vld [vmem:[%s845_s1] sm:$0xff] }
  0x2b   : > { %598 = vmatprep.subr.bf16.mxu1 %v597_v48  ;;  %v633_v45 = vpack.c.bf16 %v298_v43, %v296_v42  ;;  %v635_v48 = vpack.c.bf16 %v297_v47, %v295_v46 }
  0x2e   : > { %600 = vmatpush1.bf16.msra.mxu1 %v599_v58 }
  0x2f   : > { %602 = vmatprep.subr.bf16.mxu1 %v601_v60 }
  0x32   : > { %604 = vmatpush1.bf16.msra.mxu1 %v603_v2 }
  0x33   : > { %606 = vmatprep.subr.bf16.mxu1 %v605_v3 }
  0x36   : > { %608 = vmatpush1.bf16.msra.mxu1 %v607_v8 }
  0x37   : > { %610 = vmatprep.subr.bf16.mxu1 %v609_v9 }
  0x3a   : > { %612 = vmatpush1.bf16.msra.mxu1 %v611_v14 }
  0x3b   : > { %614 = vmatprep.subr.bf16.mxu1 %v613_v15 }
  0x3e   : > { %616 = vmatpush1.bf16.msra.mxu1 %v615_v20 }
  0x3f   : > { %618 = vmatprep.subr.bf16.mxu1 %v617_v21 }
  0x42   : > { %620 = vmatpush1.bf16.msra.mxu1 %v619_v26 }
  0x43   : > { %622 = vmatprep.subr.bf16.mxu1 %v621_v27 }
  0x46   : > { %624 = vmatpush1.bf16.msra.mxu1 %v623_v32 }
  0x47   : > { %626 = vmatprep.subr.bf16.mxu1 %v625_v33 }
  0x4a   : > { %628 = vmatpush1.bf16.msra.mxu1 %v627_v38 }
  0x4b   : > { %630 = vmatprep.subr.bf16.mxu1 %v629_v39 }
  0x4e   : > { %632 = vmatpush1.bf16.msra.mxu1 %v631_v44 }
  0x4f   : > { %634 = vmatprep.subr.bf16.mxu1 %v633_v45 }
  0x52   : > { %636 = vmatpush1.bf16.msra.mxu1 %v635_v48 }
  0x55   : > { %376 = vmatmul.mubr.f32.vlgmr.msra.gmra.mrb[0].mxu1 %v232_v49 }
  0x88   : > { %v466_v53 = vpop.permute.xlu0 %465 }
  0xf9   : > { %v448_v50 = vpop.f32.mrb[0].mxu0 }
  0xfa   : > { %v450_v51 = vpop.f32.mrb[1].mxu0 }
 0x128   : > { %v377_v52 = vpop.f32.mrb[0].mxu1 }
 0x129   : > { %v449_v54 = vadd.f32 %v448_v50, %v377_v52  ;;  %v379_v55 = vpop.f32.mrb[1].mxu1 }
 0x12a   : > { %v451_v56 = vadd.f32 %v450_v51, %v379_v55 }
 0x12b   : > { %v468_v57 = vadd.f32 %v466_v53, %v449_v54 }
 0x12c   : > { %v469_v58 = vadd.f32 %v466_v53, %v451_v56 }
 0x12d   : > { %470 = vst [vmem:[%s223_s4] sm:$0xff] %v468_v57 }
 0x12e   : > { %471 = vst [vmem:[%s223_s4 + $0x8] sm:$0xff] %v469_v58 }
 0x12f PF: > { %s13_s14 = sadd.s32 1, %s697_s14   ;;  %s848_s12 = smov %s693_s13 }
 0x130   : > { %p10_p5 = scmp.ge.s32.totalorder %s13_s14, 4   ;;  %s849_s13 = smov %s851_s15 }
 0x132   :  { %12 = sbr.rel (!%p10_p5) target bundleno = 2 (0x2), region = 73 }

// kernel: hourglass_forward.60
= control target key start
LH: loop header
LB: loop body
LE: loop exit
PB: predicated region body
PF: predicated region fallthrough
CT: control target
= control target key end

     0   :  { %s366_s12 = smov 0   ;;  %s398_s0 = inlined_call_operand.vmem [shape: f32[16,64], index: 0, kind: input, shape index: {}]   ;;  %s399_s1 = inlined_call_operand.vmem [shape: f32[16,1], index: 1, kind: input, shape index: {}]   ;;  %s400_s2 = inlined_call_operand.vmem [shape: f32[16,1], index: 2, kind: input, shape index: {}]   ;;  %s401_s3 = inlined_call_operand.vmem [shape: f32[16,64], index: 3, kind: output, shape index: {}]  }
   0x1 LB: > { %s313_s13 = sadd.s32 4294967295, %s343_s12   ;;  %p317_p0 = scmp.ge.s32.totalorder %s343_s12, 1  ;;  %s343_s12 = sphi %s366_s12, %s13_s12  }
   0x2   : > { %p154_p1 = scmp.lt.s32.totalorder %s343_s12, 3 }
   0x4   : > { %p155_p2 = pnand %p317_p0, %p154_p1 }
   0x5   : > { %p184_p3 = scmp.lt.s32.totalorder (!%p155_p2), %s313_s13, 1  ;;  %v345_v0 = vmov (!%p155_p2), 0   ;;  %vm201_vm0 = vcmask (!%p155_p2), 523264  }
   0x6   : > { %158 = sbr.rel (%p155_p2) target bundleno = 191 (0xbf), region = 32  ;;  %333 = vset.pattern.permute.xlu1 (!%p155_p2), %v345_v0  ;;  %334 = vset.pattern.permute.xlu0 (!%p155_p2), %v345_v0 }
   0xd   : > { %s403_s13 = smov (!%p184_p3, %s313_s13), 1 }
   0xe   : > { %s374_s14 = sshll.u32 %s403_s13, 3 }
   0xf   : > { %s187_s17 = scalar_lea.vmem %s398_s0, %s374_s14  ;;  %s191_s20 = scalar_lea.vmem %s399_s1, %s374_s14 }
  0x10   : > { %v200_v1 = vld [vmem:[%s187_s17] sm:$0xff]  ;;  %s195_s23 = scalar_lea.vmem %s400_s2, %s374_s14  ;;  %s199_s26 = scalar_lea.vmem %s401_s3, %s374_s14 }
  0x11   : > { %v218_v2 = vld [vmem:[%s191_s20] sm:$0xff]  ;;  %v202_v3 = vsel %vm201_vm0, %v200_v1, 0.0  ;;  %v207_v4 = vmul.f32 %v200_v1, %v200_v1 }
  0x12   : > { %221 = vperm.xlu1 %333, %v218_v2   ;;  %203 = vadd.xlane.f32.xlu0 %v202_v3  ;;  %v225_v5 = vld [vmem:[%s195_s23] sm:$0xff] }
  0x13   : > { %v208_v6 = vsel %vm201_vm0, %v207_v4, 0.0 }
  0x16   : > { %228 = vperm.xlu1 %333, %v225_v5   ;;  %209 = vadd.xlane.f32.xlu0 %v208_v6 }
  0x91   : > { %v222_v14 = vpop.permute.xlu1 %221 }
  0x95   : > { %v229_v19 = vpop.permute.xlu1 %228 }
  0x9f   : > { %v204_v7 = vpop.xlane.xlu0 %203 }
  0xa0   : > { %v206_v8 = vmul.f32 0.015625, %v204_v7 }
  0xa2   : > { %v212_v10 = vmul.f32 %v206_v8, %v206_v8  ;;  %v216_v15 = vsub.f32 %v200_v1, %v206_v8 }
  0xa3   : > { %v210_v9 = vpop.xlane.xlu0 %209 }
  0xa4   : > { %v211_v11 = vmul.f32 0.015625, %v210_v9 }
  0xa6   : > { %v213_v12 = vsub.f32 %v211_v11, %v212_v10 }
  0xa8   : > { %v214_v13 = vadd.f32 1e-05, %v213_v12 }
  0xaa   : > { %335 = vrsqrt.f32 %v214_v13 }
  0xb4   : > { %v336_v16 = vpop.eup %335 }
  0xb5   : > { %v217_v17 = vmul.f32 %v336_v16, %v216_v15 }
  0xb7   : > { %v224_v18 = vmul.f32 %v222_v14, %v217_v17 }
  0xb9   : > { %v231_v20 = vadd.f32 %v229_v19, %v224_v18 }
  0xbb   : > { %vm232_vm1 = vcmp.ge.f32.partialorder %v231_v20, 0.0  ;;  %v233_v21 = vmul.f32 0.01, %v231_v20 }
  0xbd   : > { %v234_v22 = vsel %vm232_vm1, %v231_v20, %v233_v21 }
  0xbe   : > { %235 = vst.msk [vmem:[%s199_s26] sm:$0xff] %vm201_vm0, %v234_v22 }
  0xbf PF: > { %s13_s12 = sadd.s32 1, %s343_s12  }
  0xc0   : > { %p10_p4 = scmp.ge.s32.totalorder %s13_s12, 4  }
  0xc2   :  { %12 = sbr.rel (!%p10_p4) target bundleno = 1 (0x1), region = 68 }

// kernel: hourglass_forward.58
= control target key start
LH: loop header
LB: loop body
LE: loop exit
PB: predicated region body
PF: predicated region fallthrough
CT: control target
= control target key end

     0   :  { %s685_s12 = smov 0   ;;  %s687_s13 = smov 0   ;;  %s775_s0 = inlined_call_operand.vmem [shape: f32[2,288,64], index: 0, kind: input, shape index: {}]   ;;  %s776_s1 = inlined_call_operand.vmem [shape: f32[8,288], index: 1, kind: input, shape index: {}]   ;;  %s777_s2 = inlined_call_operand.vmem [shape: f32[8,1], index: 2, kind: input, shape index: {}]   ;;  %s778_s3 = inlined_call_operand.vmem [shape: f32[2,8,64], index: 3, kind: output, shape index: {}]  }
   0x1   :  { %s689_s14 = smov 0  }
   0x2 LB: > { %s25_s15 = sadd.s32 1, %s655_s13  ;;  %p512_p0 = scmp.ge.s32.totalorder %s659_s14, 1  ;;  %s659_s14 = sphi %s689_s14, %s13_s14   ;;  %s655_s13 = sphi %s687_s13, %s780_s13   ;;  %s651_s12 = sphi %s685_s12, %s779_s12  }
   0x3   : > { %p27_p1 = scmp.ge.s32.totalorder %s25_s15, 2  ;;  %p167_p2 = scmp.lt.s32.totalorder %s659_s14, 3 }
   0x5   : > { %s782_s15 = smov (%p27_p1, %s25_s15), 0  ;;  %p168_p3 = pnand %p512_p0, %p167_p2 }
   0x6   : > { %p200_p4 = scmp.lt.s32.totalorder (!%p168_p3), %s651_s12, 1  ;;  %v227_v0 = vld [vmem:[%s776_s1 + $0x8] sm:$0xff] (!%p168_p3)  ;;  %vm223_vm0 = vcmask (!%p168_p3), 523264   ;;  %v661_v1 = vmov (!%p168_p3), 0.0|0.0   ;;  %v662_v2 = vmov (!%p168_p3), 0.0   ;;  %v416_v3 = vld [vmem:[%s777_s2] sm:$0xff] (!%p168_p3) }
   0x7   : > { %171 = sbr.rel (%p168_p3) target bundleno = 283 (0x11b), region = 32  ;;  %601 = vmatprep.subr.bf16.mxu1 (!%p168_p3), %v661_v1  ;;  %333 = vmatprep.mubr.f32.mxu0 (!%p168_p3), %v227_v0  ;;  %224 = vst.msk [vmem:[#allocation2] sm:$0xff] (!%p168_p3), %vm223_vm0, %v662_v2  ;;  %vm663_vm1 = vmmov (!%p168_p3), 0   ;;  %v664_v4 = vmov (!%p168_p3), 0   ;;  %v228_v43 = vld [vmem:[%s776_s1 + $0x10] sm:$0xff] (!%p168_p3)  ;;  %vm265_vm2 = vcmask (!%p168_p3), 261120  }
   0x8   : > { %566 = vmatprep.mubr.msk.f32.mxu1 (!%p168_p3), %vm663_vm1, %v662_v2  ;;  %636 = vset.pattern.permute.xlu0 (!%p168_p3), %v664_v4  ;;  %v226_v60 = vld [vmem:[%s776_s1] sm:$0xff] (!%p168_p3) }
   0x9   : > { %419 = vperm.xlu0 (!%p168_p3), %636, %v416_v3  }
   0xe   : > { %s784_s12 = smov (!%p200_p4, %s651_s12), 1  ;;  %v225_v2 = vld [vmem:[#allocation2] sm:$0xff] }
   0xf   : > { %s607_s20 = smul.u32 288, %s784_s12  ;;  %s514_s28 = sshll.u32 %s784_s12, 3 }
  0x10   : > { %s218_s4 = scalar_lea.vmem %s778_s3, %s514_s28 }
  0x11   : > { %s716_s23 = scalar_lea.vmem %s775_s0, %s607_s20 }
  0x12   : > { %v245_v5 = vld [vmem:[%s716_s23 + $0x80] sm:$0xff]  ;;  %v246_v6 = vld [vmem:[%s716_s23 + $0x88] sm:$0xff]  ;;  %v247_v10 = vld [vmem:[%s716_s23 + $0x90] sm:$0xff] }
  0x13   : > { %v229_v7 = vld [vmem:[%s716_s23] sm:$0xff]  ;;  %v569_v8 = vpack.c.bf16 %v246_v6, %v245_v5  ;;  %v230_v9 = vld [vmem:[%s716_s23 + $0x8] sm:$0xff]  ;;  %v248_v11 = vld [vmem:[%s716_s23 + $0x98] sm:$0xff] }
  0x14   : > { %v571_v12 = vpack.c.bf16 %v230_v9, %v229_v7  ;;  %v573_v13 = vpack.c.bf16 %v248_v11, %v247_v10  ;;  %v231_v14 = vld [vmem:[%s716_s23 + $0x10] sm:$0xff]  ;;  %v232_v15 = vld [vmem:[%s716_s23 + $0x18] sm:$0xff]  ;;  %v249_v16 = vld [vmem:[%s716_s23 + $0xa0] sm:$0xff] }
  0x15   : > { %570 = vmatprep.subr.bf16.mxu0 %v569_v8  ;;  %v250_v17 = vld [vmem:[%s716_s23 + $0xa8] sm:$0xff]  ;;  %v575_v18 = vpack.c.bf16 %v232_v15, %v231_v14  ;;  %v233_v20 = vld [vmem:[%s716_s23 + $0x20] sm:$0xff]  ;;  %v251_v22 = vld [vmem:[%s716_s23 + $0xb0] sm:$0xff] }
  0x16   : > { %572 = vmatpush3.bf16.msra.mxu0 %v571_v12  ;;  %v577_v19 = vpack.c.bf16 %v250_v17, %v249_v16  ;;  %v234_v21 = vld [vmem:[%s716_s23 + $0x28] sm:$0xff]  ;;  %v252_v23 = vld [vmem:[%s716_s23 + $0xb8] sm:$0xff]  ;;  %v235_v25 = vld [vmem:[%s716_s23 + $0x30] sm:$0xff] }
  0x17   : > { %574 = vmatprep.subr.bf16.mxu0 %v573_v13  ;;  %v579_v24 = vpack.c.bf16 %v234_v21, %v233_v20  ;;  %v581_v26 = vpack.c.bf16 %v252_v23, %v251_v22  ;;  %v236_v27 = vld [vmem:[%s716_s23 + $0x38] sm:$0xff]  ;;  %v261_v28 = vld [vmem:[%s716_s23 + $0x100] sm:$0xff]  ;;  %v262_v29 = vld [vmem:[%s716_s23 + $0x108] sm:$0xff] }
  0x18   : > { %v253_v30 = vld [vmem:[%s716_s23 + $0xc0] sm:$0xff]  ;;  %v254_v31 = vld [vmem:[%s716_s23 + $0xc8] sm:$0xff]  ;;  %v602_v32 = vpack.c.bf16 %v262_v29, %v261_v28  ;;  %v263_v33 = vld [vmem:[%s716_s23 + $0x110] sm:$0xff]  ;;  %v583_v35 = vpack.c.bf16 %v236_v27, %v235_v25 }
  0x19   : > { %v264_v34 = vld [vmem:[%s716_s23 + $0x118] sm:$0xff]  ;;  %v585_v37 = vpack.c.bf16 %v254_v31, %v253_v30  ;;  %v237_v38 = vld [vmem:[%s716_s23 + $0x40] sm:$0xff]  ;;  %v238_v39 = vld [vmem:[%s716_s23 + $0x48] sm:$0xff] }
  0x1a   : > { %576 = vmatpush3.bf16.msra.mxu0 %v575_v18  ;;  %603 = vmatpush3.bf16.msra.mxu1 %v602_v32  ;;  %v605_v36 = vpack.c.bf16 %v264_v34, %v263_v33  ;;  %v255_v40 = vld [vmem:[%s716_s23 + $0xd0] sm:$0xff]  ;;  %v256_v41 = vld [vmem:[%s716_s23 + $0xd8] sm:$0xff]  ;;  %v587_v42 = vpack.c.bf16 %v238_v39, %v237_v38  ;;  %v257_v47 = vld [vmem:[%s716_s23 + $0xe0] sm:$0xff] }
  0x1b   : > { %578 = vmatprep.subr.bf16.mxu0 %v577_v19  ;;  %604 = vmatprep.subr.bf16.mxu1 %v661_v1  ;;  %v589_v44 = vpack.c.bf16 %v256_v41, %v255_v40  ;;  %v239_v45 = vld [vmem:[%s716_s23 + $0x50] sm:$0xff]  ;;  %v240_v46 = vld [vmem:[%s716_s23 + $0x58] sm:$0xff]  ;;  %v258_v48 = vld [vmem:[%s716_s23 + $0xe8] sm:$0xff] }
  0x1c   : > { %v591_v49 = vpack.c.bf16 %v240_v46, %v239_v45  ;;  %v593_v50 = vpack.c.bf16 %v258_v48, %v257_v47  ;;  %v241_v51 = vld [vmem:[%s716_s23 + $0x60] sm:$0xff]  ;;  %v242_v52 = vld [vmem:[%s716_s23 + $0x68] sm:$0xff]  ;;  %v259_v53 = vld [vmem:[%s716_s23 + $0xf0] sm:$0xff] }
  0x1d   : > { %v260_v54 = vld [vmem:[%s716_s23 + $0xf8] sm:$0xff]  ;;  %v595_v55 = vpack.c.bf16 %v242_v52, %v241_v51  ;;  %v243_v57 = vld [vmem:[%s716_s23 + $0x70] sm:$0xff] }
  0x1e   : > { %580 = vmatpush3.bf16.msra.mxu0 %v579_v24  ;;  %606 = vmatpush3.bf16.msra.mxu1 %v605_v36  ;;  %v597_v56 = vpack.c.bf16 %v260_v54, %v259_v53  ;;  %v244_v58 = vld [vmem:[%s716_s23 + $0x78] sm:$0xff] }
  0x1f   : > { %582 = vmatprep.subr.bf16.mxu0 %v581_v26  ;;  %v599_v59 = vpack.c.bf16 %v244_v58, %v243_v57 }
  0x21   : > { %567 = vmatmul.mubr.msk.f32.vlgmr.msra.gmra.mrb[0].mxu1 %vm265_vm2, %v228_v43 }
  0x22   : > { %584 = vmatpush3.bf16.msra.mxu0 %v583_v35 }
  0x23   : > { %586 = vmatprep.subr.bf16.mxu0 %v585_v37 }
  0x26   : > { %588 = vmatpush3.bf16.msra.mxu0 %v587_v42 }
  0x27   : > { %590 = vmatprep.subr.bf16.mxu0 %v589_v44 }
  0x2a   : > { %592 = vmatpush3.bf16.msra.mxu0 %v591_v49 }
  0x2b   : > { %594 = vmatprep.subr.bf16.mxu0 %v593_v50 }
  0x2e   : > { %596 = vmatpush3.bf16.msra.mxu0 %v595_v55 }
  0x2f   : > { %598 = vmatprep.subr.bf16.mxu0 %v597_v56 }
  0x32   : > { %600 = vmatpush3.bf16.msra.mxu0 %v599_v59 }
  0x35   : > { %334 = vmatmul.mubr.f32.vlgmr.msra.gmra.mrb[0].mxu0 %v226_v60 }
  0x88   : > { %v420_v5 = vpop.permute.xlu0 %419 }
  0xf4   : > { %v405_v61 = vpop.f32.mrb[0].mxu1 }
  0xf5   : > { %v568_v62 = vpop.f32.mrb[1].mxu1 }
 0x108   : > { %v550_v63 = vpop.f32.mrb[0].mxu0 }
 0x109   : > { %v551_v0 = vpop.f32.mrb[1].mxu0 }
 0x10a   : > { %v552_v1 = vadd.f32 %v551_v0, %v550_v63 }
 0x10c   : > { %v406_v3 = vadd.f32 %v552_v1, %v405_v61 }
 0x10e   : > { %v409_v4 = vadd.f32 %v406_v3, %v225_v2 }
 0x110   : > { %411 = vst.msk [vmem:[#allocation2] sm:$0xff] %vm223_vm0, %v409_v4 }
 0x117   : > { %v415_v6 = vld [vmem:[#allocation2] sm:$0xff] }
 0x118   : > { %v422_v7 = vadd.f32 %v420_v5, %v415_v6 }
 0x11a   : > { %423 = vst.msk [vmem:[%s218_s4] sm:$0xff] %vm223_vm0, %v422_v7 }
 0x11b PF: > { %s13_s14 = sadd.s32 1, %s659_s14   ;;  %s779_s12 = smov %s655_s13 }
 0x11c   : > { %p10_p5 = scmp.ge.s32.totalorder %s13_s14, 4   ;;  %s780_s13 = smov %s782_s15 }
 0x11e   :  { %12 = sbr.rel (!%p10_p5) target bundleno = 2 (0x2), region = 73 }

// kernel: hourglass_forward.61
= control target key start
LH: loop header
LB: loop body
LE: loop exit
PB: predicated region body
PF: predicated region fallthrough
CT: control target
= control target key end

     0   :  { %s602_s15 = smov 0   ;;  %s604_s16 = smov 0   ;;  %s668_s0 = inlined_call_operand.vmem [shape: f32[2,72,256], index: 0, kind: input, shape index: {}]   ;;  %s669_s1 = inlined_call_operand.vmem [shape: f32[8,72], index: 1, kind: input, shape index: {}]   ;;  %s670_s2 = inlined_call_operand.vmem [shape: f32[8,1], index: 2, kind: input, shape index: {}]   ;;  %s671_s3 = inlined_call_operand.vmem [shape: f32[2,8,256], index: 3, kind: input, shape index: {}]   ;;  %s672_s4 = inlined_call_operand.vmem [shape: f32[2,8,256], index: 4, kind: output, shape index: {}]  }
   0x1   :  { %s606_s17 = smov 0  }
   0x2 LB: > { %s26_s18 = sadd.s32 1, %s569_s16  ;;  %p496_p0 = scmp.ge.s32.totalorder %s573_s17, 1  ;;  %s573_s17 = sphi %s606_s17, %s14_s17   ;;  %s569_s16 = sphi %s604_s16, %s674_s16   ;;  %s565_s15 = sphi %s602_s15, %s673_s15  }
   0x3   : > { %p28_p1 = scmp.ge.s32.totalorder %s26_s18, 2  ;;  %p201_p2 = scmp.lt.s32.totalorder %s573_s17, 3 }
   0x5   : > { %s676_s18 = smov (%p28_p1, %s26_s18), 0  ;;  %p202_p3 = pnand %p496_p0, %p201_p2 }
   0x6   : > { %p242_p4 = scmp.lt.s32.totalorder (!%p202_p3), %s565_s15, 1  ;;  %v377_v0 = vld [vmem:[%s670_s2] sm:$0xff] (!%p202_p3)  ;;  %v575_v1 = vmov (!%p202_p3), 0.0   ;;  %v576_v2 = vmov (!%p202_p3), 0   ;;  %vm293_vm0 = vcmask (!%p202_p3), 588800  }
   0x7   : > { %205 = sbr.rel (%p202_p3) target bundleno = 257 (0x101), region = 36  ;;  %361 = vmatprep.mubr.f32.mxu0 (!%p202_p3), %v575_v1  ;;  %550 = vset.pattern.permute.xlu0 (!%p202_p3), %v576_v2  ;;  %v274_v29 = vld [vmem:[%s669_s1] sm:$0xff] (!%p202_p3) }
   0x8   : > { %380 = vperm.xlu0 (!%p202_p3), %550, %v377_v0  }
   0xe   : > { %s678_s15 = smov (!%p242_p4, %s565_s15), 1 }
   0xf   : > { %s523_s21 = smul.u32 144, %s678_s15  ;;  %s505_s27 = sshll.u32 %s678_s15, 4 }
  0x10   : > { %s260_s30 = scalar_lea.vmem %s671_s3, %s505_s27  ;;  %s265_s7 = scalar_lea.vmem %s672_s4, %s505_s27 }
  0x11   : > { %s629_s24 = scalar_lea.vmem %s668_s0, %s523_s21  ;;  %v385_v32 = vld [vmem:[%s260_s30] sm:$0xff]  ;;  %v386_v35 = vld [vmem:[%s260_s30 + $0x8] sm:$0xff] }
  0x12   : > { %v276_v3 = vld [vmem:[%s629_s24 + $0x8] sm:$0xff]  ;;  %v278_v4 = vld [vmem:[%s629_s24 + $0x18] sm:$0xff]  ;;  %v275_v5 = vld [vmem:[%s629_s24] sm:$0xff] }
  0x13   : > { %v507_v6 = vpack.c.bf16 %v278_v4, %v276_v3  ;;  %v277_v7 = vld [vmem:[%s629_s24 + $0x10] sm:$0xff]  ;;  %v280_v8 = vld [vmem:[%s629_s24 + $0x28] sm:$0xff]  ;;  %v282_v9 = vld [vmem:[%s629_s24 + $0x38] sm:$0xff] }
  0x14   : > { %v509_v10 = vpack.c.bf16 %v277_v7, %v275_v5  ;;  %v511_v11 = vpack.c.bf16 %v282_v9, %v280_v8  ;;  %v279_v12 = vld [vmem:[%s629_s24 + $0x20] sm:$0xff]  ;;  %v281_v13 = vld [vmem:[%s629_s24 + $0x30] sm:$0xff]  ;;  %v284_v14 = vld [vmem:[%s629_s24 + $0x48] sm:$0xff] }
  0x15   : > { %508 = vmatprep.subr.bf16.mxu0 %v507_v6  ;;  %v286_v15 = vld [vmem:[%s629_s24 + $0x58] sm:$0xff]  ;;  %v513_v16 = vpack.c.bf16 %v281_v13, %v279_v12  ;;  %v283_v18 = vld [vmem:[%s629_s24 + $0x40] sm:$0xff]  ;;  %v285_v19 = vld [vmem:[%s629_s24 + $0x50] sm:$0xff] }
  0x16   : > { %510 = vmatpush1.bf16.msra.mxu0 %v509_v10  ;;  %v515_v17 = vpack.c.bf16 %v286_v15, %v284_v14  ;;  %v288_v20 = vld [vmem:[%s629_s24 + $0x68] sm:$0xff]  ;;  %v290_v21 = vld [vmem:[%s629_s24 + $0x78] sm:$0xff]  ;;  %v517_v22 = vpack.c.bf16 %v285_v19, %v283_v18  ;;  %v287_v24 = vld [vmem:[%s629_s24 + $0x60] sm:$0xff] }
  0x17   : > { %512 = vmatprep.subr.bf16.mxu0 %v511_v11  ;;  %v519_v23 = vpack.c.bf16 %v290_v21, %v288_v20  ;;  %v289_v25 = vld [vmem:[%s629_s24 + $0x70] sm:$0xff]  ;;  %v292_v27 = vld [vmem:[%s629_s24 + $0x88] sm:$0xff]  ;;  %v291_v28 = vld [vmem:[%s629_s24 + $0x80] sm:$0xff] }
  0x18   : > { %v521_v26 = vpack.c.bf16 %v289_v25, %v287_v24 }
  0x1a   : > { %514 = vmatpush1.bf16.msra.mxu0 %v513_v16 }
  0x1b   : > { %516 = vmatprep.subr.bf16.mxu0 %v515_v17 }
  0x1e   : > { %518 = vmatpush1.bf16.msra.mxu0 %v517_v22 }
  0x1f   : > { %520 = vmatprep.subr.bf16.mxu0 %v519_v23 }
  0x22   : > { %522 = vmatpush1.bf16.msra.mxu0 %v521_v26 }
  0x23   : > { %313 = vmatprep.subr.mxu0 %v292_v27 }
  0x26   : > { %314 = vmatpush1.msra.mxu0 %v291_v28 }
  0x27   : > { %502 = vmatmul.mubr.msk.f32.vlgmr.msra.gmra.mrb[0].mxu0 %vm293_vm0, %v274_v29 }
  0x87   : > { %v381_v30 = vpop.permute.xlu0 %380 }
  0xfa   : > { %v363_v31 = vpop.f32.mrb[0].mxu0 }
  0xfb   : > { %v383_v33 = vadd.f32 %v381_v30, %v363_v31  ;;  %v365_v34 = vpop.f32.mrb[1].mxu0 }
  0xfc   : > { %v384_v36 = vadd.f32 %v381_v30, %v365_v34 }
  0xfd   : > { %v387_v37 = vadd.f32 %v385_v32, %v383_v33 }
  0xfe   : > { %v388_v38 = vadd.f32 %v386_v35, %v384_v36 }
  0xff   : > { %389 = vst [vmem:[%s265_s7] sm:$0xff] %v387_v37 }
 0x100   : > { %390 = vst [vmem:[%s265_s7 + $0x8] sm:$0xff] %v388_v38 }
 0x101 PF: > { %s14_s17 = sadd.s32 1, %s573_s17   ;;  %s673_s15 = smov %s569_s16 }
 0x102   : > { %p11_p5 = scmp.ge.s32.totalorder %s14_s17, 4   ;;  %s674_s16 = smov %s676_s18 }
 0x104   :  { %13 = sbr.rel (!%p11_p5) target bundleno = 2 (0x2), region = 80 }

</bundles_post_ra>
